<compile_context>
chip_gen: v5e
topology: v5e:2x2
jax: 0.10.0
libtpu: 0.0.40
codegen_flags: <defaults>
</compile_context>

<pallas_src>
import functools
import math

import jax
import jax.numpy as jnp
from jax.experimental import pallas as pl
from jax.experimental.pallas import tpu as pltpu


def _conv_adain_kernel(x_ref, w_ref, ss_ref, o_ref, stack_ref, *,
                       D, H, W, eps, slope):
    """Fused conv3x3x3 + LeakyReLU + adaptive instance norm for one batch element.

    x_ref    : (1, C_in, S)   input volume, spatial flattened onto lanes
    w_ref    : (C_out, K)     conv weights [27*C_in taps | bias | zero pad]
    ss_ref   : (1, C_out, 2)  per-instance style (scale, shift)
    o_ref    : (1, C_out, S)  output
    stack_ref: (K, S) f32     VMEM scratch: im2col stack fed to the MXU
    """
    C_in = x_ref.shape[1]
    C_out = o_ref.shape[1]
    S = x_ref.shape[2]
    K = stack_ref.shape[0]
    HW = H * W

    x = x_ref[0].astype(jnp.float32)                      # (C_in, S)

    # ---- per-lane (d, h, w) coordinates, derived in-kernel (no mask operand).
    lane = jax.lax.broadcasted_iota(jnp.int32, (1, S), 1).astype(jnp.float32)
    d = jnp.floor(lane / float(HW))
    rem = lane - d * float(HW)
    h = jnp.floor(rem / float(W))
    w = rem - h * float(W)

    one = jnp.ones((1, S), jnp.float32)
    # Per-axis boundary masks for tap offsets {-1, 0, +1} (index 1 == no mask).
    md = (jnp.where(d >= 1.0, 1.0, 0.0), one, jnp.where(d <= D - 2.0, 1.0, 0.0))
    mh = (jnp.where(h >= 1.0, 1.0, 0.0), one, jnp.where(h <= H - 2.0, 1.0, 0.0))
    mw = (jnp.where(w >= 1.0, 1.0, 0.0), one, jnp.where(w <= W - 2.0, 1.0, 0.0))

    # ---- build the im2col stack: row t*C_in + ci = tap t of input channel ci.
    t = 0
    for kd in range(3):
        for kh in range(3):
            m_dh = None
            if kd != 1:
                m_dh = md[kd]
            if kh != 1:
                m_dh = mh[kh] if m_dh is None else m_dh * mh[kh]
            for kw in range(3):
                off = (kd - 1) * HW + (kh - 1) * W + (kw - 1)
                shift = (-off) % S
                x_sh = pltpu.roll(x, shift=shift, axis=1) if shift != 0 else x
                mask = m_dh
                if kw != 1:
                    mask = mw[kw] if mask is None else mask * mw[kw]
                if mask is not None:
                    x_sh = x_sh * mask
                r0 = t * C_in
                stack_ref[r0:r0 + C_in, :] = x_sh
                t += 1

    n_rows = 27 * C_in
    stack_ref[n_rows:n_rows + 1, :] = one                  # bias row (weight col = conv bias)
    if K > n_rows + 1:                                     # keep pad rows exactly zero
        stack_ref[n_rows + 1:K, :] = jnp.zeros((K - n_rows - 1, S), jnp.float32)

    # ---- conv + bias as ONE MXU matmul with fp32 contraction precision.
    y = jnp.dot(w_ref[...].astype(jnp.float32), stack_ref[...],
                preferred_element_type=jnp.float32,
                precision=jax.lax.Precision.HIGHEST)       # (C_out, S)

    # LeakyReLU(0.2)
    y = jnp.maximum(y, slope * y)

    # ---- instance norm: one pass (sum, sum-of-squares), rsqrt on the EUP.
    inv_n = 1.0 / S
    s1 = jnp.sum(y, axis=1, keepdims=True)                 # (C_out, 1)
    s2 = jnp.sum(y * y, axis=1, keepdims=True)             # (C_out, 1)
    mean = s1 * inv_n
    var = s2 * inv_n - mean * mean
    inv_std = jax.lax.rsqrt(var + eps)

    ss = ss_ref[0].astype(jnp.float32)                     # (C_out, 2)
    scale = ss[:, 0:1] * inv_std                           # (C_out, 1)
    shift = ss[:, 1:2] - scale * mean                      # (C_out, 1)
    o_ref[...] = (scale * y + shift)[None].astype(o_ref.dtype)


def conv_instance_norm_3d(x, latent, conv_w, conv_b, aff_w, aff_b, *,
                          eps=1e-8, slope=0.2):
    """x: (N, C_in, D, H, W); latent: (N, L). Returns (N, C_out, D, H, W)."""
    N, C_in, D, H, W = x.shape
    C_out = conv_w.shape[0]
    S = D * H * W
    K = ((27 * C_in + 1 + 127) // 128) * 128               # contraction dim, lane-aligned

    # Free contiguous reshape only; spatial on lanes.
    x2 = x.reshape(N, C_in, S)

    # One (C_out, K) weight tile: tap-major / in-channel-minor, bias column, zero pad.
    w_mat = jnp.transpose(conv_w, (0, 2, 3, 4, 1)).reshape(C_out, 27 * C_in)
    w_aug = jnp.concatenate(
        [w_mat.astype(jnp.float32),
         conv_b[:, None].astype(jnp.float32),
         jnp.zeros((C_out, K - 27 * C_in - 1), jnp.float32)], axis=1)   # (C_out, K)

    # Tiny per-instance style affine precomputed; merged (scale, shift) operand.
    style = latent @ aff_w.T + aff_b                        # (N, 2*C_out)
    ss = jnp.stack([style[:, :C_out], style[:, C_out:]], axis=-1)       # (N, C_out, 2)

    kernel = functools.partial(_conv_adain_kernel, D=D, H=H, W=W, eps=eps, slope=slope)

    out_flat = pl.pallas_call(
        kernel,
        out_shape=jax.ShapeDtypeStruct((N, C_out, S), x.dtype),
        grid_spec=pltpu.PrefetchScalarGridSpec(
            num_scalar_prefetch=0,
            grid=(N,),
            in_specs=[
                pl.BlockSpec((1, C_in, S), lambda n: (n, 0, 0)),
                pl.BlockSpec((C_out, K), lambda n: (0, 0)),
                pl.BlockSpec((1, C_out, 2), lambda n: (n, 0, 0)),
            ],
            out_specs=pl.BlockSpec((1, C_out, S), lambda n: (n, 0, 0)),
            scratch_shapes=[pltpu.VMEM((K, S), jnp.float32)],
        ),
        compiler_params=pltpu.CompilerParams(
            dimension_semantics=("parallel",)),
    )(x2, w_aug, ss)

    return out_flat.reshape(N, C_out, D, H, W)


class ConvInstanceNorm3d:
    """JAX/Pallas port of muvo ConvInstanceNorm3d."""

    def __init__(self, in_channels, out_channels, latent_n_channels, key, epsilon=1e-8):
        self.in_channels = in_channels
        self.out_channels = out_channels
        self.latent_n_channels = latent_n_channels
        self.epsilon = epsilon
        k1, k2, k3, k4 = jax.random.split(key, 4)
        fan_in = in_channels * 27
        bound = 1.0 / math.sqrt(fan_in)
        self.conv_w = jax.random.uniform(
            k1, (out_channels, in_channels, 3, 3, 3), jnp.float32, -bound, bound)
        self.conv_b = jax.random.uniform(
            k2, (out_channels,), jnp.float32, -bound, bound)
        lbound = 1.0 / math.sqrt(latent_n_channels)
        self.aff_w = jax.random.uniform(
            k3, (2 * out_channels, latent_n_channels), jnp.float32, -lbound, lbound)
        self.aff_b = jax.random.uniform(
            k4, (2 * out_channels,), jnp.float32, -lbound, lbound)

    def __call__(self, x, w):
        return conv_instance_norm_3d(x, w, self.conv_w, self.conv_b,
                                     self.aff_w, self.aff_b, eps=self.epsilon)


def _reference(x, latent, conv_w, conv_b, aff_w, aff_b, eps=1e-8, slope=0.2):
    """Plain-JAX reference of the PyTorch forward."""
    y = jax.lax.conv_general_dilated(
        x, conv_w, window_strides=(1, 1, 1),
        padding=((1, 1), (1, 1), (1, 1)),
        dimension_numbers=("NCDHW", "OIDHW", "NCDHW"),
        precision=jax.lax.Precision.HIGHEST)
    y = y + conv_b[None, :, None, None, None]
    y = jnp.maximum(y, slope * y)
    mean = jnp.mean(y, axis=(2, 3, 4), keepdims=True)
    yc = y - mean
    std = jnp.sqrt(jnp.mean(yc * yc, axis=(2, 3, 4), keepdims=True) + eps)
    yn = yc / std
    C_out = conv_w.shape[0]
    style = latent @ aff_w.T + aff_b
    scale = style[:, :C_out][:, :, None, None, None]
    shift = style[:, C_out:][:, :, None, None, None]
    return scale * yn + shift


if __name__ == "__main__":
    key = jax.random.PRNGKey(0)
    k_param, kx, kw = jax.random.split(key, 3)

    batch, in_channels, out_channels, latent_n_channels = 2, 4, 8, 16
    D = H = W = 8   # S = D*H*W = 512 lanes (multiple of 128)

    module = ConvInstanceNorm3d(in_channels, out_channels, latent_n_channels, k_param)

    x = jax.random.normal(kx, (batch, in_channels, D, H, W), jnp.float32)
    w_latent = jax.random.normal(kw, (batch, latent_n_channels), jnp.float32)

    out = module(x, w_latent)
    jax.block_until_ready(out)

    ref = _reference(x, w_latent, module.conv_w, module.conv_b,
                     module.aff_w, module.aff_b, eps=module.epsilon)

    assert out.shape == (batch, out_channels, D, H, W)
    max_err = float(jnp.max(jnp.abs(out - ref)))
    assert jnp.allclose(out, ref, atol=1e-4, rtol=1e-4), f"max_err={max_err}"

    print("KERNEL_OK")
</pallas_src>

<mosaic_0001>
module attributes {stable_mosaic.version = 11 : i64} {
  func.func @_conv_adain_kernel(%arg0: i32, %arg1: memref<1x4x512xf32, #tpu.memory_space<vmem>>, %arg2: memref<8x128xf32, #tpu.memory_space<vmem>>, %arg3: memref<1x8x2xf32, #tpu.memory_space<vmem>>, %arg4: memref<1x8x512xf32, #tpu.memory_space<vmem>>, %arg5: memref<128x512xf32, #tpu.memory_space<vmem>>) attributes {dimension_semantics = [#tpu.dimension_semantics<parallel>], iteration_bounds = array<i64: 2>, scalar_prefetch = 0 : i64, scratch_operands = 1 : i64, tpu.core_type = #tpu.core_type<tc>, window_params = [{transform_indices = @transform_0, window_bounds = array<i64: 1, 4, 512>}, {pipeline_mode = #tpu.pipeline_mode<synchronous>, transform_indices = @transform_1, window_bounds = array<i64: 8, 128>}, {transform_indices = @transform_2, window_bounds = array<i64: 1, 8, 2>}, {transform_indices = @transform_3, window_bounds = array<i64: 1, 8, 512>}]} {
    %c0 = arith.constant 0 : index
    %c0_0 = arith.constant 0 : index
    %c0_1 = arith.constant 0 : index
    %0 = vector.load %arg1[%c0, %c0_0, %c0_1] : memref<1x4x512xf32, #tpu.memory_space<vmem>>, vector<1x4x512xf32>
    %1 = vector.shape_cast %0 : vector<1x4x512xf32> to vector<4x512xf32>
    %2 = tpu.iota {dimensions = array<i32: 1>} : vector<1x512xi32>
    %3 = arith.sitofp %2 : vector<1x512xi32> to vector<1x512xf32>
    %cst = arith.constant 6.400000e+01 : f32
    %4 = vector.broadcast %cst : f32 to vector<1x512xf32>
    %5 = arith.divf %3, %4 : vector<1x512xf32>
    %6 = math.floor %5 : vector<1x512xf32>
    %cst_2 = arith.constant 6.400000e+01 : f32
    %7 = vector.broadcast %cst_2 : f32 to vector<1x512xf32>
    %8 = arith.mulf %6, %7 : vector<1x512xf32>
    %9 = arith.subf %3, %8 : vector<1x512xf32>
    %cst_3 = arith.constant 8.000000e+00 : f32
    %10 = vector.broadcast %cst_3 : f32 to vector<1x512xf32>
    %11 = arith.divf %9, %10 : vector<1x512xf32>
    %12 = math.floor %11 : vector<1x512xf32>
    %cst_4 = arith.constant 8.000000e+00 : f32
    %13 = vector.broadcast %cst_4 : f32 to vector<1x512xf32>
    %14 = arith.mulf %12, %13 : vector<1x512xf32>
    %15 = arith.subf %9, %14 : vector<1x512xf32>
    %cst_5 = arith.constant 1.000000e+00 : f32
    %16 = vector.broadcast %cst_5 : f32 to vector<1x512xf32>
    %cst_6 = arith.constant 1.000000e+00 : f32
    %17 = vector.broadcast %cst_6 : f32 to vector<1x512xf32>
    %18 = arith.cmpf oge, %6, %17 : vector<1x512xf32>
    %cst_7 = arith.constant 1.000000e+00 : f32
    %cst_8 = arith.constant 0.000000e+00 : f32
    %19 = vector.broadcast %cst_7 : f32 to vector<1x512xf32>
    %20 = vector.broadcast %cst_8 : f32 to vector<1x512xf32>
    %21 = arith.select %18, %19, %20 : vector<1x512xi1>, vector<1x512xf32>
    %cst_9 = arith.constant 6.000000e+00 : f32
    %22 = vector.broadcast %cst_9 : f32 to vector<1x512xf32>
    %23 = arith.cmpf ole, %6, %22 : vector<1x512xf32>
    %cst_10 = arith.constant 1.000000e+00 : f32
    %cst_11 = arith.constant 0.000000e+00 : f32
    %24 = vector.broadcast %cst_10 : f32 to vector<1x512xf32>
    %25 = vector.broadcast %cst_11 : f32 to vector<1x512xf32>
    %26 = arith.select %23, %24, %25 : vector<1x512xi1>, vector<1x512xf32>
    %cst_12 = arith.constant 1.000000e+00 : f32
    %27 = vector.broadcast %cst_12 : f32 to vector<1x512xf32>
    %28 = arith.cmpf oge, %12, %27 : vector<1x512xf32>
    %cst_13 = arith.constant 1.000000e+00 : f32
    %cst_14 = arith.constant 0.000000e+00 : f32
    %29 = vector.broadcast %cst_13 : f32 to vector<1x512xf32>
    %30 = vector.broadcast %cst_14 : f32 to vector<1x512xf32>
    %31 = arith.select %28, %29, %30 : vector<1x512xi1>, vector<1x512xf32>
    %cst_15 = arith.constant 6.000000e+00 : f32
    %32 = vector.broadcast %cst_15 : f32 to vector<1x512xf32>
    %33 = arith.cmpf ole, %12, %32 : vector<1x512xf32>
    %cst_16 = arith.constant 1.000000e+00 : f32
    %cst_17 = arith.constant 0.000000e+00 : f32
    %34 = vector.broadcast %cst_16 : f32 to vector<1x512xf32>
    %35 = vector.broadcast %cst_17 : f32 to vector<1x512xf32>
    %36 = arith.select %33, %34, %35 : vector<1x512xi1>, vector<1x512xf32>
    %cst_18 = arith.constant 1.000000e+00 : f32
    %37 = vector.broadcast %cst_18 : f32 to vector<1x512xf32>
    %38 = arith.cmpf oge, %15, %37 : vector<1x512xf32>
    %cst_19 = arith.constant 1.000000e+00 : f32
    %cst_20 = arith.constant 0.000000e+00 : f32
    %39 = vector.broadcast %cst_19 : f32 to vector<1x512xf32>
    %40 = vector.broadcast %cst_20 : f32 to vector<1x512xf32>
    %41 = arith.select %38, %39, %40 : vector<1x512xi1>, vector<1x512xf32>
    %cst_21 = arith.constant 6.000000e+00 : f32
    %42 = vector.broadcast %cst_21 : f32 to vector<1x512xf32>
    %43 = arith.cmpf ole, %15, %42 : vector<1x512xf32>
    %cst_22 = arith.constant 1.000000e+00 : f32
    %cst_23 = arith.constant 0.000000e+00 : f32
    %44 = vector.broadcast %cst_22 : f32 to vector<1x512xf32>
    %45 = vector.broadcast %cst_23 : f32 to vector<1x512xf32>
    %46 = arith.select %43, %44, %45 : vector<1x512xi1>, vector<1x512xf32>
    %47 = arith.mulf %21, %31 : vector<1x512xf32>
    %c73_i32 = arith.constant 73 : i32
    %48 = tpu.dynamic_rotate %1 by %c73_i32 dim 1 : vector<4x512xf32>, i32 -> vector<4x512xf32>
    %49 = arith.mulf %47, %41 : vector<1x512xf32>
    %50 = vector.broadcast %49 : vector<1x512xf32> to vector<4x512xf32>
    %51 = arith.mulf %48, %50 : vector<4x512xf32>
    %c0_24 = arith.constant 0 : index
    %c0_25 = arith.constant 0 : index
    %52 = vector.load %arg5[%c0_24, %c0_25] : memref<128x512xf32, #tpu.memory_space<vmem>>, vector<4x512xf32>
    tpu.vector_store %arg5[%c0_24, %c0_25], %51 {strides = array<i32>} : memref<128x512xf32, #tpu.memory_space<vmem>>, vector<4x512xf32>,
    %c72_i32 = arith.constant 72 : i32
    %53 = tpu.dynamic_rotate %1 by %c72_i32 dim 1 : vector<4x512xf32>, i32 -> vector<4x512xf32>
    %54 = vector.broadcast %47 : vector<1x512xf32> to vector<4x512xf32>
    %55 = arith.mulf %53, %54 : vector<4x512xf32>
    %c4 = arith.constant 4 : index
    %c0_26 = arith.constant 0 : index
    %56 = vector.load %arg5[%c4, %c0_26] : memref<128x512xf32, #tpu.memory_space<vmem>>, vector<4x512xf32>
    tpu.vector_store %arg5[%c4, %c0_26], %55 {strides = array<i32>} : memref<128x512xf32, #tpu.memory_space<vmem>>, vector<4x512xf32>,
    %c71_i32 = arith.constant 71 : i32
    %57 = tpu.dynamic_rotate %1 by %c71_i32 dim 1 : vector<4x512xf32>, i32 -> vector<4x512xf32>
    %58 = arith.mulf %47, %46 : vector<1x512xf32>
    %59 = vector.broadcast %58 : vector<1x512xf32> to vector<4x512xf32>
    %60 = arith.mulf %57, %59 : vector<4x512xf32>
    %c8 = arith.constant 8 : index
    %c0_27 = arith.constant 0 : index
    %61 = vector.load %arg5[%c8, %c0_27] : memref<128x512xf32, #tpu.memory_space<vmem>>, vector<4x512xf32>
    tpu.vector_store %arg5[%c8, %c0_27], %60 {strides = array<i32>} : memref<128x512xf32, #tpu.memory_space<vmem>>, vector<4x512xf32>,
    %c65_i32 = arith.constant 65 : i32
    %62 = tpu.dynamic_rotate %1 by %c65_i32 dim 1 : vector<4x512xf32>, i32 -> vector<4x512xf32>
    %63 = arith.mulf %21, %41 : vector<1x512xf32>
    %64 = vector.broadcast %63 : vector<1x512xf32> to vector<4x512xf32>
    %65 = arith.mulf %62, %64 : vector<4x512xf32>
    %c12 = arith.constant 12 : index
    %c0_28 = arith.constant 0 : index
    %66 = vector.load %arg5[%c12, %c0_28] : memref<128x512xf32, #tpu.memory_space<vmem>>, vector<4x512xf32>
    tpu.vector_store %arg5[%c12, %c0_28], %65 {strides = array<i32>} : memref<128x512xf32, #tpu.memory_space<vmem>>, vector<4x512xf32>,
    %c64_i32 = arith.constant 64 : i32
    %67 = tpu.dynamic_rotate %1 by %c64_i32 dim 1 : vector<4x512xf32>, i32 -> vector<4x512xf32>
    %68 = vector.broadcast %21 : vector<1x512xf32> to vector<4x512xf32>
    %69 = arith.mulf %67, %68 : vector<4x512xf32>
    %c16 = arith.constant 16 : index
    %c0_29 = arith.constant 0 : index
    %70 = vector.load %arg5[%c16, %c0_29] : memref<128x512xf32, #tpu.memory_space<vmem>>, vector<4x512xf32>
    tpu.vector_store %arg5[%c16, %c0_29], %69 {strides = array<i32>} : memref<128x512xf32, #tpu.memory_space<vmem>>, vector<4x512xf32>,
    %c63_i32 = arith.constant 63 : i32
    %71 = tpu.dynamic_rotate %1 by %c63_i32 dim 1 : vector<4x512xf32>, i32 -> vector<4x512xf32>
    %72 = arith.mulf %21, %46 : vector<1x512xf32>
    %73 = vector.broadcast %72 : vector<1x512xf32> to vector<4x512xf32>
    %74 = arith.mulf %71, %73 : vector<4x512xf32>
    %c20 = arith.constant 20 : index
    %c0_30 = arith.constant 0 : index
    %75 = vector.load %arg5[%c20, %c0_30] : memref<128x512xf32, #tpu.memory_space<vmem>>, vector<4x512xf32>
    tpu.vector_store %arg5[%c20, %c0_30], %74 {strides = array<i32>} : memref<128x512xf32, #tpu.memory_space<vmem>>, vector<4x512xf32>,
    %76 = arith.mulf %21, %36 : vector<1x512xf32>
    %c57_i32 = arith.constant 57 : i32
    %77 = tpu.dynamic_rotate %1 by %c57_i32 dim 1 : vector<4x512xf32>, i32 -> vector<4x512xf32>
    %78 = arith.mulf %76, %41 : vector<1x512xf32>
    %79 = vector.broadcast %78 : vector<1x512xf32> to vector<4x512xf32>
    %80 = arith.mulf %77, %79 : vector<4x512xf32>
    %c24 = arith.constant 24 : index
    %c0_31 = arith.constant 0 : index
    %81 = vector.load %arg5[%c24, %c0_31] : memref<128x512xf32, #tpu.memory_space<vmem>>, vector<4x512xf32>
    tpu.vector_store %arg5[%c24, %c0_31], %80 {strides = array<i32>} : memref<128x512xf32, #tpu.memory_space<vmem>>, vector<4x512xf32>,
    %c56_i32 = arith.constant 56 : i32
    %82 = tpu.dynamic_rotate %1 by %c56_i32 dim 1 : vector<4x512xf32>, i32 -> vector<4x512xf32>
    %83 = vector.broadcast %76 : vector<1x512xf32> to vector<4x512xf32>
    %84 = arith.mulf %82, %83 : vector<4x512xf32>
    %c28 = arith.constant 28 : index
    %c0_32 = arith.constant 0 : index
    %85 = vector.load %arg5[%c28, %c0_32] : memref<128x512xf32, #tpu.memory_space<vmem>>, vector<4x512xf32>
    tpu.vector_store %arg5[%c28, %c0_32], %84 {strides = array<i32>} : memref<128x512xf32, #tpu.memory_space<vmem>>, vector<4x512xf32>,
    %c55_i32 = arith.constant 55 : i32
    %86 = tpu.dynamic_rotate %1 by %c55_i32 dim 1 : vector<4x512xf32>, i32 -> vector<4x512xf32>
    %87 = arith.mulf %76, %46 : vector<1x512xf32>
    %88 = vector.broadcast %87 : vector<1x512xf32> to vector<4x512xf32>
    %89 = arith.mulf %86, %88 : vector<4x512xf32>
    %c32 = arith.constant 32 : index
    %c0_33 = arith.constant 0 : index
    %90 = vector.load %arg5[%c32, %c0_33] : memref<128x512xf32, #tpu.memory_space<vmem>>, vector<4x512xf32>
    tpu.vector_store %arg5[%c32, %c0_33], %89 {strides = array<i32>} : memref<128x512xf32, #tpu.memory_space<vmem>>, vector<4x512xf32>,
    %c9_i32 = arith.constant 9 : i32
    %91 = tpu.dynamic_rotate %1 by %c9_i32 dim 1 : vector<4x512xf32>, i32 -> vector<4x512xf32>
    %92 = arith.mulf %31, %41 : vector<1x512xf32>
    %93 = vector.broadcast %92 : vector<1x512xf32> to vector<4x512xf32>
    %94 = arith.mulf %91, %93 : vector<4x512xf32>
    %c36 = arith.constant 36 : index
    %c0_34 = arith.constant 0 : index
    %95 = vector.load %arg5[%c36, %c0_34] : memref<128x512xf32, #tpu.memory_space<vmem>>, vector<4x512xf32>
    tpu.vector_store %arg5[%c36, %c0_34], %94 {strides = array<i32>} : memref<128x512xf32, #tpu.memory_space<vmem>>, vector<4x512xf32>,
    %c8_i32 = arith.constant 8 : i32
    %96 = tpu.dynamic_rotate %1 by %c8_i32 dim 1 : vector<4x512xf32>, i32 -> vector<4x512xf32>
    %97 = vector.broadcast %31 : vector<1x512xf32> to vector<4x512xf32>
    %98 = arith.mulf %96, %97 : vector<4x512xf32>
    %c40 = arith.constant 40 : index
    %c0_35 = arith.constant 0 : index
    %99 = vector.load %arg5[%c40, %c0_35] : memref<128x512xf32, #tpu.memory_space<vmem>>, vector<4x512xf32>
    tpu.vector_store %arg5[%c40, %c0_35], %98 {strides = array<i32>} : memref<128x512xf32, #tpu.memory_space<vmem>>, vector<4x512xf32>,
    %c7_i32 = arith.constant 7 : i32
    %100 = tpu.dynamic_rotate %1 by %c7_i32 dim 1 : vector<4x512xf32>, i32 -> vector<4x512xf32>
    %101 = arith.mulf %31, %46 : vector<1x512xf32>
    %102 = vector.broadcast %101 : vector<1x512xf32> to vector<4x512xf32>
    %103 = arith.mulf %100, %102 : vector<4x512xf32>
    %c44 = arith.constant 44 : index
    %c0_36 = arith.constant 0 : index
    %104 = vector.load %arg5[%c44, %c0_36] : memref<128x512xf32, #tpu.memory_space<vmem>>, vector<4x512xf32>
    tpu.vector_store %arg5[%c44, %c0_36], %103 {strides = array<i32>} : memref<128x512xf32, #tpu.memory_space<vmem>>, vector<4x512xf32>,
    %c1_i32 = arith.constant 1 : i32
    %105 = tpu.dynamic_rotate %1 by %c1_i32 dim 1 : vector<4x512xf32>, i32 -> vector<4x512xf32>
    %106 = vector.broadcast %41 : vector<1x512xf32> to vector<4x512xf32>
    %107 = arith.mulf %105, %106 : vector<4x512xf32>
    %c48 = arith.constant 48 : index
    %c0_37 = arith.constant 0 : index
    %108 = vector.load %arg5[%c48, %c0_37] : memref<128x512xf32, #tpu.memory_space<vmem>>, vector<4x512xf32>
    tpu.vector_store %arg5[%c48, %c0_37], %107 {strides = array<i32>} : memref<128x512xf32, #tpu.memory_space<vmem>>, vector<4x512xf32>,
    %c52 = arith.constant 52 : index
    %c0_38 = arith.constant 0 : index
    %109 = vector.load %arg5[%c52, %c0_38] : memref<128x512xf32, #tpu.memory_space<vmem>>, vector<4x512xf32>
    tpu.vector_store %arg5[%c52, %c0_38], %1 {strides = array<i32>} : memref<128x512xf32, #tpu.memory_space<vmem>>, vector<4x512xf32>,
    %c511_i32 = arith.constant 511 : i32
    %110 = tpu.dynamic_rotate %1 by %c511_i32 dim 1 : vector<4x512xf32>, i32 -> vector<4x512xf32>
    %111 = vector.broadcast %46 : vector<1x512xf32> to vector<4x512xf32>
    %112 = arith.mulf %110, %111 : vector<4x512xf32>
    %c56 = arith.constant 56 : index
    %c0_39 = arith.constant 0 : index
    %113 = vector.load %arg5[%c56, %c0_39] : memref<128x512xf32, #tpu.memory_space<vmem>>, vector<4x512xf32>
    tpu.vector_store %arg5[%c56, %c0_39], %112 {strides = array<i32>} : memref<128x512xf32, #tpu.memory_space<vmem>>, vector<4x512xf32>,
    %c505_i32 = arith.constant 505 : i32
    %114 = tpu.dynamic_rotate %1 by %c505_i32 dim 1 : vector<4x512xf32>, i32 -> vector<4x512xf32>
    %115 = arith.mulf %36, %41 : vector<1x512xf32>
    %116 = vector.broadcast %115 : vector<1x512xf32> to vector<4x512xf32>
    %117 = arith.mulf %114, %116 : vector<4x512xf32>
    %c60 = arith.constant 60 : index
    %c0_40 = arith.constant 0 : index
    %118 = vector.load %arg5[%c60, %c0_40] : memref<128x512xf32, #tpu.memory_space<vmem>>, vector<4x512xf32>
    tpu.vector_store %arg5[%c60, %c0_40], %117 {strides = array<i32>} : memref<128x512xf32, #tpu.memory_space<vmem>>, vector<4x512xf32>,
    %c504_i32 = arith.constant 504 : i32
    %119 = tpu.dynamic_rotate %1 by %c504_i32 dim 1 : vector<4x512xf32>, i32 -> vector<4x512xf32>
    %120 = vector.broadcast %36 : vector<1x512xf32> to vector<4x512xf32>
    %121 = arith.mulf %119, %120 : vector<4x512xf32>
    %c64 = arith.constant 64 : index
    %c0_41 = arith.constant 0 : index
    %122 = vector.load %arg5[%c64, %c0_41] : memref<128x512xf32, #tpu.memory_space<vmem>>, vector<4x512xf32>
    tpu.vector_store %arg5[%c64, %c0_41], %121 {strides = array<i32>} : memref<128x512xf32, #tpu.memory_space<vmem>>, vector<4x512xf32>,
    %c503_i32 = arith.constant 503 : i32
    %123 = tpu.dynamic_rotate %1 by %c503_i32 dim 1 : vector<4x512xf32>, i32 -> vector<4x512xf32>
    %124 = arith.mulf %36, %46 : vector<1x512xf32>
    %125 = vector.broadcast %124 : vector<1x512xf32> to vector<4x512xf32>
    %126 = arith.mulf %123, %125 : vector<4x512xf32>
    %c68 = arith.constant 68 : index
    %c0_42 = arith.constant 0 : index
    %127 = vector.load %arg5[%c68, %c0_42] : memref<128x512xf32, #tpu.memory_space<vmem>>, vector<4x512xf32>
    tpu.vector_store %arg5[%c68, %c0_42], %126 {strides = array<i32>} : memref<128x512xf32, #tpu.memory_space<vmem>>, vector<4x512xf32>,
    %128 = arith.mulf %26, %31 : vector<1x512xf32>
    %c457_i32 = arith.constant 457 : i32
    %129 = tpu.dynamic_rotate %1 by %c457_i32 dim 1 : vector<4x512xf32>, i32 -> vector<4x512xf32>
    %130 = arith.mulf %128, %41 : vector<1x512xf32>
    %131 = vector.broadcast %130 : vector<1x512xf32> to vector<4x512xf32>
    %132 = arith.mulf %129, %131 : vector<4x512xf32>
    %c72 = arith.constant 72 : index
    %c0_43 = arith.constant 0 : index
    %133 = vector.load %arg5[%c72, %c0_43] : memref<128x512xf32, #tpu.memory_space<vmem>>, vector<4x512xf32>
    tpu.vector_store %arg5[%c72, %c0_43], %132 {strides = array<i32>} : memref<128x512xf32, #tpu.memory_space<vmem>>, vector<4x512xf32>,
    %c456_i32 = arith.constant 456 : i32
    %134 = tpu.dynamic_rotate %1 by %c456_i32 dim 1 : vector<4x512xf32>, i32 -> vector<4x512xf32>
    %135 = vector.broadcast %128 : vector<1x512xf32> to vector<4x512xf32>
    %136 = arith.mulf %134, %135 : vector<4x512xf32>
    %c76 = arith.constant 76 : index
    %c0_44 = arith.constant 0 : index
    %137 = vector.load %arg5[%c76, %c0_44] : memref<128x512xf32, #tpu.memory_space<vmem>>, vector<4x512xf32>
    tpu.vector_store %arg5[%c76, %c0_44], %136 {strides = array<i32>} : memref<128x512xf32, #tpu.memory_space<vmem>>, vector<4x512xf32>,
    %c455_i32 = arith.constant 455 : i32
    %138 = tpu.dynamic_rotate %1 by %c455_i32 dim 1 : vector<4x512xf32>, i32 -> vector<4x512xf32>
    %139 = arith.mulf %128, %46 : vector<1x512xf32>
    %140 = vector.broadcast %139 : vector<1x512xf32> to vector<4x512xf32>
    %141 = arith.mulf %138, %140 : vector<4x512xf32>
    %c80 = arith.constant 80 : index
    %c0_45 = arith.constant 0 : index
    %142 = vector.load %arg5[%c80, %c0_45] : memref<128x512xf32, #tpu.memory_space<vmem>>, vector<4x512xf32>
    tpu.vector_store %arg5[%c80, %c0_45], %141 {strides = array<i32>} : memref<128x512xf32, #tpu.memory_space<vmem>>, vector<4x512xf32>,
    %c449_i32 = arith.constant 449 : i32
    %143 = tpu.dynamic_rotate %1 by %c449_i32 dim 1 : vector<4x512xf32>, i32 -> vector<4x512xf32>
    %144 = arith.mulf %26, %41 : vector<1x512xf32>
    %145 = vector.broadcast %144 : vector<1x512xf32> to vector<4x512xf32>
    %146 = arith.mulf %143, %145 : vector<4x512xf32>
    %c84 = arith.constant 84 : index
    %c0_46 = arith.constant 0 : index
    %147 = vector.load %arg5[%c84, %c0_46] : memref<128x512xf32, #tpu.memory_space<vmem>>, vector<4x512xf32>
    tpu.vector_store %arg5[%c84, %c0_46], %146 {strides = array<i32>} : memref<128x512xf32, #tpu.memory_space<vmem>>, vector<4x512xf32>,
    %c448_i32 = arith.constant 448 : i32
    %148 = tpu.dynamic_rotate %1 by %c448_i32 dim 1 : vector<4x512xf32>, i32 -> vector<4x512xf32>
    %149 = vector.broadcast %26 : vector<1x512xf32> to vector<4x512xf32>
    %150 = arith.mulf %148, %149 : vector<4x512xf32>
    %c88 = arith.constant 88 : index
    %c0_47 = arith.constant 0 : index
    %151 = vector.load %arg5[%c88, %c0_47] : memref<128x512xf32, #tpu.memory_space<vmem>>, vector<4x512xf32>
    tpu.vector_store %arg5[%c88, %c0_47], %150 {strides = array<i32>} : memref<128x512xf32, #tpu.memory_space<vmem>>, vector<4x512xf32>,
    %c447_i32 = arith.constant 447 : i32
    %152 = tpu.dynamic_rotate %1 by %c447_i32 dim 1 : vector<4x512xf32>, i32 -> vector<4x512xf32>
    %153 = arith.mulf %26, %46 : vector<1x512xf32>
    %154 = vector.broadcast %153 : vector<1x512xf32> to vector<4x512xf32>
    %155 = arith.mulf %152, %154 : vector<4x512xf32>
    %c92 = arith.constant 92 : index
    %c0_48 = arith.constant 0 : index
    %156 = vector.load %arg5[%c92, %c0_48] : memref<128x512xf32, #tpu.memory_space<vmem>>, vector<4x512xf32>
    tpu.vector_store %arg5[%c92, %c0_48], %155 {strides = array<i32>} : memref<128x512xf32, #tpu.memory_space<vmem>>, vector<4x512xf32>,
    %157 = arith.mulf %26, %36 : vector<1x512xf32>
    %c441_i32 = arith.constant 441 : i32
    %158 = tpu.dynamic_rotate %1 by %c441_i32 dim 1 : vector<4x512xf32>, i32 -> vector<4x512xf32>
    %159 = arith.mulf %157, %41 : vector<1x512xf32>
    %160 = vector.broadcast %159 : vector<1x512xf32> to vector<4x512xf32>
    %161 = arith.mulf %158, %160 : vector<4x512xf32>
    %c96 = arith.constant 96 : index
    %c0_49 = arith.constant 0 : index
    %162 = vector.load %arg5[%c96, %c0_49] : memref<128x512xf32, #tpu.memory_space<vmem>>, vector<4x512xf32>
    tpu.vector_store %arg5[%c96, %c0_49], %161 {strides = array<i32>} : memref<128x512xf32, #tpu.memory_space<vmem>>, vector<4x512xf32>,
    %c440_i32 = arith.constant 440 : i32
    %163 = tpu.dynamic_rotate %1 by %c440_i32 dim 1 : vector<4x512xf32>, i32 -> vector<4x512xf32>
    %164 = vector.broadcast %157 : vector<1x512xf32> to vector<4x512xf32>
    %165 = arith.mulf %163, %164 : vector<4x512xf32>
    %c100 = arith.constant 100 : index
    %c0_50 = arith.constant 0 : index
    %166 = vector.load %arg5[%c100, %c0_50] : memref<128x512xf32, #tpu.memory_space<vmem>>, vector<4x512xf32>
    tpu.vector_store %arg5[%c100, %c0_50], %165 {strides = array<i32>} : memref<128x512xf32, #tpu.memory_space<vmem>>, vector<4x512xf32>,
    %c439_i32 = arith.constant 439 : i32
    %167 = tpu.dynamic_rotate %1 by %c439_i32 dim 1 : vector<4x512xf32>, i32 -> vector<4x512xf32>
    %168 = arith.mulf %157, %46 : vector<1x512xf32>
    %169 = vector.broadcast %168 : vector<1x512xf32> to vector<4x512xf32>
    %170 = arith.mulf %167, %169 : vector<4x512xf32>
    %c104 = arith.constant 104 : index
    %c0_51 = arith.constant 0 : index
    %171 = vector.load %arg5[%c104, %c0_51] : memref<128x512xf32, #tpu.memory_space<vmem>>, vector<4x512xf32>
    tpu.vector_store %arg5[%c104, %c0_51], %170 {strides = array<i32>} : memref<128x512xf32, #tpu.memory_space<vmem>>, vector<4x512xf32>,
    %c108 = arith.constant 108 : index
    %c0_52 = arith.constant 0 : index
    %172 = vector.load %arg5[%c108, %c0_52] : memref<128x512xf32, #tpu.memory_space<vmem>>, vector<1x512xf32>
    tpu.vector_store %arg5[%c108, %c0_52], %16 {strides = array<i32>} : memref<128x512xf32, #tpu.memory_space<vmem>>, vector<1x512xf32>,
    %cst_53 = arith.constant 0.000000e+00 : f32
    %173 = vector.broadcast %cst_53 : f32 to vector<19x512xf32>
    %c109 = arith.constant 109 : index
    %c0_54 = arith.constant 0 : index
    %174 = vector.load %arg5[%c109, %c0_54] : memref<128x512xf32, #tpu.memory_space<vmem>>, vector<19x512xf32>
    tpu.vector_store %arg5[%c109, %c0_54], %173 {strides = array<i32>} : memref<128x512xf32, #tpu.memory_space<vmem>>, vector<19x512xf32>,
    %c0_55 = arith.constant 0 : index
    %c0_56 = arith.constant 0 : index
    %175 = vector.load %arg2[%c0_55, %c0_56] : memref<8x128xf32, #tpu.memory_space<vmem>>, vector<8x128xf32>
    %c0_57 = arith.constant 0 : index
    %c0_58 = arith.constant 0 : index
    %176 = vector.load %arg5[%c0_57, %c0_58] : memref<128x512xf32, #tpu.memory_space<vmem>>, vector<128x512xf32>
    %cst_59 = arith.constant dense<0.000000e+00> : vector<8x512xf32>
    %177 = tpu.matmul %175, %176, %cst_59 {dimension_numbers = #tpu.dot_dimension_numbers<[1], [0], [0], [1], [0, 0, 1, 1], [], []>, precision = #tpu.contract_precision<fp32>} : vector<8x128xf32>, vector<128x512xf32>, vector<8x512xf32> -> vector<8x512xf32>
    %cst_60 = arith.constant 2.000000e-01 : f32
    %178 = vector.broadcast %cst_60 : f32 to vector<8x512xf32>
    %179 = arith.mulf %178, %177 : vector<8x512xf32>
    %180 = arith.maximumf %177, %179 : vector<8x512xf32>
    %cst_61 = arith.constant dense<0.000000e+00> : vector<8xf32>
    %181 = vector.multi_reduction <add>, %180, %cst_61 [1] : vector<8x512xf32> to vector<8xf32>
    %182 = vector.shape_cast %181 : vector<8xf32> to vector<8x1xf32>
    %183 = arith.mulf %180, %180 : vector<8x512xf32>
    %cst_62 = arith.constant dense<0.000000e+00> : vector<8xf32>
    %184 = vector.multi_reduction <add>, %183, %cst_62 [1] : vector<8x512xf32> to vector<8xf32>
    %185 = vector.shape_cast %184 : vector<8xf32> to vector<8x1xf32>
    %cst_63 = arith.constant 0.001953125 : f32
    %186 = vector.broadcast %cst_63 : f32 to vector<8x1xf32>
    %187 = arith.mulf %182, %186 : vector<8x1xf32>
    %cst_64 = arith.constant 0.001953125 : f32
    %188 = vector.broadcast %cst_64 : f32 to vector<8x1xf32>
    %189 = arith.mulf %185, %188 : vector<8x1xf32>
    %190 = arith.mulf %187, %187 : vector<8x1xf32>
    %191 = arith.subf %189, %190 : vector<8x1xf32>
    %cst_65 = arith.constant 9.99999993E-9 : f32
    %192 = vector.broadcast %cst_65 : f32 to vector<8x1xf32>
    %193 = arith.addf %191, %192 : vector<8x1xf32>
    %194 = math.rsqrt %193 : vector<8x1xf32>
    %c0_66 = arith.constant 0 : index
    %c0_67 = arith.constant 0 : index
    %c0_68 = arith.constant 0 : index
    %195 = vector.load %arg3[%c0_66, %c0_67, %c0_68] : memref<1x8x2xf32, #tpu.memory_space<vmem>>, vector<1x8x2xf32>
    %196 = vector.shape_cast %195 : vector<1x8x2xf32> to vector<8x2xf32>
    %197 = vector.extract_strided_slice %196 {offsets = [0, 0], sizes = [8, 1], strides = [1, 1]} : vector<8x2xf32> to vector<8x1xf32>
    %198 = arith.mulf %197, %194 : vector<8x1xf32>
    %199 = vector.extract_strided_slice %196 {offsets = [0, 1], sizes = [8, 1], strides = [1, 1]} : vector<8x2xf32> to vector<8x1xf32>
    %200 = arith.mulf %198, %187 : vector<8x1xf32>
    %201 = arith.subf %199, %200 : vector<8x1xf32>
    %202 = vector.broadcast %198 : vector<8x1xf32> to vector<8x512xf32>
    %203 = arith.mulf %202, %180 : vector<8x512xf32>
    %204 = vector.broadcast %201 : vector<8x1xf32> to vector<8x512xf32>
    %205 = arith.addf %203, %204 : vector<8x512xf32>
    %206 = vector.shape_cast %205 : vector<8x512xf32> to vector<1x8x512xf32>
    %c0_69 = arith.constant 0 : index
    %c0_70 = arith.constant 0 : index
    %c0_71 = arith.constant 0 : index
    %207 = vector.load %arg4[%c0_69, %c0_70, %c0_71] : memref<1x8x512xf32, #tpu.memory_space<vmem>>, vector<1x8x512xf32>
    tpu.vector_store %arg4[%c0_69, %c0_70, %c0_71], %206 {strides = array<i32>} : memref<1x8x512xf32, #tpu.memory_space<vmem>>, vector<1x8x512xf32>,
    return
  }
  func.func @transform_0(%arg0: i32) -> (i32, i32, i32) {
    %c0_i32 = arith.constant 0 : i32
    %c0_i32_0 = arith.constant 0 : i32
    %c0_i32_1 = arith.constant 0 : i32
    return %arg0, %c0_i32, %c0_i32_0 : i32, i32, i32
  }
  func.func @transform_1(%arg0: i32) -> (i32, i32) {
    %c0_i32 = arith.constant 0 : i32
    %c0_i32_0 = arith.constant 0 : i32
    %c0_i32_1 = arith.constant 0 : i32
    return %c0_i32, %c0_i32_0 : i32, i32
  }
  func.func @transform_2(%arg0: i32) -> (i32, i32, i32) {
    %c0_i32 = arith.constant 0 : i32
    %c0_i32_0 = arith.constant 0 : i32
    %c0_i32_1 = arith.constant 0 : i32
    return %arg0, %c0_i32, %c0_i32_0 : i32, i32, i32
  }
  func.func @transform_3(%arg0: i32) -> (i32, i32, i32) {
    %c0_i32 = arith.constant 0 : i32
    %c0_i32_0 = arith.constant 0 : i32
    %c0_i32_1 = arith.constant 0 : i32
    return %arg0, %c0_i32, %c0_i32_0 : i32, i32, i32
  }
}

</mosaic_0001>

<bundles_post_ra>
// kernel: tpu_custom_call.1
= control target key start
LH: loop header
LB: loop body
LE: loop exit
PB: predicated region body
PF: predicated region fallthrough
CT: control target
= control target key end

     0   :  { %8 = vsyncpa [#allocation4], 0  ;;  %s5463_s0 = inlined_call_operand.hbm [shape: f32[2,4,512], index: 0, kind: input, shape index: {}]   ;;  %s5464_s1 = inlined_call_operand.vmem [shape: f32[8,128], index: 1, kind: input, shape index: {}]   ;;  %s5465_s2 = inlined_call_operand.vmem [shape: f32[2,8,2], index: 2, kind: input, shape index: {}]   ;;  %s5466_s3 = inlined_call_operand.hbm [shape: f32[2,8,512], index: 3, kind: output, shape index: {}]  }
   0x1   :  { %10 = vsyncpa [#allocation4 + $0x1], 0 }
   0x2   :  { %11 = vsyncpa [#allocation5], 0 }
   0x3   :  { %13 = vsyncpa [#allocation5 + $0x1], 0  ;;  %s3228_s12 = smov 0   ;;  %s3230_s13 = smov 0  }
   0x4   :  { %s3232_s14 = smov 0   ;;  %s3234_s15 = smov 0  }
   0x5 LB: > { %s3249_s16 = sadd.s32 4294967295, %s3183_s15   ;;  %s2990_s17 = sadd.s32 4294967294, %s3183_s15   ;;  %s3183_s15 = sphi %s3234_s15, %s5854_s15   ;;  %s3179_s14 = sphi %s3232_s14, %s5853_s14   ;;  %s3175_s13 = sphi %s3230_s13, %s5852_s13   ;;  %s3171_s12 = sphi %s3228_s12, %s5851_s12  }
   0x6   : > { %s3253_s18 = sadd.s32 1, %s3183_s15   ;;  %s26_s19 = sadd.s32 1, %s3179_s14 }
   0x7   : > { %s23_s20 = ssub.s32 %s3183_s15, %s3253_s18  ;;  %p33_p0 = scmp.ne.s32.totalorder %s3179_s14, %s3175_s13 }
   0x8   : > { %p24_p1 = scmp.eq.s32.totalorder %s23_s20, 0  ;;  %p34_p2 = scmp.eq.s32.totalorder %s3183_s15, 0 }
   0x9   : > { %p39_p3 = scmp.ne.s32.totalorder %s3175_s13, %s3171_s12  ;;  %p40_p4 = scmp.eq.s32.totalorder %s3249_s16, 0 }
   0xa   : > { %s3265_s21 = scalar_select %p24_p1, %s3179_s14, %s26_s19  }
   0xb   : > { %p3267_p5 = por %p34_p2, %p33_p0  ;;  %p3271_p6 = por %p40_p4, %p39_p3 }
   0xc   : > { %p110_p7 = scmp.eq.s32.totalorder %s3249_s16, 1  ;;  %p116_p8 = scmp.eq.s32.totalorder %s2990_s17, 1 }
   0xd   : > { %p3019_p10 = scmp.lt.s32.totalorder %s3183_s15, 2  ;;  %s139_s26 = sand.u32 1, %s3179_s14  }
   0xe   : > { %p3278_p11 = por %p110_p7, %p33_p0  ;;  %p3282_p12 = por %p116_p8, %p39_p3 }
   0xf   : > { %s3005_s27 = sshll.u32 %s3183_s15, 4  ;;  %s2993_s28 = sshll.u32 %s139_s26, 4 }
  0x10   : > { %s148_s4 = scalar_lea.hbm %s5463_s0, %s3005_s27  ;;  %s143_s6 = scalar_lea.vmem [#allocation3], %s2993_s28 }
  0x11   : > { %s150_s5 = sshll.u32 %s148_s4, 4  ;;  %s152_s7 = sshll.u32 %s143_s6, 4  ;;  %s151_s5 = int_to_ptr.hbm [resolvable:$true] %s150_s5  ;;  %s153_s7 = int_to_ptr.vmem [resolvable:$true] %s152_s7 }
  0x12   : > { %p3293_p13 = pnand %p3019_p10, %p3267_p5  ;;  %p2996_p0 = scmp.ge.s32.totalorder %s3183_s15, 1 }
  0x13   : > { %p164_p1 = scmp.lt.s32.totalorder %s3183_s15, 3  ;;  %s140_s9 = scalar_lea.sflag [#allocation4], %s139_s26 }
  0x14   : > { %s3087_s10 = sshra.s32 %s151_s5, 4  ;;  %p3091_p3 = pneg %p3293_p13  ;;  %s3088_s10 = int_to_ptr.hbm [resolvable:$true] %s3087_s10 }
  0x15   : > { %s3089_s11 = scalar_lea.hbm %s3088_s10, 16  ;;  %s3094_s20 = scalar_lea.hbm %s5463_s0, 32 }
  0x16   : > { %p3090_p2 = scmp.ne.s32.totalorder %s3088_s10, %s3089_s11  ;;  %p3095_p5 = scmp.lt.s32.totalorder %s3088_s10, %s5463_s0 }
  0x17   : > { %p3096_p8 = scmp.lt.s32.totalorder %s3094_s20, %s3089_s11 }
  0x18   : > { %p3092_p4 = pnand %p3091_p3, %p3090_p2 }
  0x19   : > { %p3097_p10 = por %p3096_p8, %p3095_p5 }
  0x1a   : > { %p3093_p7 = pneg %p3092_p4 }
  0x1c   : > { %p3098_p9 = pnand %p3097_p10, %p3093_p7 }
  0x1e   : > { %3101 = shalt.err (!%p3098_p9)
}
  0x1f   : > { %3014 = dma.hbm_to_vmem [thread:$0]  (!%p3293_p13), %s151_s5, 256, %s153_s7, %s140_s9  }
  0x20   : > { %p165_p2 = pnand %p2996_p0, %p164_p1 }
  0x22   : > { %168 = sbr.rel (%p165_p2) target bundleno = 1154 (0x482), region = 32 }
  0x27   : > { %s3314_s26 = sand.u32 1, %s3175_s13  }
  0x28   : > { %s2997_s28 = sshll.u32 %s3314_s26, 4  ;;  %s171_s29 = scalar_lea.sflag [#allocation4], %s3314_s26 }
  0x29   : > { %s174_s30 = scalar_lea.vmem [#allocation3], %s2997_s28 }
  0x2a   : > { %3162 = dma.done.wait (%p3271_p6), %s171_s29, 256  }
  0x2b   : > { %3164 = vsyncadd (%p3271_p6), %s171_s29, 4294967040  ;;  %v3322_v0 = vld [vmem:[%s174_s30] sm:$0xff]  ;;  %v3324_v1 = vld [vmem:[%s174_s30 + $0x8] sm:$0xff]  ;;  %s3185_s4 = smov 73   ;;  %s3186_s23 = smov 72   ;;  %v3193_v34 = vmov 64.0   ;;  %v5467_v44 = vlaneseq }
  0x2c   : > { %317 = vst [vmem:[#allocation1] ss:$2 sm:$0xff] %v3322_v0  ;;  %s3187_s5 = smov 71   ;;  %s3188_s6 = smov 65   ;;  %3079 = vrcp.f32 %v3193_v34  ;;  %v3194_v41 = vmov 8.0  }
  0x2d   : > { %319 = vst [vmem:[#allocation1 + $0x10] ss:$2 sm:$0xff] %v3324_v1  ;;  %s3189_s7 = smov 64   ;;  %s3190_s8 = smov 63   ;;  %3081 = vrcp.f32 %v3194_v41  ;;  %v3401_v48 = vand.u32 127, %v5467_v44 }
  0x2e   : > { %s3191_s9 = smov 57   ;;  %s3192_s10 = smov 56  }
  0x2f   : > { %s3195_s11 = smov 55   ;;  %v213_v51 = vcvt.s32.f32 %v3401_v48  ;;  %s3196_s17 = smov 9   ;;  %vm5495_vm5 = vcmp.lt.s32.totalorder %v3401_v48, 73  ;;  %vm372_vm6 = vcmp.lt.s32.totalorder %v3401_v48, 72  ;;  %vm500_vm9 = vcmp.lt.s32.totalorder %v3401_v48, 64 }
  0x30   : > { %s3197_s19 = smov 8   ;;  %s3199_s20 = smov 7   ;;  %vm416_vm10 = vcmp.lt.s32.totalorder %v3401_v48, 71  ;;  %vm452_vm11 = vcmp.lt.s32.totalorder %v3401_v48, 65  ;;  %vm532_vm15 = vcmp.lt.s32.totalorder %v3401_v48, 63 }
  0x31   : > { %s3200_s22 = smov 1   ;;  %s3201_s27 = smov 127  }
  0x32   : > { %v3080_v39 = vpop.eup %3079  ;;  %s3202_s28 = smov 121   ;;  %s3203_s29 = smov 120  }
  0x33   : > { %v320_v2 = vld.sshfl [vmem:[#allocation1] sm:$0xff pattern:$0x75316420]  ;;  %v3328_v3 = vld.sshfl [vmem:[#allocation1 + $0x8] sm:$0xff pattern:$0x75316420]  ;;  %v3082_v50 = vpop.eup %3081  ;;  %vm222_vm0 = vweird.f32 %v3080_v39 }
  0x34   : > { %328 = vrot.lane.b32.xlu0 %v320_v2, %s3185_s4  ;;  %353 = vst [vmem:[#allocation1] ss:$2 sm:$0xff] %v3322_v0  ;;  %v323_v4 = vld.sshfl [vmem:[#allocation1 + $0x18] sm:$0xff pattern:$0x75316420]  ;;  %v218_v40 = vmul.f32 64.0, %v3080_v39  ;;  %vm245_vm1 = vweird.f32 %v3082_v50 }
  0x35   : > { %334 = vrot.lane.b32.xlu1 %v323_v4, %s3185_s4  ;;  %v3333_v5 = vld.sshfl [vmem:[#allocation1 + $0x10] sm:$0xff pattern:$0x75316420]  ;;  %v241_v53 = vmul.f32 8.0, %v3082_v50  ;;  %v5468_v2 = vmov 0.0   ;;  %s3204_s30 = smov 119  }
  0x36   : > { %355 = vst [vmem:[#allocation1 + $0x10] ss:$2 sm:$0xff] %v3324_v1  ;;  %v219_v45 = vsub.f32 1.0, %v218_v40  ;;  %p202_p6 = scmp.lt.s32.totalorder %s3249_s16, 1 }
  0x37   : > { %v242_v58 = vsub.f32 1.0, %v241_v53  ;;  %1383 = vst [vmem:[#allocation2 + $0x1a0] sm:$0xe0] %v5468_v2 }
  0x38   : > { %v220_v49 = vmul.f32 %v3080_v39, %v219_v45  ;;  %1384 = vst [vmem:[#allocation2 + $0x1a8] sm:$0xe0] %v5468_v2 }
  0x39   : > { %v243_v62 = vmul.f32 %v3082_v50, %v242_v58  ;;  %1385 = vst [vmem:[#allocation2 + $0x1b0] sm:$0xe0] %v5468_v2 }
  0x3a   : > { %v221_v52 = vadd.f32 %v3080_v39, %v220_v49  ;;  %1386 = vst [vmem:[#allocation2 + $0x1b8] sm:$0xe0] %v5468_v2 }
  0x3b   : > { %v356_v6 = vld.sshfl [vmem:[#allocation1] sm:$0xff pattern:$0x75316420]  ;;  %v3336_v7 = vld.sshfl [vmem:[#allocation1 + $0x8] sm:$0xff pattern:$0x75316420]  ;;  %v244_v4 = vadd.f32 %v3082_v50, %v243_v62 }
  0x3c   : > { %364 = vrot.lane.b32.xlu0 %v356_v6, %s3186_s23  ;;  %397 = vst [vmem:[#allocation1] ss:$2 sm:$0xff] %v3322_v0  ;;  %v3404_v54 = vsel %vm222_vm0, %v3080_v39, %v221_v52 }
  0x3d   : > { %v359_v8 = vld.sshfl [vmem:[#allocation1 + $0x18] sm:$0xff pattern:$0x75316420]  ;;  %v3340_v9 = vld.sshfl [vmem:[#allocation1 + $0x10] sm:$0xff pattern:$0x75316420]  ;;  %v224_v57 = vmul.f32 %v3404_v54, %v213_v51 }
  0x3e   : > { %370 = vrot.lane.b32.xlu1 %v359_v8, %s3186_s23  ;;  %399 = vst [vmem:[#allocation1 + $0x10] ss:$2 sm:$0xff] %v3324_v1 }
  0x3f   : > { %v3412_v61 = vfloor.f32 %v224_v57  ;;  %1387 = vst [vmem:[#allocation2 + $0x1c0] sm:$0xff] %v5468_v2 }
  0x41   : > { %v232_v63 = vmul.f32 64.0, %v3412_v61  ;;  %vm263_vm2 = vcmp.ge.f32.partialorder %v3412_v61, 1.0 }
  0x43   : > { %v400_v10 = vld.sshfl [vmem:[#allocation1] sm:$0xff pattern:$0x75316420]  ;;  %v3344_v11 = vld.sshfl [vmem:[#allocation1 + $0x8] sm:$0xff pattern:$0x75316420]  ;;  %v236_v8 = vsub.f32 %v213_v51, %v232_v63 }
  0x44   : > { %408 = vrot.lane.b32.xlu2 %v400_v10, %s3187_s5  ;;  %433 = vst [vmem:[#allocation1] ss:$2 sm:$0xff] %v3322_v0  ;;  %v3424_v10 = vsel %vm245_vm1, %v3082_v50, %v244_v4  ;;  %vm584_vm1 = vcmp.lt.s32.totalorder %v3401_v48, 57 }
  0x45   : > { %v3348_v12 = vld.sshfl [vmem:[#allocation1 + $0x10] sm:$0xff pattern:$0x75316420]  ;;  %v403_v13 = vld.sshfl [vmem:[#allocation1 + $0x18] sm:$0xff pattern:$0x75316420] }
  0x46   : > { %414 = vrot.lane.b32.xlu0 %v403_v13, %s3187_s5  ;;  %435 = vst [vmem:[#allocation1 + $0x10] ss:$2 sm:$0xff] %v3324_v1 }
  0x4b   : > { %v436_v14 = vld.sshfl [vmem:[#allocation1] sm:$0xff pattern:$0x75316420]  ;;  %v437_v15 = vld.sshfl [vmem:[#allocation1 + $0x8] sm:$0xff pattern:$0x75316420] }
  0x4c   : > { %481 = vst [vmem:[#allocation1] ss:$2 sm:$0xff] %v3322_v0 }
  0x4d   : > { %v439_v16 = vld.sshfl [vmem:[#allocation1 + $0x18] sm:$0xff pattern:$0x75316420]  ;;  %v3353_v17 = vld.sshfl [vmem:[#allocation1 + $0x10] sm:$0xff pattern:$0x75316420] }
  0x4e   : > { %450 = vrot.lane.b32.xlu1 %v439_v16, %s3188_s6  ;;  %483 = vst [vmem:[#allocation1 + $0x10] ss:$2 sm:$0xff] %v3324_v1  ;;  %444 = vrot.lane.b32.xlu0 %v436_v14, %s3188_s6 }
  0x53   : > { %v484_v18 = vld.sshfl [vmem:[#allocation1] sm:$0xff pattern:$0x75316420]  ;;  %v485_v19 = vld.sshfl [vmem:[#allocation1 + $0x8] sm:$0xff pattern:$0x75316420] }
  0x54   : > { %492 = vrot.lane.b32.xlu2 %v484_v18, %s3189_s7  ;;  %513 = vst [vmem:[#allocation1] ss:$2 sm:$0xff] %v3322_v0 }
  0x55   : > { %v3360_v20 = vld.sshfl [vmem:[#allocation1 + $0x10] sm:$0xff pattern:$0x75316420]  ;;  %v487_v21 = vld.sshfl [vmem:[#allocation1 + $0x18] sm:$0xff pattern:$0x75316420] }
  0x56   : > { %446 = vrot.lane.b32.xlu1 %v437_v15, %s3188_s6  ;;  %498 = vrot.lane.b32.xlu0 %v487_v21, %s3189_s7  ;;  %515 = vst [vmem:[#allocation1 + $0x10] ss:$2 sm:$0xff] %v3324_v1  ;;  %v247_v15 = vmul.f32 %v3424_v10, %v236_v8 }
  0x5b   : > { %v516_v22 = vld.sshfl [vmem:[#allocation1] sm:$0xff pattern:$0x75316420]  ;;  %v517_v23 = vld.sshfl [vmem:[#allocation1 + $0x8] sm:$0xff pattern:$0x75316420] }
  0x5c   : > { %494 = vrot.lane.b32.xlu2 %v485_v19, %s3189_s7  ;;  %565 = vst [vmem:[#allocation1] ss:$2 sm:$0xff] %v3322_v0  ;;  %v3431_v19 = vfloor.f32 %v247_v15 }
  0x5d   : > { %v3367_v24 = vld.sshfl [vmem:[#allocation1 + $0x10] sm:$0xff pattern:$0x75316420]  ;;  %v519_v25 = vld.sshfl [vmem:[#allocation1 + $0x18] sm:$0xff pattern:$0x75316420] }
  0x5e   : > { %530 = vrot.lane.b32.xlu1 %v519_v25, %s3190_s8  ;;  %567 = vst [vmem:[#allocation1 + $0x10] ss:$2 sm:$0xff] %v3324_v1  ;;  %524 = vrot.lane.b32.xlu0 %v516_v22, %s3190_s8  ;;  %vm279_vm3 = vcmp.ge.f32.partialorder %v3431_v19, 1.0  ;;  %vm287_vm14 = vcmp.le.f32.partialorder %v3431_v19, 6.0 }
  0x63   : > { %v569_v26 = vld.sshfl [vmem:[#allocation1 + $0x8] sm:$0xff pattern:$0x75316420]  ;;  %v568_v27 = vld.sshfl [vmem:[#allocation1] sm:$0xff pattern:$0x75316420] }
  0x64   : > { %526 = vrot.lane.b32.xlu2 %v517_v23, %s3190_s8  ;;  %601 = vst [vmem:[#allocation1] ss:$2 sm:$0xff] %v3322_v0  ;;  %v255_v23 = vmul.f32 8.0, %v3431_v19  ;;  %v3594_v19 = vsel %vm287_vm14, 1.0, %v5468_v2  ;;  %vm956_vm14 = vcmp.lt.s32.totalorder %v3401_v48, 120 }
  0x65   : > { %v3374_v28 = vld.sshfl [vmem:[#allocation1 + $0x10] sm:$0xff pattern:$0x75316420]  ;;  %v571_v29 = vld.sshfl [vmem:[#allocation1 + $0x18] sm:$0xff pattern:$0x75316420] }
  0x66   : > { %582 = vrot.lane.b32.xlu0 %v571_v29, %s3191_s9  ;;  %603 = vst [vmem:[#allocation1 + $0x10] ss:$2 sm:$0xff] %v3324_v1  ;;  %v210_v29 = vadd.s32 128, %v3401_v48 }
  0x6b   : > { %v604_v30 = vld.sshfl [vmem:[#allocation1] sm:$0xff pattern:$0x75316420]  ;;  %v605_v31 = vld.sshfl [vmem:[#allocation1 + $0x8] sm:$0xff pattern:$0x75316420] }
  0x6c   : > { %576 = vrot.lane.b32.xlu2 %v568_v27, %s3191_s9  ;;  %612 = vrot.lane.b32.xlu1 %v604_v30, %s3192_s10  ;;  %645 = vst [vmem:[#allocation1] ss:$2 sm:$0xff] %v3322_v0  ;;  %v259_v27 = vsub.f32 %v236_v8, %v255_v23  ;;  %v3449_v30 = vsel %vm263_vm2, 1.0, %v5468_v2  ;;  %vm620_vm2 = vcmp.lt.s32.totalorder %v3401_v48, 56 }
  0x6d   : > { %v3381_v32 = vld.sshfl [vmem:[#allocation1 + $0x10] sm:$0xff pattern:$0x75316420]  ;;  %v607_v33 = vld.sshfl [vmem:[#allocation1 + $0x18] sm:$0xff pattern:$0x75316420] }
  0x6e   : > { %578 = vrot.lane.b32.xlu0 %v569_v26, %s3191_s9  ;;  %647 = vst [vmem:[#allocation1 + $0x10] ss:$2 sm:$0xff] %v3324_v1  ;;  %vm295_vm4 = vcmp.ge.f32.partialorder %v259_v27, 1.0  ;;  %vm303_vm7 = vcmp.le.f32.partialorder %v259_v27, 6.0 }
  0x73   : > { %v649_v35 = vld.sshfl [vmem:[#allocation1 + $0x8] sm:$0xff pattern:$0x75316420]  ;;  %v648_v36 = vld.sshfl [vmem:[#allocation1] sm:$0xff pattern:$0x75316420] }
  0x74   : > { %618 = vrot.lane.b32.xlu2 %v607_v33, %s3192_s10  ;;  %614 = vrot.lane.b32.xlu1 %v605_v31, %s3192_s10  ;;  %681 = vst [vmem:[#allocation1] ss:$2 sm:$0xff] %v3322_v0  ;;  %v3452_v31 = vsel %vm279_vm3, 1.0, %v5468_v2  ;;  %v214_v33 = vcvt.s32.f32 %v210_v29 }
  0x75   : > { %v3388_v37 = vld.sshfl [vmem:[#allocation1 + $0x10] sm:$0xff pattern:$0x75316420]  ;;  %v651_v38 = vld.sshfl [vmem:[#allocation1 + $0x18] sm:$0xff pattern:$0x75316420] }
  0x76   : > { %366 = vrot.lane.b32.xlu0 %v3336_v7, %s3186_s23  ;;  %683 = vst [vmem:[#allocation1 + $0x10] ss:$2 sm:$0xff] %v3324_v1 }
  0x7b   : > { %v684_v42 = vld.sshfl [vmem:[#allocation1] sm:$0xff pattern:$0x75316420]  ;;  %v685_v43 = vld.sshfl [vmem:[#allocation1 + $0x8] sm:$0xff pattern:$0x75316420] }
  0x7c   : > { %662 = vrot.lane.b32.xlu1 %v651_v38, %s3195_s11  ;;  %658 = vrot.lane.b32.xlu2 %v649_v35, %s3195_s11  ;;  %729 = vst [vmem:[#allocation1] ss:$2 sm:$0xff] %v3322_v0  ;;  %v3459_v38 = vsel %vm295_vm4, 1.0, %v5468_v2  ;;  %vm664_vm4 = vcmp.lt.s32.totalorder %v3401_v48, 55 }
  0x7d   : > { %v3396_v46 = vld.sshfl [vmem:[#allocation1 + $0x10] sm:$0xff pattern:$0x75316420]  ;;  %v687_v47 = vld.sshfl [vmem:[#allocation1 + $0x18] sm:$0xff pattern:$0x75316420] }
  0x7e   : > { %656 = vrot.lane.b32.xlu0 %v648_v36, %s3195_s11  ;;  %731 = vst [vmem:[#allocation1 + $0x10] ss:$2 sm:$0xff] %v3324_v1  ;;  %v311_v36 = vmul.f32 %v3452_v31, %v3449_v30 }
  0x83   : > { %v733_v55 = vld.sshfl [vmem:[#allocation1 + $0x8] sm:$0xff pattern:$0x75316420]  ;;  %v732_v56 = vld.sshfl [vmem:[#allocation1] sm:$0xff pattern:$0x75316420] }
  0x84   : > { %698 = vrot.lane.b32.xlu2 %v687_v47, %s3196_s17  ;;  %692 = vrot.lane.b32.xlu1 %v684_v42, %s3196_s17  ;;  %761 = vst [vmem:[#allocation1] ss:$2 sm:$0xff] %v3322_v0 }
  0x85   : > { %v3410_v59 = vld.sshfl [vmem:[#allocation1 + $0x10] sm:$0xff pattern:$0x75316420]  ;;  %v735_v60 = vld.sshfl [vmem:[#allocation1 + $0x18] sm:$0xff pattern:$0x75316420] }
  0x86   : > { %740 = vrot.lane.b32.xlu0 %v732_v56, %s3197_s19  ;;  %763 = vst [vmem:[#allocation1 + $0x10] ss:$2 sm:$0xff] %v3324_v1 }
  0x8b   : > { %v764_v6 = vld.sshfl [vmem:[#allocation1] sm:$0xff pattern:$0x75316420]  ;;  %v765_v7 = vld.sshfl [vmem:[#allocation1 + $0x8] sm:$0xff pattern:$0x75316420] }
  0x8c   : > { %694 = vrot.lane.b32.xlu1 %v685_v43, %s3196_s17  ;;  %742 = vrot.lane.b32.xlu2 %v733_v55, %s3197_s19  ;;  %809 = vst [vmem:[#allocation1] ss:$2 sm:$0xff] %v3322_v0  ;;  %v341_v43 = vmul.f32 %v311_v36, %v3459_v38 }
  0x8d   : > { %v3426_v13 = vld.sshfl [vmem:[#allocation1 + $0x10] sm:$0xff pattern:$0x75316420]  ;;  %v767_v14 = vld.sshfl [vmem:[#allocation1 + $0x18] sm:$0xff pattern:$0x75316420] }
  0x8e   : > { %811 = vst [vmem:[#allocation1 + $0x10] ss:$2 sm:$0xff] %v3324_v1 }
  0x93   : > { %v812_v16 = vld.sshfl [vmem:[#allocation1] sm:$0xff pattern:$0x75316420]  ;;  %v813_v18 = vld.sshfl [vmem:[#allocation1 + $0x8] sm:$0xff pattern:$0x75316420] }
  0x94   : > { %746 = vrot.lane.b32.xlu1 %v735_v60, %s3197_s19  ;;  %778 = vrot.lane.b32.xlu2 %v767_v14, %s3199_s20  ;;  %842 = vst [vmem:[#allocation1 + $0x1] ss:$2 sm:$0xff] %v3322_v0  ;;  %v3503_v14 = vsel %vm303_vm7, 1.0, %v5468_v2  ;;  %vm5486_vm7 = vcmp.lt.s32.totalorder %v3401_v48, 9 }
  0x95   : > { %820 = vrot.lane.b32.xlu0 %v812_v16, %s3200_s22  ;;  %v815_v21 = vld.sshfl [vmem:[#allocation1 + $0x18] sm:$0xff pattern:$0x75316420]  ;;  %v3437_v22 = vld.sshfl [vmem:[#allocation1 + $0x10] sm:$0xff pattern:$0x75316420]  ;;  %v421_v23 = vmul.f32 %v311_v36, %v3503_v14 }
  0x96   : > { %844 = vst [vmem:[#allocation1 + $0x11] ss:$2 sm:$0xff] %v3324_v1 }
  0x9b   : > { %v845_v25 = vld.sshfl [vmem:[#allocation1] sm:$0xff pattern:$0x75316420]  ;;  %v846_v26 = vld.sshfl [vmem:[#allocation1 + $0x8] sm:$0xff pattern:$0x75316420] }
  0x9c   : > { %330 = vrot.lane.b32.xlu2 %v3328_v3, %s3185_s4  ;;  %772 = vrot.lane.b32.xlu1 %v764_v6, %s3199_s20  ;;  %857 = vst [vmem:[#allocation1] ss:$2 sm:$0xff] %v3322_v0  ;;  %v225_v3 = vmul.f32 %v3404_v54, %v214_v33 }
  0x9d   : > { %853 = vst [vmem:[#allocation2 + $0xc0] sm:$0xf0] %v845_v25  ;;  %v847_v34 = vld.sshfl [vmem:[#allocation1 + $0x10] sm:$0xff pattern:$0x75316420] }
  0x9e   : > { %854 = vst [vmem:[#allocation2 + $0xc8] sm:$0xf0] %v846_v26  ;;  %v848_v35 = vld.sshfl [vmem:[#allocation1 + $0x18] sm:$0xff pattern:$0x75316420]  ;;  %v3461_v40 = vfloor.f32 %v225_v3  ;;  %v3465_v41 = vpop.permute.xlu2 %408 }
  0x9f   : > { %859 = vst [vmem:[#allocation1 + $0x10] ss:$2 sm:$0xff] %v3324_v1 }
  0xa0   : > { %855 = vst [vmem:[#allocation2 + $0xd0] sm:$0xf0] %v847_v34  ;;  %v233_v49 = vmul.f32 64.0, %v3461_v40  ;;  %vm264_vm8 = vcmp.ge.f32.partialorder %v3461_v40, 1.0 }
  0xa1   : > { %856 = vst [vmem:[#allocation2 + $0xd8] sm:$0xf0] %v848_v35 }
  0xa2   : > { %v237_v55 = vsub.f32 %v214_v33, %v233_v49 }
  0xa3   : > { %v860_v39 = vld.sshfl [vmem:[#allocation1] sm:$0xff pattern:$0x75316420]  ;;  %v861_v42 = vld.sshfl [vmem:[#allocation1 + $0x8] sm:$0xff pattern:$0x75316420] }
  0xa4   : > { %774 = vrot.lane.b32.xlu1 %v765_v7, %s3199_s20  ;;  %822 = vrot.lane.b32.xlu2 %v813_v18, %s3200_s22  ;;  %889 = vst [vmem:[#allocation1] ss:$2 sm:$0xff] %v3322_v0  ;;  %v248_v62 = vmul.f32 %v3424_v10, %v237_v55 }
  0xa5   : > { %868 = vrot.lane.b32.xlu0 %v860_v39, %s3201_s27 }
  0xa6   : > { %v3471_v45 = vpop.permute.xlu0 %328  ;;  %v862_v51 = vld.sshfl [vmem:[#allocation1 + $0x10] sm:$0xff pattern:$0x75316420]  ;;  %v3480_v52 = vld.sshfl [vmem:[#allocation1 + $0x18] sm:$0xff pattern:$0x75316420]  ;;  %v3505_v15 = vfloor.f32 %v248_v62 }
  0xa7   : > { %v3473_v47 = vpop.permute.xlu1 %334  ;;  %891 = vst [vmem:[#allocation1 + $0x10] ss:$2 sm:$0xff] %v3324_v1 }
  0xa8   : > { %5610 = vst [vmem:[#allocation9_spill] sm:$0xff] %v3473_v47  ;;  %v340_v50 = vsel %vm5495_vm5, %v3473_v47, %v3471_v45  ;;  %v256_v27 = vmul.f32 8.0, %v3505_v15  ;;  %vm288_vm0 = vcmp.le.f32.partialorder %v3505_v15, 6.0  ;;  %vm280_vm3 = vcmp.ge.f32.partialorder %v3505_v15, 1.0 }
  0xa9   : > { %v345_v53 = vmul.f32 %v341_v43, %v340_v50  ;;  %v457_v43 = vmul.f32 %v3459_v38, %v3449_v30 }
  0xaa   : > { %v260_v39 = vsub.f32 %v237_v55, %v256_v27 }
  0xab   : > { %349 = vst [vmem:[#allocation2] sm:$0xf] %v345_v53  ;;  %v892_v56 = vld.sshfl [vmem:[#allocation1] sm:$0xff pattern:$0x75316420] }
  0xac   : > { %826 = vrot.lane.b32.xlu1 %v815_v21, %s3200_s22  ;;  %872 = vrot.lane.b32.xlu2 %v862_v51, %s3201_s27  ;;  %v893_v57 = vld.sshfl [vmem:[#allocation1 + $0x8] sm:$0xff pattern:$0x75316420]  ;;  %vm296_vm12 = vcmp.ge.f32.partialorder %v260_v39, 1.0  ;;  %vm304_vm13 = vcmp.le.f32.partialorder %v260_v39, 6.0 }
  0xad   : > { %900 = vrot.lane.b32.xlu0 %v892_v56, %s3202_s28  ;;  %937 = vst [vmem:[#allocation1] ss:$2 sm:$0xff] %v3322_v0 }
  0xae   : > { %v3487_v58 = vpop.permute.xlu0 %364  ;;  %v3489_v60 = vpop.permute.xlu2 %492  ;;  %v894_v4 = vld.sshfl [vmem:[#allocation1 + $0x10] sm:$0xff pattern:$0x75316420]  ;;  %v3495_v6 = vld.sshfl [vmem:[#allocation1 + $0x18] sm:$0xff pattern:$0x75316420] }
  0xaf   : > { %939 = vst [vmem:[#allocation1 + $0x10] ss:$2 sm:$0xff] %v3324_v1 }
  0xb0   : > { %v3493_v63 = vpop.permute.xlu1 %370 }
  0xb1   : > { %5611 = vst [vmem:[#allocation10_spill] sm:$0xff] %v3493_v63  ;;  %v376_v7 = vsel %vm372_vm6, %v3493_v63, %v3487_v58 }
  0xb2   : > { %v377_v8 = vmul.f32 %v376_v7, %v311_v36  ;;  %v3554_v7 = vsel %vm296_vm12, 1.0, %v5468_v2  ;;  %vm828_vm12 = vcmp.lt.s32.totalorder %v3401_v48, 1 }
  0xb4   : > { %v385_v16 = vrot.slane %v377_v8, 4  ;;  %410 = vrot.lane.b32.xlu1 %v3344_v11, %s3187_s5  ;;  %904 = vrot.lane.b32.xlu2 %v894_v4, %s3202_s28  ;;  %v941_v18 = vld.sshfl [vmem:[#allocation1 + $0x8] sm:$0xff pattern:$0x75316420]  ;;  %v3518_v11 = vsel %vm264_vm8, 1.0, %v5468_v2  ;;  %vm5485_vm8 = vcmp.lt.s32.totalorder %v3401_v48, 8 }
  0xb5   : > { %950 = vrot.lane.b32.xlu0 %v941_v18, %s3203_s29  ;;  %v940_v21 = vld.sshfl [vmem:[#allocation1] sm:$0xff pattern:$0x75316420] }
  0xb6   : > { %393 = vst [vmem:[#allocation2] sm:$0xf0] %v385_v16  ;;  %v3515_v25 = vpop.permute.xlu2 %494  ;;  %v942_v34 = vld.sshfl [vmem:[#allocation1 + $0x10] sm:$0xff pattern:$0x75316420]  ;;  %v458_v16 = vmul.f32 %v3554_v7, %v3518_v11 }
  0xb7   : > { %5612 = vst [vmem:[#allocation11_spill] sm:$0xff] %v3515_v25  ;;  %v503_v26 = vsel %vm500_vm9, %v3489_v60, %v3515_v25  ;;  %v3529_v35 = vld.sshfl [vmem:[#allocation1 + $0x18] sm:$0xff pattern:$0x75316420] }
  0xb8   : > { %969 = vst [vmem:[#allocation1] ss:$2 sm:$0xff] %v3322_v0  ;;  %v3526_v29 = vpop.permute.xlu0 %414  ;;  %v506_v33 = vmul.f32 %v503_v26, %v3518_v11 }
  0xb9   : > { %5613 = vst [vmem:[#allocation12_spill] sm:$0xff] %v3526_v29  ;;  %v420_v3 = vsel %vm416_vm10, %v3526_v29, %v3465_v41 }
  0xba   : > { %971 = vst [vmem:[#allocation1 + $0x10] ss:$2 sm:$0xff] %v3324_v1  ;;  %v425_v36 = vmul.f32 %v421_v23, %v420_v3 }
  0xbb   : > { %510 = vst [vmem:[#allocation2 + $0x48] sm:$0xf] %v506_v33 }
  0xbc   : > { %429 = vst [vmem:[#allocation2 + $0x20] sm:$0xf] %v425_v36  ;;  %870 = vrot.lane.b32.xlu1 %v861_v42, %s3201_s27  ;;  %948 = vrot.lane.b32.xlu2 %v940_v21, %s3203_s29 }
  0xbd   : > { %952 = vrot.lane.b32.xlu0 %v942_v34, %s3203_s29 }
  0xbe   : > { %v3542_v49 = vpop.permute.xlu2 %526 }
  0xbf   : > { %5614 = vst [vmem:[#allocation13_spill] sm:$0xff] %v3542_v49  ;;  %v972_v50 = vld.sshfl [vmem:[#allocation1] sm:$0xff pattern:$0x75316420] }
  0xc0   : > { %v973_v51 = vld.sshfl [vmem:[#allocation1 + $0x8] sm:$0xff pattern:$0x75316420]  ;;  %v3545_v53 = vpop.permute.xlu1 %450  ;;  %v445_v55 = vpop.permute.xlu0 %444 }
  0xc1   : > { %1021 = vst [vmem:[#allocation1] ss:$2 sm:$0xff] %v3322_v0  ;;  %v974_v42 = vld.sshfl [vmem:[#allocation1 + $0x10] sm:$0xff pattern:$0x75316420]  ;;  %v456_v62 = vsel %vm452_vm11, %v3545_v53, %v445_v55 }
  0xc2   : > { %5615 = vst [vmem:[#allocation14_spill] sm:$0xff] %v3545_v53  ;;  %v3547_v56 = vld.sshfl [vmem:[#allocation1 + $0x18] sm:$0xff pattern:$0x75316420]  ;;  %v461_v4 = vmul.f32 %v457_v43, %v456_v62 }
  0xc3   : > { %1023 = vst [vmem:[#allocation1 + $0x10] ss:$2 sm:$0xff] %v3324_v1 }
  0xc4   : > { %v469_v8 = vrot.slane %v461_v4, 4  ;;  %902 = vrot.lane.b32.xlu1 %v893_v57, %s3202_s28  ;;  %984 = vrot.lane.b32.xlu2 %v974_v42, %s3204_s30 }
  0xc5   : > { %980 = vrot.lane.b32.xlu0 %v972_v50, %s3204_s30  ;;  %v3580_v50 = vsel %vm304_vm13, 1.0, %v5468_v2  ;;  %vm5492_vm13 = vcmp.lt.s32.totalorder %v3401_v48, 7 }
  0xc6   : > { %477 = vst [vmem:[#allocation2 + $0x20] sm:$0xf0] %v469_v8  ;;  %v3561_v18 = vpop.permute.xlu2 %576 }
  0xc8   : > { %v1025_v21 = vld.sshfl [vmem:[#allocation1 + $0x8] sm:$0xff pattern:$0x75316420]  ;;  %v1024_v23 = vld.sshfl [vmem:[#allocation1] sm:$0xff pattern:$0x75316420]  ;;  %v3563_v26 = vpop.permute.xlu1 %446  ;;  %v3565_v27 = vpop.permute.xlu0 %498 }
  0xc9   : > { %5616 = vst [vmem:[#allocation15_spill] sm:$0xff] %v3563_v26  ;;  %v455_v33 = vsel %vm452_vm11, %v445_v55, %v3563_v26  ;;  %v504_v34 = vsel %vm500_vm9, %v3565_v27, %v3489_v60  ;;  %v537_v60 = vmul.f32 %v3503_v14, %v3449_v30  ;;  %v538_v55 = vmul.f32 %v3580_v50, %v3518_v11 }
  0xca   : > { %5617 = vst [vmem:[#allocation16_spill] sm:$0xff] %v3565_v27  ;;  %v1026_v57 = vld.sshfl [vmem:[#allocation1 + $0x10] sm:$0xff pattern:$0x75316420]  ;;  %v462_v36 = vmul.f32 %v458_v16, %v455_v33  ;;  %v505_v43 = vmul.f32 %v504_v34, %v3449_v30  ;;  %v5624_v27 = vmov 0.0  }
  0xcb   : > { %1056 = vst [vmem:[#allocation1] ss:$2 sm:$0xff] %v3322_v0  ;;  %v3575_v3 = vld.sshfl [vmem:[#allocation1 + $0x18] sm:$0xff pattern:$0x75316420]  ;;  %v3658_v15 = vsel %vm280_vm3, 1.0, %v5624_v27 }
  0xcc   : > { %1058 = vst [vmem:[#allocation1 + $0x10] ss:$2 sm:$0xff] %v3324_v1  ;;  %v470_v39 = vrot.slane %v462_v36, 4  ;;  %982 = vrot.lane.b32.xlu1 %v973_v51, %s3204_s30  ;;  %1032 = vrot.lane.b32.xlu2 %v1024_v23, %s3185_s4  ;;  %vm271_vm3 = vcmp.le.f32.partialorder %v3412_v61, 6.0 }
  0xcd   : > { %509 = vst [vmem:[#allocation2 + $0x40] sm:$0xf] %v505_v43  ;;  %1034 = vrot.lane.b32.xlu0 %v1025_v21, %s3185_s4  ;;  %v3610_v43 = vmul.f32 %v3594_v19, %v3449_v30  ;;  %v3622_v30 = vsel %vm288_vm0, 1.0, %v5468_v2  ;;  %vm5493_vm0 = vcmp.lt.s32.totalorder %v3401_v48, 127 }
  0xce   : > { %478 = vst [vmem:[#allocation2 + $0x28] sm:$0xf0] %v470_v39  ;;  %v3591_v42 = vpop.permute.xlu2 %618 }
  0xcf   : > { %5618 = vst [vmem:[#allocation17_spill] sm:$0xff] %v3591_v42 }
  0xd0   : > { %v3596_v4 = vpop.permute.xlu1 %530  ;;  %v525_v8 = vpop.permute.xlu0 %524 }
  0xd1   : > { %5619 = vst [vmem:[#allocation18_spill] sm:$0xff] %v3596_v4  ;;  %v535_v16 = vsel %vm532_vm15, %v525_v8, %v3542_v49  ;;  %v536_v21 = vsel %vm532_vm15, %v3596_v4, %v525_v8 }
  0xd2   : > { %v1060_v62 = vld.sshfl [vmem:[#allocation1 + $0x8] sm:$0xff pattern:$0x75316420]  ;;  %v1059_v51 = vld.sshfl [vmem:[#allocation1] sm:$0xff pattern:$0x75316420]  ;;  %v541_v34 = vmul.f32 %v537_v60, %v536_v21  ;;  %v542_v36 = vmul.f32 %v538_v55, %v535_v16  ;;  %v589_v60 = vmul.f32 %v3610_v43, %v3459_v38 }
  0xd3   : > { %1099 = vst [vmem:[#allocation1] ss:$2 sm:$0xff] %v3322_v0  ;;  %v1061_v23 = vld.sshfl [vmem:[#allocation1 + $0x10] sm:$0xff pattern:$0x75316420] }
  0xd4   : > { %v3605_v33 = vld.sshfl [vmem:[#allocation1 + $0x18] sm:$0xff pattern:$0x75316420]  ;;  %v549_v39 = vrot.slane %v541_v34, 4  ;;  %v550_v44 = vrot.slane %v542_v36, 4  ;;  %1071 = vrot.lane.b32.xlu2 %v1061_v23, %s3186_s23  ;;  %1069 = vrot.lane.b32.xlu1 %v1060_v62, %s3186_s23 }
  0xd5   : > { %1101 = vst [vmem:[#allocation1 + $0x10] ss:$2 sm:$0xff] %v3324_v1  ;;  %1036 = vrot.lane.b32.xlu0 %v1026_v57, %s3185_s4 }
  0xd6   : > { %557 = vst [vmem:[#allocation2 + $0x40] sm:$0xf0] %v549_v39  ;;  %v3619_v55 = vpop.permute.xlu2 %658 }
  0xd7   : > { %5620 = vst [vmem:[#allocation19_spill] sm:$0xff] %v3619_v55 }
  0xd8   : > { %558 = vst [vmem:[#allocation2 + $0x48] sm:$0xf0] %v550_v44  ;;  %v3624_v8 = vpop.permute.xlu0 %582  ;;  %v562_v44 = vmul.f32 %v3622_v30, %v3518_v11 }
  0xd9   : > { %5621 = vst [vmem:[#allocation20_spill] sm:$0xff] %v3624_v8  ;;  %v588_v57 = vsel %vm584_vm1, %v3624_v8, %v3561_v18 }
  0xda   : > { %v1102_v16 = vld.sshfl [vmem:[#allocation1] sm:$0xff pattern:$0x75316420]  ;;  %v1103_v62 = vld.sshfl [vmem:[#allocation1 + $0x8] sm:$0xff pattern:$0x75316420]  ;;  %v593_v34 = vmul.f32 %v589_v60, %v588_v57  ;;  %v590_v36 = vmul.f32 %v562_v44, %v3554_v7 }
  0xdb   : > { %1134 = vst [vmem:[#allocation1] ss:$2 sm:$0xff] %v3322_v0 }
  0xdc   : > { %v1104_v21 = vld.sshfl [vmem:[#allocation1 + $0x10] sm:$0xff pattern:$0x75316420]  ;;  %v3630_v23 = vld.sshfl [vmem:[#allocation1 + $0x18] sm:$0xff pattern:$0x75316420]  ;;  %1110 = vrot.lane.b32.xlu2 %v1102_v16, %s3187_s5 }
  0xdd   : > { %1136 = vst [vmem:[#allocation1 + $0x10] ss:$2 sm:$0xff] %v3324_v1  ;;  %1067 = vrot.lane.b32.xlu0 %v1059_v51, %s3186_s23 }
  0xde   : > { %597 = vst [vmem:[#allocation2 + $0x60] sm:$0xf] %v593_v34  ;;  %v613_v39 = vpop.permute.xlu1 %612  ;;  %v3640_v2 = vpop.permute.xlu2 %698 }
  0xdf   : > { %5622 = vst [vmem:[#allocation21_spill] sm:$0xff] %v3640_v2  ;;  %v624_v60 = vsel %vm620_vm2, %v3591_v42, %v613_v39 }
  0xe0   : > { %v3646_v57 = vpop.permute.xlu0 %578  ;;  %v625_v34 = vmul.f32 %v624_v60, %v3610_v43 }
  0xe1   : > { %5623 = vst [vmem:[#allocation22_spill] sm:$0xff] %v3646_v57  ;;  %v587_v51 = vsel %vm584_vm1, %v3561_v18, %v3646_v57  ;;  %v3665_v18 = vmul.f32 %v3658_v15, %v3518_v11 }
  0xe2   : > { %v594_v29 = vmul.f32 %v590_v36, %v587_v51  ;;  %v633_v25 = vrot.slane %v625_v34, 4  ;;  %v1137_v26 = vld.sshfl [vmem:[#allocation1] sm:$0xff pattern:$0x75316420] }
  0xe3   : > { %v1138_v53 = vld.sshfl [vmem:[#allocation1 + $0x8] sm:$0xff pattern:$0x75316420] }
  0xe4   : > { %v1139_v16 = vld.sshfl [vmem:[#allocation1 + $0x10] sm:$0xff pattern:$0x75316420]  ;;  %v3649_v47 = vld.sshfl [vmem:[#allocation1 + $0x18] sm:$0xff pattern:$0x75316420]  ;;  %1145 = vrot.lane.b32.xlu2 %v1137_v26, %s3188_s6 }
  0xe5   : > { %1183 = vst [vmem:[#allocation1 + $0x10] ss:$2 sm:$0xff] %v3324_v1  ;;  %1149 = vrot.lane.b32.xlu1 %v1139_v16, %s3188_s6  ;;  %1112 = vrot.lane.b32.xlu0 %v1103_v62, %s3187_s5 }
  0xe6   : > { %598 = vst [vmem:[#allocation2 + $0x68] sm:$0xf] %v594_v29  ;;  %v3667_v60 = vpop.permute.xlu1 %614  ;;  %v3669_v36 = vpop.permute.xlu2 %742 }
  0xe7   : > { %641 = vst [vmem:[#allocation2 + $0x60] sm:$0xf0] %v633_v25  ;;  %v623_v34 = vsel %vm620_vm2, %v613_v39, %v3667_v60 }
  0xe8   : > { %1181 = vst [vmem:[#allocation1] ss:$2 sm:$0xff] %v3322_v0  ;;  %v3674_v29 = vpop.permute.xlu0 %366  ;;  %v626_v26 = vmul.f32 %v623_v34, %v562_v44  ;;  %v669_v34 = vmul.f32 %v3610_v43, %v3503_v14 }
  0xe9   : > { %5625 = vst [vmem:[#allocation23_spill] sm:$0xff] %v3667_v60  ;;  %v375_v25 = vsel %vm372_vm6, %v3487_v58, %v3674_v29 }
  0xea   : > { %5626 = vst [vmem:[#allocation24_spill] sm:$0xff] %v3669_v36  ;;  %v378_v11 = vmul.f32 %v375_v25, %v3665_v18  ;;  %v634_v51 = vrot.slane %v626_v26, 4  ;;  %v670_v26 = vmul.f32 %v562_v44, %v3580_v50 }
  0xeb   : > { %5627 = vst [vmem:[#allocation25_spill] sm:$0xff] %v3674_v29  ;;  %v342_v29 = vmul.f32 %v3665_v18, %v3554_v7 }
  0xec   : > { %v1186_v62 = vld.sshfl [vmem:[#allocation1 + $0x10] sm:$0xff pattern:$0x75316420]  ;;  %v3680_v16 = vld.sshfl [vmem:[#allocation1 + $0x18] sm:$0xff pattern:$0x75316420] }
  0xed   : > { %1214 = vst [vmem:[#allocation1 + $0x10] ss:$2 sm:$0xff] %v3324_v1  ;;  %v386_v49 = vrot.slane %v378_v11, 4  ;;  %1114 = vrot.lane.b32.xlu0 %v1104_v21, %s3187_s5 }
  0xee   : > { %642 = vst [vmem:[#allocation2 + $0x68] sm:$0xf0] %v634_v51  ;;  %v3687_v58 = vpop.permute.xlu1 %662  ;;  %v3693_v25 = vpop.permute.xlu2 %778 }
  0xef   : > { %v1184_v4 = vld.sshfl [vmem:[#allocation1] sm:$0xff pattern:$0x75316420]  ;;  %v1185_v39 = vld.sshfl [vmem:[#allocation1 + $0x8] sm:$0xff pattern:$0x75316420] }
  0xf0   : > { %1192 = vrot.lane.b32.xlu1 %v1184_v4, %s3189_s7  ;;  %394 = vst [vmem:[#allocation2 + $0x8] sm:$0xf0] %v386_v49  ;;  %1194 = vrot.lane.b32.xlu2 %v1185_v39, %s3189_s7  ;;  %v657_v21 = vpop.permute.xlu0 %656  ;;  %v705_v39 = vmul.f32 %v3459_v38, %v3452_v31 }
  0xf1   : > { %5628 = vst [vmem:[#allocation26_spill] sm:$0xff] %v3687_v58  ;;  %v667_v49 = vsel %vm664_vm4, %v657_v21, %v3619_v55  ;;  %v668_v4 = vsel %vm664_vm4, %v3687_v58, %v657_v21 }
  0xf2   : > { %5629 = vst [vmem:[#allocation27_spill] sm:$0xff] %v3693_v25  ;;  %v673_v43 = vmul.f32 %v669_v34, %v668_v4  ;;  %v674_v44 = vmul.f32 %v670_v26, %v667_v49 }
  0xf3   : > { %1212 = vst [vmem:[#allocation1] ss:$2 sm:$0xff] %v3322_v0 }
  0xf4   : > { %v1217_v11 = vld.sshfl [vmem:[#allocation1 + $0x10] sm:$0xff pattern:$0x75316420]  ;;  %v3696_v51 = vld.sshfl [vmem:[#allocation1 + $0x18] sm:$0xff pattern:$0x75316420] }
  0xf5   : > { %1265 = vst [vmem:[#allocation1 + $0x10] ss:$2 sm:$0xff] %v3324_v1  ;;  %1147 = vrot.lane.b32.xlu0 %v1138_v53, %s3188_s6 }
  0xf6   : > { %677 = vst [vmem:[#allocation2 + $0x80] sm:$0xf] %v673_v43  ;;  %v693_v21 = vpop.permute.xlu1 %692  ;;  %v3714_v49 = vpop.permute.xlu2 %330 }
  0xf7   : > { %678 = vst [vmem:[#allocation2 + $0x88] sm:$0xf] %v674_v44  ;;  %v704_v4 = vsel %vm5486_vm7, %v3640_v2, %v693_v21  ;;  %v339_v53 = vsel %vm5495_vm5, %v3471_v45, %v3714_v49  ;;  %v706_v45 = vmul.f32 %v3554_v7, %v3658_v15 }
  0xf8   : > { %1227 = vrot.lane.b32.xlu1 %v1217_v11, %s3190_s8  ;;  %1196 = vrot.lane.b32.xlu2 %v1186_v62, %s3189_s7  ;;  %5630 = vst [vmem:[#allocation28_spill] sm:$0xff] %v3714_v49  ;;  %v709_v43 = vmul.f32 %v705_v39, %v704_v4  ;;  %v346_v11 = vmul.f32 %v342_v29, %v339_v53  ;;  %v741_v44 = vpop.permute.xlu0 %740 }
  0xf9   : > { %v751_v58 = vsel %vm5485_vm8, %v741_v44, %v3669_v36 }
  0xfa   : > { %v1215_v34 = vld.sshfl [vmem:[#allocation1] sm:$0xff pattern:$0x75316420]  ;;  %v1216_v26 = vld.sshfl [vmem:[#allocation1 + $0x8] sm:$0xff pattern:$0x75316420]  ;;  %v754_v57 = vmul.f32 %v751_v58, %v3658_v15 }
  0xfb   : > { %1263 = vst [vmem:[#allocation1] ss:$2 sm:$0xff] %v3322_v0  ;;  %v717_v63 = vrot.slane %v709_v43, 4 }
  0xfc   : > { %v1268_v62 = vld.sshfl [vmem:[#allocation1 + $0x10] sm:$0xff pattern:$0x75316420]  ;;  %v3724_v55 = vld.sshfl [vmem:[#allocation1 + $0x18] sm:$0xff pattern:$0x75316420] }
  0xfd   : > { %350 = vst [vmem:[#allocation2 + $0x8] sm:$0xf] %v346_v11 }
  0xfe   : > { %1300 = vst [vmem:[#allocation1 + $0x10] ss:$2 sm:$0xff] %v3324_v1  ;;  %v3734_v4 = vpop.permute.xlu1 %694  ;;  %v3736_v53 = vpop.permute.xlu2 %822 }
  0xff   : > { %725 = vst [vmem:[#allocation2 + $0x80] sm:$0xf0] %v717_v63  ;;  %v703_v63 = vsel %vm5486_vm7, %v693_v21, %v3734_v4  ;;  %vm988_vm7 = vcmp.lt.s32.totalorder %v3401_v48, 119 }
 0x100   : > { %758 = vst [vmem:[#allocation2 + $0xa8] sm:$0xf] %v754_v57  ;;  %1223 = vrot.lane.b32.xlu2 %v1215_v34, %s3190_s8  ;;  %v710_v58 = vmul.f32 %v706_v45, %v703_v63 }
 0x101   : > { %5631 = vst [vmem:[#allocation29_spill] sm:$0xff] %v3734_v4 }
 0x102   : > { %v1267_v29 = vld.sshfl [vmem:[#allocation1 + $0x8] sm:$0xff pattern:$0x75316420]  ;;  %v1266_v39 = vld.sshfl [vmem:[#allocation1] sm:$0xff pattern:$0x75316420] }
 0x103   : > { %1276 = vrot.lane.b32.xlu1 %v1267_v29, %s3191_s9  ;;  %1274 = vrot.lane.b32.xlu0 %v1266_v39, %s3191_s9  ;;  %1298 = vst [vmem:[#allocation1] ss:$2 sm:$0xff] %v3322_v0  ;;  %v718_v57 = vrot.slane %v710_v58, 4 }
 0x105   : > { %v1304_v43 = vld.sshfl [vmem:[#allocation1 + $0x18] sm:$0xff pattern:$0x75316420]  ;;  %v1303_v11 = vld.sshfl [vmem:[#allocation1 + $0x10] sm:$0xff pattern:$0x75316420] }
 0x106   : > { %726 = vst [vmem:[#allocation2 + $0x88] sm:$0xf0] %v718_v57  ;;  %v3747_v39 = vpop.permute.xlu1 %746  ;;  %v3749_v49 = vpop.permute.xlu2 %872 }
 0x107   : > { %1343 = vst [vmem:[#allocation1 + $0x10] ss:$2 sm:$0xff] %v3324_v1  ;;  %v752_v21 = vsel %vm5485_vm8, %v3747_v39, %v741_v44  ;;  %v821_v45 = vpop.permute.xlu0 %820  ;;  %vm5494_vm8 = vcmp.lt.s32.totalorder %v3401_v48, 121 }
 0x108   : > { %1225 = vrot.lane.b32.xlu2 %v1216_v26, %s3190_s8  ;;  %5632 = vst [vmem:[#allocation30_spill] sm:$0xff] %v3747_v39  ;;  %v753_v1 = vmul.f32 %v752_v21, %v3452_v31  ;;  %v831_v26 = vsel %vm828_vm12, %v821_v45, %v3736_v53  ;;  %v1408_v39 = vld [vmem:[#allocation2 + $0x60] sm:$0xff] }
 0x109   : > { %5633 = vst [vmem:[#allocation31_spill] sm:$0xff] %v3749_v49  ;;  %v834_v63 = vmul.f32 %v831_v26, %v3554_v7 }
 0x10a   : > { %v1301_v34 = vld.sshfl [vmem:[#allocation1] sm:$0xff pattern:$0x75316420]  ;;  %v1302_v29 = vld.sshfl [vmem:[#allocation1 + $0x8] sm:$0xff pattern:$0x75316420] }
 0x10b   : > { %1313 = vrot.lane.b32.xlu1 %v1303_v11, %s3192_s10  ;;  %1309 = vrot.lane.b32.xlu0 %v1301_v34, %s3192_s10  ;;  %1341 = vst [vmem:[#allocation1] ss:$2 sm:$0xff] %v3322_v0  ;;  %v785_v0 = vmul.f32 %v3503_v14, %v3452_v31 }
 0x10c   : > { %757 = vst [vmem:[#allocation2 + $0xa0] sm:$0xf] %v753_v1 }
 0x10d   : > { %838 = vst [vmem:[#allocation2 + $0xc8] sm:$0xf] %v834_v63  ;;  %v786_v63 = vmul.f32 %v3580_v50, %v3658_v15 }
 0x10e   : > { %v773_v44 = vpop.permute.xlu1 %772  ;;  %v3766_v57 = vpop.permute.xlu2 %904  ;;  %v1346_v1 = vld.sshfl [vmem:[#allocation1 + $0x10] sm:$0xff pattern:$0x75316420] }
 0x10f   : > { %5634 = vst [vmem:[#allocation32_spill] sm:$0xff] %v3766_v57  ;;  %v784_v11 = vsel %vm5492_vm13, %v3693_v25, %v773_v44  ;;  %v1409_v25 = vld [vmem:[#allocation2 + $0x68] sm:$0xff] }
 0x110   : > { %1278 = vrot.lane.b32.xlu2 %v1268_v62, %s3191_s9  ;;  %v789_v34 = vmul.f32 %v785_v0, %v784_v11 }
 0x112   : > { %v1344_v58 = vld.sshfl [vmem:[#allocation1] sm:$0xff pattern:$0x75316420]  ;;  %v797_v21 = vrot.slane %v789_v34, 4 }
 0x113   : > { %1352 = vrot.lane.b32.xlu1 %v1344_v58, %s3195_s11  ;;  %1311 = vrot.lane.b32.xlu0 %v1302_v29, %s3192_s10  ;;  %v1345_v26 = vld.sshfl [vmem:[#allocation1 + $0x8] sm:$0xff pattern:$0x75316420] }
 0x114   : > { %805 = vst [vmem:[#allocation2 + $0xa0] sm:$0xf0] %v797_v21 }
 0x116   : > { %v3776_v62 = vpop.permute.xlu1 %774  ;;  %v3778_v36 = vpop.permute.xlu2 %948 }
 0x117   : > { %5635 = vst [vmem:[#allocation33_spill] sm:$0xff] %v3776_v62  ;;  %v783_v29 = vsel %vm5492_vm13, %v773_v44, %v3776_v62  ;;  %v3785_v0 = vpop.permute.xlu0 %868 }
 0x118   : > { %1356 = vrot.lane.b32.xlu2 %v1346_v1, %s3195_s11  ;;  %5636 = vst [vmem:[#allocation34_spill] sm:$0xff] %v3785_v0  ;;  %v790_v58 = vmul.f32 %v786_v63, %v783_v29  ;;  %v1347_v29 = vld.sshfl [vmem:[#allocation1 + $0x18] sm:$0xff pattern:$0x75316420] }
 0x11a   : > { %v798_v11 = vrot.slane %v790_v58, 4 }
 0x11b   : > { %1354 = vrot.lane.b32.xlu1 %v1345_v26, %s3195_s11  ;;  %1315 = vrot.lane.b32.xlu0 %v1304_v43, %s3192_s10 }
 0x11c   : > { %806 = vst [vmem:[#allocation2 + $0xa8] sm:$0xf0] %v798_v11 }
 0x11e   : > { %v3789_v34 = vpop.permute.xlu1 %826  ;;  %v3791_v21 = vpop.permute.xlu2 %984 }
 0x11f   : > { %v832_v43 = vsel %vm828_vm12, %v3789_v34, %v821_v45  ;;  %v3800_v44 = vpop.permute.xlu0 %900 }
 0x120   : > { %1229 = vrot.lane.b32.xlu2 %v3696_v51, %s3190_s8  ;;  %5637 = vst [vmem:[#allocation35_spill] sm:$0xff] %v3800_v44  ;;  %v833_v1 = vmul.f32 %v832_v43, %v3459_v38  ;;  %v422_v51 = vmul.f32 %v3665_v18, %v3580_v50 }
 0x122   : > { %837 = vst [vmem:[#allocation2 + $0xc0] sm:$0xf] %v833_v1 }
 0x123   : > { %1151 = vrot.lane.b32.xlu1 %v3649_v47, %s3188_s6  ;;  %1280 = vrot.lane.b32.xlu0 %v3724_v55, %s3191_s9 }
 0x126   : > { %v3808_v47 = vpop.permute.xlu1 %410  ;;  %v3810_v55 = vpop.permute.xlu2 %1032 }
 0x127   : > { %5638 = vst [vmem:[#allocation36_spill] sm:$0xff] %v3808_v47  ;;  %v419_v18 = vsel %vm416_vm10, %v3465_v41, %v3808_v47  ;;  %v951_v45 = vpop.permute.xlu0 %950  ;;  %v1412_v47 = vld [vmem:[#allocation2 + $0x80] sm:$0xff] }
 0x128   : > { %1198 = vrot.lane.b32.xlu2 %v3680_v16, %s3189_s7  ;;  %5639 = vst [vmem:[#allocation37_spill] sm:$0xff] %v3810_v55  ;;  %v426_v26 = vmul.f32 %v422_v51, %v419_v18  ;;  %v959_v16 = vsel %vm956_vm14, %v3778_v36, %v951_v45  ;;  %v913_v51 = vmul.f32 %v3459_v38, %v3594_v19 }
 0x129   : > { %v961_v63 = vmul.f32 %v959_v16, %v3594_v19  ;;  %v914_v18 = vmul.f32 %v3554_v7, %v3622_v30  ;;  %v3857_v16 = vsel %vm271_vm3, 1.0, %v5624_v27  ;;  %vm272_vm3 = vcmp.le.f32.partialorder %v3461_v40, 6.0 }
 0x12a   : > { %430 = vst [vmem:[#allocation2 + $0x28] sm:$0xf] %v426_v26  ;;  %v3888_v40 = vsel %vm272_vm3, 1.0, %v5624_v27  ;;  %v4017_v62 = vmul.f32 %v3594_v19, %v3857_v16 }
 0x12b   : > { %1116 = vrot.lane.b32.xlu1 %v3630_v23, %s3187_s5  ;;  %1073 = vrot.lane.b32.xlu0 %v3605_v33, %s3186_s23  ;;  %965 = vst [vmem:[#allocation2 + $0x100] sm:$0xf] %v961_v63 }
 0x12e   : > { %v871_v33 = vpop.permute.xlu1 %870  ;;  %v3827_v23 = vpop.permute.xlu2 %1071 }
 0x12f   : > { %v878_v41 = vsel %vm5493_vm0, %v871_v33, %v3749_v49  ;;  %v879_v58 = vsel %vm5493_vm0, %v3785_v0, %v871_v33  ;;  %v3838_v11 = vpop.permute.xlu0 %952 }
 0x130   : > { %986 = vrot.lane.b32.xlu2 %v3547_v56, %s3204_s30  ;;  %v881_v56 = vmul.f32 %v879_v58, %v3503_v14  ;;  %v882_v43 = vmul.f32 %v878_v41, %v3580_v50  ;;  %v958_v1 = vsel %vm956_vm14, %v951_v45, %v3838_v11  ;;  %v3873_v41 = vmul.f32 %v3452_v31, %v3857_v16 }
 0x132   : > { %885 = vst [vmem:[#allocation2 + $0xe0] sm:$0xf] %v881_v56  ;;  %v994_v56 = vmul.f32 %v3580_v50, %v3622_v30 }
 0x133   : > { %1358 = vrot.lane.b32.xlu1 %v1347_v29, %s3195_s11  ;;  %1038 = vrot.lane.b32.xlu0 %v3575_v3, %s3185_s4  ;;  %v962_v3 = vmul.f32 %v958_v1, %v3622_v30  ;;  %886 = vst [vmem:[#allocation2 + $0xe8] sm:$0xf] %v882_v43  ;;  %v1044_v43 = vmul.f32 %v3873_v41, %v3459_v38 }
 0x135   : > { %966 = vst [vmem:[#allocation2 + $0x108] sm:$0xf] %v962_v3 }
 0x136   : > { %v903_v26 = vpop.permute.xlu1 %902  ;;  %v3854_v45 = vpop.permute.xlu2 %1110 }
 0x137   : > { %v910_v61 = vsel %vm5494_vm8, %v903_v26, %v3766_v57  ;;  %v3869_v63 = vpop.permute.xlu0 %980 }
 0x138   : > { %954 = vrot.lane.b32.xlu2 %v3529_v35, %s3203_s29  ;;  %v911_v35 = vsel %vm5494_vm8, %v3800_v44, %v903_v26  ;;  %v918_v33 = vmul.f32 %v914_v18, %v910_v61 }
 0x139   : > { %v917_v29 = vmul.f32 %v913_v51, %v911_v35 }
 0x13a   : > { %v926_v58 = vrot.slane %v918_v33, 4 }
 0x13b   : > { %906 = vrot.lane.b32.xlu1 %v3495_v6, %s3202_s28  ;;  %874 = vrot.lane.b32.xlu0 %v3480_v52, %s3201_s27  ;;  %v925_v6 = vrot.slane %v917_v29, 4  ;;  %v993_v52 = vmul.f32 %v3503_v14, %v3594_v19 }
 0x13c   : > { %934 = vst [vmem:[#allocation2 + $0xe8] sm:$0xf0] %v926_v58 }
 0x13d   : > { %933 = vst [vmem:[#allocation2 + $0xe0] sm:$0xf0] %v925_v6 }
 0x13e   : > { %v983_v31 = vpop.permute.xlu1 %982  ;;  %v3885_v1 = vpop.permute.xlu2 %1145 }
 0x13f   : > { %v990_v3 = vsel %vm988_vm7, %v983_v31, %v3791_v21  ;;  %v1035_v51 = vpop.permute.xlu0 %1034 }
 0x140   : > { %824 = vrot.lane.b32.xlu2 %v3437_v22, %s3200_s22  ;;  %v991_v22 = vsel %vm988_vm7, %v3869_v63, %v983_v31  ;;  %v998_v26 = vmul.f32 %v994_v56, %v990_v3  ;;  %v1042_v27 = vsel %vm5495_vm5, %v3810_v55, %v1035_v51 }
 0x141   : > { %v997_v18 = vmul.f32 %v993_v52, %v991_v22  ;;  %v1048_v61 = vmul.f32 %v1044_v43, %v1042_v27 }
 0x142   : > { %v1006_v35 = vrot.slane %v998_v26, 4 }
 0x143   : > { %776 = vrot.lane.b32.xlu1 %v3426_v13, %s3199_s20  ;;  %696 = vrot.lane.b32.xlu0 %v3396_v46, %s3196_s17  ;;  %v1018_v13 = vmul.f32 %v3658_v15, %v3888_v40  ;;  %v1005_v46 = vrot.slane %v997_v18, 4  ;;  %1052 = vst [vmem:[#allocation2 + $0x120] sm:$0xf] %v1048_v61 }
 0x144   : > { %1014 = vst [vmem:[#allocation2 + $0x108] sm:$0xf0] %v1006_v35  ;;  %v1424_v55 = vld [vmem:[#allocation2 + $0xe0] sm:$0xff] }
 0x145   : > { %1013 = vst [vmem:[#allocation2 + $0x100] sm:$0xf0] %v1005_v46  ;;  %v1045_v29 = vmul.f32 %v1018_v13, %v3554_v7 }
 0x146   : > { %v1070_v33 = vpop.permute.xlu1 %1069 }
 0x147   : > { %v3912_v6 = vpop.permute.xlu0 %1036  ;;  %v1076_v15 = vsel %vm372_vm6, %v1070_v33, %v3827_v23 }
 0x148   : > { %616 = vrot.lane.b32.xlu2 %v3381_v32, %s3192_s10  ;;  %5640 = vst [vmem:[#allocation38_spill] sm:$0xff] %v3912_v6  ;;  %v1041_v58 = vsel %vm5495_vm5, %v1035_v51, %v3912_v6  ;;  %v1080_v52 = vmul.f32 %v1076_v15, %v1018_v13  ;;  %s2998_s10 = sshll.u32 %s3314_s26, 5 }
 0x149   : > { %v1049_v32 = vmul.f32 %v1045_v29, %v1041_v58  ;;  %v1122_v29 = vmul.f32 %v3873_v41, %v3503_v14 }
 0x14a   : > { %v1195_v56 = vpop.permute.xlu2 %1194  ;;  %v1088_v43 = vrot.slane %v1080_v52, 4 }
 0x14b   : > { %744 = vrot.lane.b32.xlu1 %v3410_v59, %s3197_s19  ;;  %660 = vrot.lane.b32.xlu0 %v3388_v37, %s3195_s11  ;;  %1053 = vst [vmem:[#allocation2 + $0x128] sm:$0xf] %v1049_v32  ;;  %v211_v59 = vadd.s32 256, %v3401_v48  ;;  %v212_v37 = vadd.s32 384, %v3401_v48  ;;  %s3006_s11 = sshll.u32 %s3249_s16, 5 }
 0x14c   : > { %1096 = vst [vmem:[#allocation2 + $0x128] sm:$0xf0] %v1088_v43  ;;  %s2903_s20 = scalar_lea.hbm %s5466_s3, %s3006_s11 }
 0x14d   : > { %v215_v31 = vcvt.s32.f32 %v211_v59  ;;  %v216_v22 = vcvt.s32.f32 %v212_v37  ;;  %s2907_s28 = sshll.u32 %s2903_s20, 4  ;;  %s2908_s28 = int_to_ptr.hbm [resolvable:$true] %s2907_s28 }
 0x14e   : > { %s3131_s29 = sshra.s32 %s2908_s28, 4  ;;  %s3132_s29 = int_to_ptr.hbm [resolvable:$true] %s3131_s29 }
 0x14f   : > { %v3928_v3 = vpop.permute.xlu0 %1067  ;;  %v226_v51 = vmul.f32 %v3404_v54, %v215_v31  ;;  %s3133_s30 = scalar_lea.hbm %s3132_s29, 32  ;;  %p3138_p1 = scmp.lt.s32.totalorder %s3132_s29, %s5466_s3 }
 0x150   : > { %580 = vrot.lane.b32.xlu2 %v3374_v28, %s3191_s9  ;;  %v1077_v18 = vsel %vm372_vm6, %v3928_v3, %v1070_v33  ;;  %v227_v28 = vmul.f32 %v3404_v54, %v216_v22  ;;  %p3134_p9 = scmp.ne.s32.totalorder %s3132_s29, %s3133_s30 }
 0x151   : > { %v1079_v27 = vmul.f32 %v1077_v18, %v3873_v41  ;;  %v3942_v46 = vfloor.f32 %v226_v51 }
 0x152   : > { %v3934_v26 = vpop.permute.xlu2 %1196  ;;  %v3944_v35 = vfloor.f32 %v227_v28  ;;  %p3135_p13 = pnand %p3134_p9, %p3278_p11 }
 0x153   : > { %528 = vrot.lane.b32.xlu1 %v3367_v24, %s3190_s8  ;;  %448 = vrot.lane.b32.xlu0 %v3353_v17, %s3188_s6  ;;  %v1201_v24 = vsel %vm500_vm9, %v1195_v56, %v3934_v26  ;;  %v1087_v61 = vrot.slane %v1079_v27, 4  ;;  %v234_v15 = vmul.f32 64.0, %v3942_v46  ;;  %vm273_vm13 = vcmp.le.f32.partialorder %v3942_v46, 6.0 }
 0x154   : > { %v1205_v17 = vmul.f32 %v1201_v24, %v3888_v40  ;;  %v235_v41 = vmul.f32 64.0, %v3944_v35  ;;  %vm274_vm0 = vcmp.le.f32.partialorder %v3944_v35, 6.0  ;;  %p3136_p0 = pneg %p3135_p13 }
 0x155   : > { %1095 = vst [vmem:[#allocation2 + $0x120] sm:$0xf0] %v1087_v61 }
 0x156   : > { %1209 = vst [vmem:[#allocation2 + $0x168] sm:$0xf] %v1205_v17  ;;  %v239_v43 = vsub.f32 %v216_v22, %v235_v41  ;;  %v1396_v41 = vld [vmem:[#allocation2] sm:$0xff] }
 0x157   : > { %v3948_v33 = vpop.permute.xlu1 %1149  ;;  %v1113_v54 = vpop.permute.xlu0 %1112 }
 0x158   : > { %368 = vrot.lane.b32.xlu2 %v3340_v9, %s3186_s23  ;;  %v1120_v58 = vsel %vm416_vm10, %v3854_v45, %v1113_v54  ;;  %v238_v9 = vsub.f32 %v215_v31, %v234_v15  ;;  %v250_v22 = vmul.f32 %v3424_v10, %v239_v43 }
 0x159   : > { %v1126_v32 = vmul.f32 %v1122_v29, %v1120_v58 }
 0x15a   : > { %v3960_v52 = vpop.permute.xlu2 %1223  ;;  %v249_v37 = vmul.f32 %v3424_v10, %v238_v9  ;;  %v3986_v29 = vfloor.f32 %v250_v22  ;;  %v1157_v10 = vmul.f32 %v3459_v38, %v3857_v16 }
 0x15b   : > { %496 = vrot.lane.b32.xlu1 %v3360_v20, %s3189_s7  ;;  %412 = vrot.lane.b32.xlu0 %v3348_v12, %s3187_s5  ;;  %1130 = vst [vmem:[#allocation2 + $0x140] sm:$0xf] %v1126_v32  ;;  %v1123_v20 = vmul.f32 %v1018_v13, %v3580_v50  ;;  %v1235_v12 = vmul.f32 %v3503_v14, %v3857_v16  ;;  %s203_s5 = scalar_select %p202_p6, %s3249_s16, 1 }
 0x15c   : > { %v3984_v17 = vfloor.f32 %v249_v37  ;;  %s2892_s16 = scalar_lea.sflag [#allocation5], %s3314_s26 }
 0x15d   : > { %s2999_s6 = sshll.u32 %s203_s5, 3  ;;  %s3137_s5 = scalar_lea.hbm %s5466_s3, 64 }
 0x15e   : > { %v257_v58 = vmul.f32 8.0, %v3984_v17  ;;  %s205_s9 = scalar_lea.vmem %s5465_s2, %s2999_s6  ;;  %p3139_p3 = scmp.lt.s32.totalorder %s3137_s5, %s3133_s30 }
 0x15f   : > { %v3968_v59 = vpop.permute.xlu0 %1114 }
 0x160   : > { %v1119_v18 = vsel %vm416_vm10, %v1113_v54, %v3968_v59  ;;  %v1236_v54 = vmul.f32 %v3580_v50, %v3888_v40  ;;  %p3140_p4 = por %p3139_p3, %p3138_p1 }
 0x161   : > { %v1127_v27 = vmul.f32 %v1123_v20, %v1119_v18  ;;  %v258_v18 = vmul.f32 8.0, %v3986_v29 }
 0x162   : > { %v3971_v51 = vpop.permute.xlu1 %1192  ;;  %v1226_v31 = vpop.permute.xlu2 %1225  ;;  %p3141_p7 = pnand %p3140_p4, %p3136_p0 }
 0x163   : > { %332 = vrot.lane.b32.xlu1 %v3333_v5, %s3185_s4  ;;  %v1202_v13 = vsel %vm500_vm9, %v3971_v51, %v1195_v56  ;;  %v1233_v5 = vsel %vm532_vm15, %v3960_v52, %v1226_v31  ;;  %1131 = vst [vmem:[#allocation2 + $0x148] sm:$0xf] %v1127_v27  ;;  %v1158_v56 = vmul.f32 %v3554_v7, %v3888_v40 }
 0x164   : > { %v1204_v24 = vmul.f32 %v1202_v13, %v3857_v16  ;;  %v1239_v28 = vmul.f32 %v1235_v12, %v1233_v5  ;;  %v1404_v5 = vld [vmem:[#allocation2 + $0x40] sm:$0xff]  ;;  %v1286_v16 = vmul.f32 %v4017_v62, %v3459_v38 }
 0x165   : > { %v4050_v38 = vld [vmem:[#allocation2 + $0x1c0] sm:$0xff] }
 0x166   : > { %1208 = vst [vmem:[#allocation2 + $0x160] sm:$0xf] %v1204_v24  ;;  %v1247_v61 = vrot.slane %v1239_v28, 4  ;;  %v1400_v24 = vld [vmem:[#allocation2 + $0x20] sm:$0xff] }
 0x167   : > { %v1148_v15 = vpop.permute.xlu0 %1147 }
 0x168   : > { %1255 = vst [vmem:[#allocation2 + $0x160] sm:$0xf0] %v1247_v61  ;;  %v1154_v20 = vsel %vm452_vm11, %v1148_v15, %v3948_v33  ;;  %v1155_v12 = vsel %vm452_vm11, %v3885_v1, %v1148_v15  ;;  %v4011_v61 = vmul.f32 %v3622_v30, %v3888_v40  ;;  %v4013_v15 = vand.u32 4294901760, %v1396_v41 }
 0x169   : > { %v1161_v13 = vmul.f32 %v1157_v10, %v1155_v12  ;;  %v1162_v27 = vmul.f32 %v1158_v56, %v1154_v20  ;;  %v4021_v56 = vsub.f32 %v239_v43, %v258_v18  ;;  %v4025_v20 = vand.u32 4294901760, %v1400_v24 }
 0x16a   : > { %v3995_v32 = vpop.permute.xlu1 %1227  ;;  %v4003_v37 = vpop.permute.xlu2 %1278  ;;  %5641 = vst [vmem:[#allocation39_spill] sm:$0xff] %v4013_v15  ;;  %v5644_v30 = vlaneseq  ;;  %v4028_v40 = vand.u32 4294901760, %v1412_v47  ;;  %v4030_v12 = vand.u32 4294901760, %v1408_v39  ;;  %v1287_v19 = vmul.f32 %v4011_v61, %v3554_v7 }
 0x16b   : > { %v1232_v22 = vsel %vm532_vm15, %v1226_v31, %v3995_v32  ;;  %v1169_v4 = vrot.slane %v1161_v13, 4  ;;  %v1170_v2 = vrot.slane %v1162_v27, 4  ;;  %v4019_v31 = vsub.f32 %v238_v9, %v257_v58  ;;  %5643 = vst [vmem:[#allocation41_spill] sm:$0xff] %v4025_v20 }
 0x16c   : > { %v1240_v28 = vmul.f32 %v1236_v54, %v1232_v22  ;;  %v4023_v54 = vand.u32 4294901760, %v1404_v5  ;;  %vm1378_vm3 = vcmp.lt.s32.totalorder %v5644_v30, 512  ;;  %5645 = vst [vmem:[#allocation42_spill] sm:$0xff] %v4028_v40  ;;  %vm306_vm5 = vcmp.le.f32.partialorder %v4021_v56, 6.0 }
 0x16d   : > { %1177 = vst [vmem:[#allocation2 + $0x140] sm:$0xf0] %v1169_v4  ;;  %vm305_vm8 = vcmp.le.f32.partialorder %v4019_v31, 6.0  ;;  %v3205_v9 = vmov 1.0   ;;  %v4043_v43 = vsub.f32 %v1400_v24, %v4025_v20  ;;  %v4053_v18 = vsel %vm273_vm13, 1.0, %v4050_v38 }
 0x16e   : > { %v1248_v10 = vrot.slane %v1240_v28, 4  ;;  %5642 = vst [vmem:[#allocation40_spill] sm:$0xff] %v4023_v54  ;;  %v4056_v22 = vsub.f32 %v1412_v47, %v4028_v40  ;;  %v4059_v13 = vsub.f32 %v1408_v39, %v4030_v12  ;;  %v4062_v27 = vsub.f32 %v1404_v5, %v4023_v54 }
 0x16f   : > { %5646 = vst [vmem:[#allocation43_spill] sm:$0xff] %v4030_v12  ;;  %v4073_v28 = vsel %vm274_vm0, 1.0, %v4050_v38  ;;  %v4078_v39 = vsel %vm305_vm8, 1.0, %v4050_v38  ;;  %v4086_v30 = vand.u32 4294901760, %v4050_v38  ;;  %v4108_v54 = vand.u32 4294901760, %v1409_v25 }
 0x170   : > { %1256 = vst [vmem:[#allocation2 + $0x168] sm:$0xf0] %v1248_v10  ;;  %v4083_v10 = vsel %vm306_vm5, 1.0, %v4050_v38  ;;  %v5663_v6 = vand.u32 4294901760, %v4059_v13  ;;  %v5665_v60 = vand.u32 4294901760, %v4062_v27  ;;  %v5668_v42 = vand.u32 4294901760, %v4056_v22 }
 0x171   : > { %1178 = vst [vmem:[#allocation2 + $0x148] sm:$0xf0] %v1170_v2  ;;  %v4046_v2 = vsub.f32 %v1396_v41, %v4013_v15  ;;  %1461 = vmatpush.msra.mxu0 %v4086_v30  ;;  %1657 = vmatpush.msra.mxu3 %v4086_v30  ;;  %v1405_v15 = vld [vmem:[#allocation2 + $0x48] sm:$0xff]  ;;  %vm289_vm5 = vcmp.le.f32.partialorder %v3984_v17, 6.0  ;;  %vm290_vm8 = vcmp.le.f32.partialorder %v3986_v29, 6.0  ;;  %vm297_vm13 = vcmp.ge.f32.partialorder %v4019_v31, 1.0 }
 0x172   : > { %v4039_v4 = vpop.permute.xlu2 %1356  ;;  %1381 = vst.msk [vmem:[#allocation2 + $0x1a4] ss:$8 sm:$0xf] %vm1378_vm3, %v3205_v9  ;;  %v1238_v9 = vmul.f32 %v4083_v10, %v4073_v28  ;;  %vm298_vm0 = vcmp.ge.f32.partialorder %v4021_v56, 1.0  ;;  %vm281_vm3 = vcmp.ge.f32.partialorder %v3984_v17, 1.0 }
 0x173   : > { %5647 = vst [vmem:[#allocation44_spill] sm:$0xff] %v4043_v43  ;;  %1463 = vmatpush.msra.mxu0 %v4086_v30  ;;  %1659 = vmatpush.msra.mxu3 %v4086_v30  ;;  %v5660_v44 = vand.u32 4294901760, %v4046_v2 }
 0x174   : > { %5648 = vst [vmem:[#allocation45_spill] sm:$0xff] %v4046_v2 }
 0x175   : > { %v1277_v7 = vpop.permute.xlu1 %1276  ;;  %v4048_v58 = vpop.permute.xlu0 %1274  ;;  %5649 = vst [vmem:[#allocation46_spill] sm:$0xff] %v4056_v22  ;;  %v4123_v57 = vsub.f32 %v4046_v2, %v5660_v44 }
 0x176   : > { %5650 = vst [vmem:[#allocation47_spill] sm:$0xff] %v4059_v13  ;;  %v1283_v41 = vsel %vm584_vm1, %v1277_v7, %v4003_v37  ;;  %v1284_v24 = vsel %vm584_vm1, %v4048_v58, %v1277_v7 }
 0x177   : > { %5651 = vst [vmem:[#allocation48_spill] sm:$0xff] %v4062_v27  ;;  %v1291_v47 = vmul.f32 %v1287_v19, %v1283_v41  ;;  %v1290_v5 = vmul.f32 %v1286_v16, %v1284_v24  ;;  %v4094_v19 = vsub.f32 %v4050_v38, %v4086_v30  ;;  %v1420_v16 = vld [vmem:[#allocation2 + $0xc0] sm:$0xff]  ;;  %v1237_v24 = vmul.f32 %v4078_v39, %v4053_v18 }
 0x178   : > { %5652 = vst [vmem:[#allocation49_spill] sm:$0xff] %v4086_v30  ;;  %v1416_v41 = vld [vmem:[#allocation2 + $0xa0] sm:$0xff]  ;;  %v4111_v49 = vand.u32 4294901760, %v1420_v16 }
 0x179   : > { %1295 = vst [vmem:[#allocation2 + $0x188] sm:$0xf] %v1291_v47  ;;  %1604 = vmatpush.msra.mxu2 %v4094_v19  ;;  %v4105_v20 = vand.u32 4294901760, %v4094_v19  ;;  %v4113_v7 = vand.u32 4294901760, %v1416_v41  ;;  %v5658_v47 = vand.u32 4294901760, %v4043_v43 }
 0x17a   : > { %5653 = vst [vmem:[#allocation50_spill] sm:$0xff] %v4094_v19  ;;  %v1230_v0 = vpop.permute.xlu2 %1229 }
 0x17b   : > { %1294 = vst [vmem:[#allocation2 + $0x180] sm:$0xf] %v1290_v5  ;;  %v4118_v12 = vsub.f32 %v4043_v43, %v5658_v47  ;;  %v1231_v30 = vsel %vm532_vm15, %v3995_v32, %v1230_v0  ;;  %v1234_v8 = vsel %vm532_vm15, %v1230_v0, %v3960_v52  ;;  %1607 = vmatpush.msra.mxu2 %v4094_v19  ;;  %v4138_v43 = vand.u32 4294901760, %v1405_v15 }
 0x17c   : > { %5654 = vst [vmem:[#allocation51_spill] sm:$0xff] %v4105_v20  ;;  %v1504_v47 = vsub.f32 %v4094_v19, %v4105_v20  ;;  %v1241_v44 = vmul.f32 %v1237_v24, %v1231_v30  ;;  %v1242_v2 = vmul.f32 %v1238_v9, %v1234_v8  ;;  %v4143_v32 = vsub.f32 %v4059_v13, %v5663_v6  ;;  %v4166_v20 = vld [vmem:[#allocation2 + $0x88] sm:$0xff] }
 0x17d   : > { %5655 = vst [vmem:[#allocation52_spill] sm:$0xff] %v4108_v54  ;;  %v4125_v5 = vpop.permute.xlu1 %1313  ;;  %v4133_v40 = vpop.permute.xlu0 %1309  ;;  %v4148_v0 = vsub.f32 %v4062_v27, %v5665_v60  ;;  %v4155_v19 = vsub.f32 %v4056_v22, %v5668_v42  ;;  %v4158_v8 = vsub.f32 %v1409_v25, %v4108_v54  ;;  %v4161_v6 = vsub.f32 %v1420_v16, %v4111_v49  ;;  %v1421_v60 = vld [vmem:[#allocation2 + $0xc8] sm:$0xff]  ;;  %v1428_v25 = vld [vmem:[#allocation2 + $0x100] sm:$0xff] }
 0x17e   : > { %5656 = vst [vmem:[#allocation53_spill] sm:$0xff] %v4111_v49  ;;  %v4150_v52 = vand.u32 4294901760, %v1504_v47  ;;  %v1249_v30 = vrot.slane %v1241_v44, 4  ;;  %v1250_v9 = vrot.slane %v1242_v2, 4  ;;  %v4164_v24 = vsub.f32 %v1416_v41, %v4113_v7 }
 0x17f   : > { %5657 = vst [vmem:[#allocation54_spill] sm:$0xff] %v4113_v7  ;;  %v4169_v47 = vand.u32 4294901760, %v1424_v55  ;;  %v4176_v41 = vsub.f32 %v1405_v15, %v4138_v43  ;;  %v4180_v27 = vand.u32 4294901760, %v1421_v60  ;;  %v4183_v42 = vand.u32 4294901760, %v4166_v20 }
 0x180   : > { %5659 = vst [vmem:[#allocation55_spill] sm:$0xff] %v4118_v12  ;;  %1506 = vmatpush.msra.mxu1 %v4150_v52  ;;  %v1432_v12 = vld [vmem:[#allocation2 + $0x120] sm:$0xff] }
 0x181   : > { %5661 = vst [vmem:[#allocation56_spill] sm:$0xff] %v4123_v57 }
 0x182   : > { %5662 = vst [vmem:[#allocation57_spill] sm:$0xff] %v4138_v43  ;;  %1512 = vmatpush.msra.mxu1 %v4150_v52  ;;  %v1199_v44 = vpop.permute.xlu2 %1198  ;;  %v4198_v43 = vand.u32 4294901760, %v1428_v25 }
 0x183   : > { %5664 = vst [vmem:[#allocation58_spill] sm:$0xff] %v4143_v32  ;;  %v1200_v2 = vsel %vm500_vm9, %v3934_v26, %v1199_v44  ;;  %v1203_v54 = vsel %vm500_vm9, %v1199_v44, %v3971_v51 }
 0x184   : > { %5666 = vst [vmem:[#allocation59_spill] sm:$0xff] %v4148_v0  ;;  %v1206_v15 = vmul.f32 %v1200_v2, %v4053_v18  ;;  %v1440_v2 = vld [vmem:[#allocation2 + $0x160] sm:$0xff]  ;;  %v4236_v0 = vsub.f32 %v1421_v60, %v4180_v27  ;;  %v1364_v60 = vmul.f32 %v4017_v62, %v3503_v14  ;;  %v4267_v14 = vsel %vm297_vm13, 1.0, %v4050_v38 }
 0x185   : > { %5667 = vst [vmem:[#allocation60_spill] sm:$0xff] %v4150_v52  ;;  %v4190_v16 = vpop.permute.xlu1 %1352 }
 0x186   : > { %5669 = vst [vmem:[#allocation61_spill] sm:$0xff] %v4155_v19 }
 0x187   : > { %5670 = vst [vmem:[#allocation62_spill] sm:$0xff] %v4158_v8  ;;  %v1425_v8 = vld [vmem:[#allocation2 + $0xe8] sm:$0xff] }
 0x188   : > { %5671 = vst [vmem:[#allocation63_spill] sm:$0xff] %v4161_v6 }
 0x189   : > { %5672 = vst [vmem:[#allocation64_spill] sm:$0xff] %v4164_v24 }
 0x18a   : > { %5673 = vst [vmem:[#allocation65_spill] sm:$0xff] %v4166_v20  ;;  %v5679_v20 = vand.u32 4294901760, %v4161_v6 }
 0x18b   : > { %5674 = vst [vmem:[#allocation66_spill] sm:$0xff] %v4169_v47 }
 0x18c   : > { %1257 = vst [vmem:[#allocation2 + $0x170] sm:$0xf0] %v1249_v30  ;;  %v1312_v30 = vpop.permute.xlu0 %1311 }
 0x18d   : > { %5675 = vst [vmem:[#allocation67_spill] sm:$0xff] %v4176_v41  ;;  %v4201_v41 = vsub.f32 %v1424_v55, %v4169_v47  ;;  %v1318_v57 = vsel %vm620_vm2, %v1312_v30, %v4125_v5  ;;  %v1319_v26 = vsel %vm620_vm2, %v4133_v40, %v1312_v30  ;;  %v4216_v55 = vsel %vm289_vm5, 1.0, %v4050_v38 }
 0x18e   : > { %1258 = vst [vmem:[#allocation2 + $0x178] sm:$0xf0] %v1250_v9  ;;  %v1207_v9 = vmul.f32 %v1203_v54, %v4073_v28  ;;  %v1321_v51 = vmul.f32 %v1319_v26, %v4017_v62  ;;  %v1322_v44 = vmul.f32 %v1318_v57, %v4011_v61  ;;  %v4221_v54 = vsel %vm290_vm8, 1.0, %v4050_v38  ;;  %v1355_v62 = vpop.permute.xlu1 %1354 }
 0x18f   : > { %5676 = vst [vmem:[#allocation68_spill] sm:$0xff] %v4180_v27  ;;  %v4226_v30 = vsub.f32 %v4161_v6, %v5679_v20  ;;  %v5681_v57 = vand.u32 4294901760, %v4164_v24  ;;  %v995_v20 = vmul.f32 %v4078_v39, %v4216_v55  ;;  %v996_v52 = vmul.f32 %v4083_v10, %v4221_v54  ;;  %v987_v27 = vpop.permute.xlu2 %986 }
 0x190   : > { %5677 = vst [vmem:[#allocation69_spill] sm:$0xff] %v4183_v42  ;;  %v4233_v42 = vand.u32 4294901760, %v1425_v8  ;;  %v1330_v32 = vrot.slane %v1322_v44, 4  ;;  %v4254_v44 = vand.u32 4294901760, %v1432_v12  ;;  %vm282_vm5 = vcmp.ge.f32.partialorder %v3986_v29, 1.0 }
 0x191   : > { %5678 = vst [vmem:[#allocation70_spill] sm:$0xff] %v4198_v43  ;;  %v4231_v26 = vsub.f32 %v4164_v24, %v5681_v57  ;;  %v4245_v57 = vsub.f32 %v1428_v25, %v4198_v43  ;;  %v4262_v25 = vmul.f32 %v4221_v54, %v4073_v28  ;;  %v1361_v31 = vsel %vm664_vm4, %v1355_v62, %v4039_v4 }
 0x192   : > { %1210 = vst [vmem:[#allocation2 + $0x170] sm:$0xf] %v1206_v15  ;;  %v1329_v15 = vrot.slane %v1321_v51, 4  ;;  %v4252_v51 = vand.u32 4294901760, %v1440_v2  ;;  %v1362_v56 = vsel %vm664_vm4, %v4190_v16, %v1355_v62  ;;  %v4316_v17 = vsub.f32 %v1432_v12, %v4254_v44 }
 0x193   : > { %5680 = vst [vmem:[#allocation71_spill] sm:$0xff] %v4226_v30  ;;  %vm5701_vm8 = vcmp.lt.s32.totalorder %v3401_v48, 121 }
 0x194   : > { %5682 = vst [vmem:[#allocation72_spill] sm:$0xff] %v4231_v26  ;;  %v1368_v26 = vmul.f32 %v1364_v60, %v1362_v56  ;;  %vm5703_vm13 = vmmov %vm5701_vm8 }
 0x195   : > { %5683 = vst [vmem:[#allocation73_spill] sm:$0xff] %v4236_v0  ;;  %v4258_v0 = vmul.f32 %v4216_v55, %v4053_v18 }
 0x196   : > { %1211 = vst [vmem:[#allocation2 + $0x178] sm:$0xf] %v1207_v9  ;;  %v1365_v9 = vmul.f32 %v4011_v61, %v3580_v50  ;;  %v4272_v50 = vsel %vm298_vm0, 1.0, %v4050_v38  ;;  %v989_v61 = vsel %vm988_vm7, %v3791_v21, %v987_v27  ;;  %v4288_v21 = vld [vmem:[#allocation2 + $0x108] sm:$0xff] }
 0x197   : > { %1337 = vst [vmem:[#allocation2 + $0x180] sm:$0xf0] %v1329_v15  ;;  %v1316_v15 = vpop.permute.xlu0 %1315  ;;  %v999_v19 = vmul.f32 %v995_v20, %v989_v61  ;;  %v1436_v20 = vld [vmem:[#allocation2 + $0x140] sm:$0xff]  ;;  %v1159_v61 = vmul.f32 %v4267_v14, %v4053_v18  ;;  %v1288_v29 = vmul.f32 %v4258_v0, %v4267_v14  ;;  %v1289_v12 = vmul.f32 %v4262_v25, %v4272_v50 }
 0x198   : > { %5684 = vst [vmem:[#allocation74_spill] sm:$0xff] %v4254_v44  ;;  %v1369_v22 = vmul.f32 %v1365_v9, %v1361_v31  ;;  %v1152_v31 = vpop.permute.xlu1 %1151 }
 0x199   : > { %1338 = vst [vmem:[#allocation2 + $0x188] sm:$0xf0] %v1330_v32  ;;  %v992_v32 = vsel %vm988_vm7, %v987_v27, %v3869_v63  ;;  %v1317_v63 = vsel %vm620_vm2, %v4125_v5, %v1316_v15  ;;  %v1320_v27 = vsel %vm620_vm2, %v1316_v15, %v4133_v40  ;;  %v1007_v30 = vrot.slane %v999_v19, 4 }
 0x19a   : > { %v1000_v13 = vmul.f32 %v996_v52, %v992_v32  ;;  %v1323_v6 = vmul.f32 %v1317_v63, %v4258_v0  ;;  %v1324_v62 = vmul.f32 %v1320_v27, %v4262_v25  ;;  %1372 = vst [vmem:[#allocation2 + $0x1a0] sm:$0xf] %v1368_v26  ;;  %v4301_v52 = vsel %vm281_vm3, 1.0, %v4050_v38 }
 0x19b   : > { %v4305_v5 = vand.u32 4294901760, %v4288_v21  ;;  %v4308_v40 = vsub.f32 %v1425_v8, %v4233_v42  ;;  %1373 = vst [vmem:[#allocation2 + $0x1a8] sm:$0xf] %v1369_v22  ;;  %v4313_v26 = vsel %vm282_vm5, 1.0, %v4050_v38  ;;  %v1160_v8 = vmul.f32 %v4272_v50, %v4073_v28 }
 0x19c   : > { %v1008_v24 = vrot.slane %v1000_v13, 4  ;;  %v1331_v13 = vrot.slane %v1323_v6, 4  ;;  %v1332_v19 = vrot.slane %v1324_v62, 4  ;;  %1015 = vst [vmem:[#allocation2 + $0x110] sm:$0xf0] %v1007_v30  ;;  %v4325_v22 = vsub.f32 %v1440_v2, %v4252_v51  ;;  %v955_v6 = vpop.permute.xlu2 %954 }
 0x19d   : > { %v4333_v30 = vmul.f32 %v4301_v52, %v4053_v18  ;;  %v4335_v15 = vand.u32 4294901760, %v1436_v20  ;;  %v957_v2 = vsel %vm956_vm14, %v3838_v11, %v955_v6  ;;  %v4345_v63 = vmul.f32 %v4313_v26, %v4073_v28 }
 0x19e   : > { %v1444_v9 = vld [vmem:[#allocation2 + $0x180] sm:$0xff]  ;;  %1016 = vst [vmem:[#allocation2 + $0x118] sm:$0xf0] %v1008_v24  ;;  %v960_v24 = vsel %vm956_vm14, %v955_v6, %v3778_v36  ;;  %v1153_v27 = vsel %vm452_vm11, %v3948_v33, %v1152_v31  ;;  %v1156_v11 = vsel %vm452_vm11, %v1152_v31, %v3885_v1  ;;  %v963_v62 = vmul.f32 %v957_v2, %v4216_v55 }
 0x19f   : > { %v4322_v32 = vand.u32 4294901760, %v1444_v9  ;;  %1339 = vst [vmem:[#allocation2 + $0x190] sm:$0xf0] %v1331_v13  ;;  %v1281_v56 = vpop.permute.xlu0 %1280  ;;  %v964_v36 = vmul.f32 %v960_v24, %v4221_v54  ;;  %v1163_v13 = vmul.f32 %v1159_v61, %v1153_v27  ;;  %v1164_v6 = vmul.f32 %v1160_v8, %v1156_v11 }
 0x1a0   : > { %1340 = vst [vmem:[#allocation2 + $0x198] sm:$0xf0] %v1332_v19  ;;  %v1282_v28 = vsel %vm584_vm1, %v4003_v37, %v1281_v56  ;;  %v1285_v19 = vsel %vm584_vm1, %v1281_v56, %v4048_v58  ;;  %v4365_v60 = vsub.f32 %v1436_v20, %v4335_v15  ;;  %v5555_v31 = vand.u32 4294901760, %v4325_v22 }
 0x1a1   : > { %v4348_v18 = vsub.f32 %v1444_v9, %v4322_v32  ;;  %v1448_v9 = vld [vmem:[#allocation2 + $0x1a0] sm:$0xff]  ;;  %967 = vst [vmem:[#allocation2 + $0x110] sm:$0xf] %v963_v62  ;;  %v1292_v33 = vmul.f32 %v1288_v29, %v1282_v28  ;;  %v1171_v61 = vrot.slane %v1163_v13, 4  ;;  %v1172_v8 = vrot.slane %v1164_v6, 4  ;;  %v1117_v28 = vpop.permute.xlu1 %1116 }
 0x1a2   : > { %v4369_v2 = vand.u32 4294901760, %v1448_v9  ;;  %968 = vst [vmem:[#allocation2 + $0x118] sm:$0xf] %v964_v36  ;;  %v1293_v37 = vmul.f32 %v1289_v12, %v1285_v19  ;;  %v5556_v24 = vand.u32 4294901760, %v4316_v17  ;;  %v5685_v58 = vand.u32 4294901760, %v4245_v57 }
 0x1a3   : > { %v5558_v1 = vand.u32 4294901760, %v4348_v18  ;;  %1296 = vst [vmem:[#allocation2 + $0x190] sm:$0xf] %v1292_v33  ;;  %v5686_v20 = vand.u32 4294901760, %v4201_v41  ;;  %v4384_v27 = vsub.f32 %v4288_v21, %v4305_v5  ;;  %v1124_v11 = vmul.f32 %v4333_v30, %v4078_v39 }
 0x1a4   : > { %v4375_v29 = vsub.f32 %v4245_v57, %v5685_v58  ;;  %1179 = vst [vmem:[#allocation2 + $0x150] sm:$0xf0] %v1171_v61  ;;  %1465 = vmatpush.msra.mxu0 %v4369_v2  ;;  %1661 = vmatpush.msra.mxu3 %v4369_v2  ;;  %v4389_v12 = vsub.f32 %v1448_v9, %v4369_v2  ;;  %v825_v36 = vpop.permute.xlu2 %824  ;;  %v5557_v6 = vand.u32 4294901760, %v4365_v60  ;;  %vm265_vm7 = vcmp.ge.f32.partialorder %v3942_v46, 1.0 }
 0x1a5   : > { %v4380_v56 = vsub.f32 %v4201_v41, %v5686_v20  ;;  %v1125_v62 = vmul.f32 %v4345_v63, %v4083_v10  ;;  %1180 = vst [vmem:[#allocation2 + $0x158] sm:$0xf0] %v1172_v8  ;;  %v1522_v21 = vsub.f32 %v4348_v18, %v5558_v1  ;;  %v4401_v13 = vsub.f32 %v4325_v22, %v5555_v31  ;;  %v1441_v8 = vld [vmem:[#allocation2 + $0x168] sm:$0xff]  ;;  %v5704_v1 = vld [vmem:[#allocation64_spill] sm:$0xff] }
 0x1a6   : > { %1297 = vst [vmem:[#allocation2 + $0x198] sm:$0xf] %v1293_v37  ;;  %1467 = vmatpush.msra.mxu0 %v4322_v32  ;;  %1610 = vmatpush.msra.mxu2 %v4389_v12  ;;  %v5559_v19 = vand.u32 4294901760, %v4389_v12  ;;  %v829_v9 = vsel %vm828_vm12, %v825_v36, %v3789_v34  ;;  %v830_v33 = vsel %vm828_vm12, %v3736_v53, %v825_v36  ;;  %vm266_vm14 = vcmp.ge.f32.partialorder %v3944_v35, 1.0 }
 0x1a7   : > { %v1074_v61 = vpop.permute.xlu0 %1073  ;;  %1663 = vmatpush.msra.mxu3 %v4322_v32  ;;  %v1118_v37 = vsel %vm416_vm10, %v3968_v59, %v1117_v28  ;;  %v1121_v58 = vsel %vm416_vm10, %v1117_v28, %v3854_v45  ;;  %v835_v34 = vmul.f32 %v830_v33, %v4267_v14  ;;  %v836_v20 = vmul.f32 %v829_v9, %v4272_v50  ;;  %v4434_v45 = vld [vmem:[#allocation2 + $0x128] sm:$0xff] }
 0x1a8   : > { %v1128_v31 = vmul.f32 %v1124_v11, %v1118_v37  ;;  %v1129_v53 = vmul.f32 %v1125_v62, %v1121_v58  ;;  %1469 = vmatpush.msra.mxu0 %v4252_v51  ;;  %1613 = vmatpush.msra.mxu2 %v4348_v18  ;;  %v1516_v36 = vsub.f32 %v4389_v12, %v5559_v19  ;;  %v4432_v59 = vsel %vm265_vm7, 1.0, %v4050_v38 }
 0x1a9   : > { %1665 = vmatpush.msra.mxu3 %v4252_v51  ;;  %839 = vst [vmem:[#allocation2 + $0xd0] sm:$0xf] %v835_v34  ;;  %v1075_v11 = vsel %vm372_vm6, %v3827_v23, %v1074_v61  ;;  %v1078_v62 = vsel %vm372_vm6, %v1074_v61, %v3928_v3  ;;  %v4446_v28 = vsel %vm266_vm14, 1.0, %v4050_v38  ;;  %v4448_v46 = vand.u32 4294901760, %v1441_v8 }
 0x1aa   : > { %1132 = vst [vmem:[#allocation2 + $0x150] sm:$0xf] %v1128_v31  ;;  %1471 = vmatpush.msra.mxu0 %v4335_v15  ;;  %1616 = vmatpush.msra.mxu2 %v4325_v22  ;;  %v1517_v9 = vand.u32 4294901760, %v1516_v36  ;;  %v1081_v33 = vmul.f32 %v1075_v11, %v4333_v30  ;;  %v1082_v23 = vmul.f32 %v1078_v62, %v4345_v63  ;;  %v1523_v37 = vand.u32 4294901760, %v1522_v21  ;;  %v1359_v11 = vpop.permute.xlu1 %1358  ;;  %v5688_v62 = vld [vmem:[#allocation17_spill] sm:$0xff] }
 0x1ab   : > { %1133 = vst [vmem:[#allocation2 + $0x158] sm:$0xf] %v1129_v53  ;;  %1667 = vmatpush.msra.mxu3 %v4335_v15  ;;  %v1366_v3 = vmul.f32 %v4258_v0, %v4078_v39  ;;  %v1534_v35 = vsub.f32 %v4365_v60, %v5557_v6  ;;  %v4462_v38 = vmul.f32 %v4216_v55, %v4432_v59  ;;  %v4465_v31 = vand.u32 4294901760, %v4434_v45  ;;  %v5690_v6 = vld [vmem:[#allocation38_spill] sm:$0xff] }
 0x1ac   : > { %1473 = vmatpush.msra.mxu0 %v4254_v44  ;;  %1518 = vmatpush.msra.mxu1 %v1517_v9  ;;  %840 = vst [vmem:[#allocation2 + $0xd8] sm:$0xf] %v836_v20  ;;  %v1089_v21 = vrot.slane %v1081_v33, 4  ;;  %v1090_v61 = vrot.slane %v1082_v23, 4  ;;  %v1367_v0 = vmul.f32 %v4262_v25, %v4083_v10  ;;  %v4472_v58 = vmul.f32 %v4221_v54, %v4446_v28  ;;  %v617_v20 = vpop.permute.xlu2 %616  ;;  %v5689_v9 = vld [vmem:[#allocation23_spill] sm:$0xff] }
 0x1ad   : > { %1619 = vmatpush.msra.mxu2 %v4365_v60  ;;  %1669 = vmatpush.msra.mxu3 %v4254_v44  ;;  %v1529_v34 = vand.u32 4294901760, %v4401_v13  ;;  %v1540_v53 = vsub.f32 %v4316_v17, %v5556_v24  ;;  %v1046_v36 = vmul.f32 %v4333_v30, %v4267_v14  ;;  %v4483_v25 = vsub.f32 %v1441_v8, %v4448_v46  ;;  %v1449_v24 = vld [vmem:[#allocation2 + $0x1a8] sm:$0xff] }
 0x1ae   : > { %1097 = vst [vmem:[#allocation2 + $0x130] sm:$0xf0] %v1089_v21  ;;  %1475 = vmatpush.msra.mxu0 %v4198_v43  ;;  %1524 = vmatpush.msra.mxu1 %v1523_v37  ;;  %v621_v13 = vsel %vm620_vm2, %v617_v20, %v5688_v62  ;;  %v622_v33 = vsel %vm620_vm2, %v5689_v9, %v617_v20  ;;  %v1445_v20 = vld [vmem:[#allocation2 + $0x188] sm:$0xff]  ;;  %vm5691_vm2 = vcmp.lt.s32.totalorder %v3401_v48, 73  ;;  %vm5726_vm3 = vcmp.lt.s32.totalorder %v3401_v48, 7 }
 0x1af   : > { %5687 = vst [vmem:[#allocation75_spill] sm:$0xff] %v4483_v25  ;;  %v1047_v23 = vmul.f32 %v4345_v63, %v4272_v50  ;;  %v1039_v30 = vpop.permute.xlu0 %1038  ;;  %1622 = vmatpush.msra.mxu2 %v4316_v17  ;;  %1671 = vmatpush.msra.mxu3 %v4198_v43  ;;  %v1360_v8 = vsel %vm664_vm4, %v4039_v4, %v1359_v11  ;;  %vm5693_vm12 = vmmov %vm5691_vm2  ;;  %v5731_v43 = vld [vmem:[#allocation60_spill] sm:$0xff]  ;;  %v5732_v44 = vld [vmem:[#allocation58_spill] sm:$0xff]  ;;  %vm5753_vm14 = vcmp.lt.s32.totalorder %v3401_v48, 8 }
 0x1b0   : > { %1098 = vst [vmem:[#allocation2 + $0x138] sm:$0xf0] %v1090_v61  ;;  %v1363_v37 = vsel %vm664_vm4, %v1359_v11, %v4190_v16  ;;  %v627_v21 = vmul.f32 %v622_v33, %v4462_v38  ;;  %v1370_v62 = vmul.f32 %v1366_v3, %v1360_v8  ;;  %1477 = vmatpush.msra.mxu0 %v4169_v47  ;;  %v1535_v61 = vand.u32 4294901760, %v1534_v35  ;;  %v5692_v11 = vld [vmem:[#allocation37_spill] sm:$0xff]  ;;  %v1437_v8 = vld [vmem:[#allocation2 + $0x148] sm:$0xff]  ;;  %vm5728_vm5 = vmmov %vm5726_vm3 }
 0x1b1   : > { %v1371_v63 = vmul.f32 %v1367_v0, %v1363_v37  ;;  %1530 = vmatpush.msra.mxu1 %v1529_v34  ;;  %v628_v9 = vmul.f32 %v621_v13, %v4472_v58  ;;  %1625 = vmatpush.msra.mxu2 %v4245_v57  ;;  %v1040_v16 = vsel %vm5691_vm2, %v5690_v6, %v1039_v30  ;;  %v4513_v0 = vand.u32 4294901760, %v1449_v24  ;;  %vm5755_vm2 = vmmov %vm5753_vm14 }
 0x1b2   : > { %1673 = vmatpush.msra.mxu3 %v4169_v47  ;;  %v635_v4 = vrot.slane %v627_v21, 4  ;;  %v1043_v3 = vsel %vm5693_vm12, %v1039_v30, %v5692_v11  ;;  %1374 = vst [vmem:[#allocation2 + $0x1b0] sm:$0xf] %v1370_v62  ;;  %1479 = vmatpush.msra.mxu0 %v4111_v49  ;;  %v1541_v35 = vand.u32 4294901760, %v1540_v53  ;;  %v1050_v13 = vmul.f32 %v1046_v36, %v1040_v16  ;;  %v5694_v62 = vld [vmem:[#allocation63_spill] sm:$0xff]  ;;  %v5698_v11 = vld [vmem:[#allocation22_spill] sm:$0xff] }
 0x1b3   : > { %1536 = vmatpush.msra.mxu1 %v1535_v61  ;;  %v636_v34 = vrot.slane %v628_v9, 4  ;;  %v4516_v33 = vand.u32 4294901760, %v1445_v20  ;;  %1375 = vst [vmem:[#allocation2 + $0x1b8] sm:$0xf] %v1371_v63  ;;  %1628 = vmatpush.msra.mxu2 %v4201_v41  ;;  %v1051_v6 = vmul.f32 %v1047_v23, %v1043_v3  ;;  %v1547_v30 = vand.u32 4294901760, %v4375_v29  ;;  %v5696_v9 = vld [vmem:[#allocation42_spill] sm:$0xff] }
 0x1b4   : > { %1675 = vmatpush.msra.mxu3 %v4111_v49  ;;  %v1553_v37 = vand.u32 4294901760, %v4380_v56  ;;  %v591_v21 = vmul.f32 %v4462_v38, %v4267_v14  ;;  %1481 = vmatpush.msra.mxu0 %v4113_v7  ;;  %643 = vst [vmem:[#allocation2 + $0x70] sm:$0xf0] %v635_v4  ;;  %v915_v53 = vmul.f32 %v4267_v14, %v4216_v55  ;;  %v581_v29 = vpop.permute.xlu2 %580  ;;  %v4537_v61 = vand.u32 4294901760, %v1437_v8  ;;  %v5697_v4 = vld [vmem:[#allocation20_spill] sm:$0xff]  ;;  %v5709_v49 = vld [vmem:[#allocation31_spill] sm:$0xff] }
 0x1b5   : > { %1542 = vmatpush.msra.mxu1 %v1541_v35  ;;  %v916_v36 = vmul.f32 %v4272_v50, %v4221_v54  ;;  %v592_v23 = vmul.f32 %v4472_v58, %v4272_v50  ;;  %1631 = vmatpush.msra.mxu2 %v5694_v62  ;;  %644 = vst [vmem:[#allocation2 + $0x78] sm:$0xf0] %v636_v34  ;;  %v907_v54 = vpop.permute.xlu1 %906  ;;  %v5727_v47 = vld [vmem:[#allocation33_spill] sm:$0xff] }
 0x1b6   : > { %1677 = vmatpush.msra.mxu3 %v4113_v7  ;;  %v4534_v56 = vsub.f32 %v1449_v24, %v4513_v0  ;;  %v4541_v55 = vsub.f32 %v4434_v45, %v4465_v31  ;;  %1054 = vst [vmem:[#allocation2 + $0x130] sm:$0xf] %v1050_v13  ;;  %1483 = vmatpush.msra.mxu0 %v5696_v9  ;;  %v5700_v45 = vld [vmem:[#allocation32_spill] sm:$0xff]  ;;  %v5702_v13 = vld [vmem:[#allocation35_spill] sm:$0xff]  ;;  %v4563_v7 = vld [vmem:[#allocation2 + $0xa8] sm:$0xff] }
 0x1b7   : > { %1548 = vmatpush.msra.mxu1 %v1547_v30  ;;  %v585_v16 = vsel %vm584_vm1, %v581_v29, %v5697_v4  ;;  %v586_v24 = vsel %vm584_vm1, %v5698_v11, %v581_v29  ;;  %v875_v3 = vpop.permute.xlu0 %874  ;;  %v4551_v35 = vsub.f32 %v1445_v20, %v4516_v33  ;;  %1055 = vst [vmem:[#allocation2 + $0x138] sm:$0xf] %v1051_v6  ;;  %v5705_v11 = vld [vmem:[#allocation43_spill] sm:$0xff]  ;;  %vm5710_vm1 = vcmp.lt.s32.totalorder %v3401_v48, 127 }
 0x1b8   : > { %5695 = vst [vmem:[#allocation17_spill] sm:$0xff] %v4534_v56  ;;  %v909_v34 = vsel %vm5701_vm8, %v5700_v45, %v907_v54  ;;  %v912_v30 = vsel %vm5703_vm13, %v907_v54, %v5702_v13  ;;  %1634 = vmatpush.msra.mxu2 %v5704_v1  ;;  %1679 = vmatpush.msra.mxu3 %v5696_v9  ;;  %v5706_v20 = vld [vmem:[#allocation71_spill] sm:$0xff]  ;;  %v5707_v45 = vld [vmem:[#allocation46_spill] sm:$0xff]  ;;  %v5708_v54 = vld [vmem:[#allocation72_spill] sm:$0xff] }
 0x1b9   : > { %5699 = vst [vmem:[#allocation23_spill] sm:$0xff] %v4551_v35  ;;  %v595_v4 = vmul.f32 %v591_v21, %v586_v24  ;;  %v919_v19 = vmul.f32 %v915_v53, %v909_v34  ;;  %v920_v29 = vmul.f32 %v916_v36, %v912_v30  ;;  %1485 = vmatpush.msra.mxu0 %v5705_v11  ;;  %v1559_v6 = vand.u32 4294901760, %v5706_v20  ;;  %v5711_v53 = vld [vmem:[#allocation34_spill] sm:$0xff]  ;;  %vm5712_vm0 = vmmov %vm5710_vm1  ;;  %v5713_v24 = vld [vmem:[#allocation40_spill] sm:$0xff] }
 0x1ba   : > { %1554 = vmatpush.msra.mxu1 %v1553_v37  ;;  %v596_v63 = vmul.f32 %v592_v23, %v585_v16  ;;  %1637 = vmatpush.msra.mxu2 %v5707_v45  ;;  %v1565_v13 = vand.u32 4294901760, %v5708_v54  ;;  %v877_v21 = vsel %vm5710_vm1, %v5709_v49, %v875_v3  ;;  %v880_v37 = vsel %vm5712_vm0, %v875_v3, %v5711_v53  ;;  %v4637_v45 = vld [vmem:[#allocation2 + $0x8] sm:$0xff] }
 0x1bb   : > { %1681 = vmatpush.msra.mxu3 %v5705_v11  ;;  %599 = vst [vmem:[#allocation2 + $0x70] sm:$0xf] %v595_v4  ;;  %v5568_v36 = vand.u32 4294901760, %v4534_v56  ;;  %v927_v23 = vrot.slane %v919_v19, 4  ;;  %v928_v16 = vrot.slane %v920_v29, 4  ;;  %1487 = vmatpush.msra.mxu0 %v5713_v24  ;;  %v883_v34 = vmul.f32 %v877_v21, %v4078_v39  ;;  %v5714_v4 = vld [vmem:[#allocation47_spill] sm:$0xff] }
 0x1bc   : > { %1560 = vmatpush.msra.mxu1 %v1559_v6  ;;  %600 = vst [vmem:[#allocation2 + $0x78] sm:$0xf] %v596_v63  ;;  %v4578_v30 = vsub.f32 %v1437_v8, %v4537_v61  ;;  %1640 = vmatpush.msra.mxu2 %v5714_v4  ;;  %v884_v49 = vmul.f32 %v880_v37, %v4083_v10  ;;  %v5716_v19 = vand.u32 4294901760, %v4483_v25  ;;  %v4593_v63 = vand.u32 4294901760, %v4563_v7  ;;  %v5717_v8 = vld [vmem:[#allocation41_spill] sm:$0xff]  ;;  %v5719_v21 = vld [vmem:[#allocation48_spill] sm:$0xff]  ;;  %v369_v37 = vpop.permute.xlu2 %368 }
 0x1bd   : > { %1683 = vmatpush.msra.mxu3 %v5713_v24  ;;  %v4585_v3 = vmul.f32 %v4301_v52, %v4432_v59  ;;  %935 = vst [vmem:[#allocation2 + $0xf0] sm:$0xf0] %v927_v23  ;;  %1489 = vmatpush.msra.mxu0 %v5717_v8  ;;  %v787_v20 = vmul.f32 %v4078_v39, %v4301_v52  ;;  %v5720_v24 = vld [vmem:[#allocation39_spill] sm:$0xff] }
 0x1be   : > { %v4590_v29 = vsub.f32 %v4483_v25, %v5716_v19  ;;  %1566 = vmatpush.msra.mxu1 %v1565_v13  ;;  %v788_v6 = vmul.f32 %v4083_v10, %v4313_v26  ;;  %v4602_v54 = vmul.f32 %v4313_v26, %v4446_v28  ;;  %936 = vst [vmem:[#allocation2 + $0xf8] sm:$0xf0] %v928_v16  ;;  %v777_v25 = vpop.permute.xlu1 %776  ;;  %v5721_v16 = vld [vmem:[#allocation61_spill] sm:$0xff]  ;;  %v5730_v4 = vld [vmem:[#allocation51_spill] sm:$0xff] }
 0x1bf   : > { %5715 = vst [vmem:[#allocation38_spill] sm:$0xff] %v4585_v3  ;;  %1643 = vmatpush.msra.mxu2 %v5719_v21  ;;  %1685 = vmatpush.msra.mxu3 %v5717_v8  ;;  %v1857_v53 = vsub.f32 %v4534_v56, %v5568_v36  ;;  %v707_v23 = vmul.f32 %v4267_v14, %v4301_v52  ;;  %v5722_v11 = vand.u32 4294901760, %v5721_v16  ;;  %v5723_v8 = vld [vmem:[#allocation10_spill] sm:$0xff]  ;;  %v5724_v36 = vld [vmem:[#allocation25_spill] sm:$0xff]  ;;  %v697_v21 = vpop.permute.xlu0 %696  ;;  %v5729_v16 = vld [vmem:[#allocation44_spill] sm:$0xff] }
 0x1c0   : > { %5718 = vst [vmem:[#allocation37_spill] sm:$0xff] %v4602_v54  ;;  %1491 = vmatpush.msra.mxu0 %v5720_v24  ;;  %v373_v9 = vsel %vm372_vm6, %v369_v37, %v5723_v8  ;;  %v374_v13 = vsel %vm372_vm6, %v5724_v36, %v369_v37  ;;  %v708_v56 = vmul.f32 %v4272_v50, %v4313_v26  ;;  %vm5737_vm6 = vcmp.lt.s32.totalorder %v3401_v48, 9  ;;  %v5806_v48 = vld [vmem:[#allocation40_spill] sm:$0xff] }
 0x1c1   : > { %887 = vst [vmem:[#allocation2 + $0xf0] sm:$0xf] %v883_v34  ;;  %1572 = vmatpush.msra.mxu1 %v5722_v11  ;;  %v5725_v34 = vld [vmem:[#allocation27_spill] sm:$0xff]  ;;  %v782_v11 = vsel %vm5728_vm5, %v5727_v47, %v777_v25  ;;  %1646 = vmatpush.msra.mxu2 %v5729_v16  ;;  %v379_v8 = vmul.f32 %v374_v13, %v4585_v3  ;;  %v5733_v47 = vand.u32 4294901760, %v5732_v44  ;;  %v5736_v13 = vld [vmem:[#allocation21_spill] sm:$0xff]  ;;  %vm5739_vm7 = vmmov %vm5737_vm6 }
 0x1c2   : > { %888 = vst [vmem:[#allocation2 + $0xf8] sm:$0xf] %v884_v49  ;;  %v781_v19 = vsel %vm5726_vm3, %v777_v25, %v5725_v34  ;;  %1687 = vmatpush.msra.mxu3 %v5720_v24  ;;  %v791_v36 = vmul.f32 %v787_v20, %v782_v11  ;;  %1698 = vmatpush.msrb.mxu0 %v5730_v4  ;;  %v5734_v25 = vld [vmem:[#allocation45_spill] sm:$0xff]  ;;  %v5735_v24 = vand.u32 4294901760, %v4551_v35 }
 0x1c3   : > { %v792_v37 = vmul.f32 %v788_v6, %v781_v19  ;;  %v380_v49 = vmul.f32 %v373_v9, %v4602_v54  ;;  %1578 = vmatpush.msra.mxu1 %v5733_v47  ;;  %1649 = vmatpush.msra.mxu2 %v5734_v25  ;;  %v387_v6 = vrot.slane %v379_v8, 4  ;;  %v701_v19 = vsel %vm5737_vm6, %v697_v21, %v5736_v13  ;;  %v5738_v11 = vld [vmem:[#allocation29_spill] sm:$0xff] }
 0x1c4   : > { %1847 = vmatpush.msrb.mxu3 %v5731_v43  ;;  %v1863_v20 = vsub.f32 %v4551_v35, %v5735_v24  ;;  %v702_v9 = vsel %vm5739_vm7, %v5738_v11, %v697_v21  ;;  %v799_v34 = vrot.slane %v791_v36, 4  ;;  %1702 = vmatpush.msrb.mxu0 %v5730_v4  ;;  %v5740_v44 = vld [vmem:[#allocation49_spill] sm:$0xff]  ;;  %v5741_v24 = vld [vmem:[#allocation59_spill] sm:$0xff]  ;;  %v1858_v35 = vand.u32 4294901760, %v1857_v53 }
 0x1c5   : > { %v800_v16 = vrot.slane %v792_v37, 4  ;;  %1802 = vmatpush.msrb.mxu2 %v5740_v44  ;;  %v388_v47 = vrot.slane %v380_v49, 4  ;;  %v711_v25 = vmul.f32 %v707_v23, %v702_v9  ;;  %v5742_v8 = vand.u32 4294901760, %v5741_v24  ;;  %395 = vst [vmem:[#allocation2 + $0x10] sm:$0xf0] %v387_v6  ;;  %v5743_v54 = vld [vmem:[#allocation69_spill] sm:$0xff] }
 0x1c6   : > { %1853 = vmatpush.msrb.mxu3 %v5731_v43  ;;  %v712_v13 = vmul.f32 %v708_v56, %v701_v19  ;;  %v5744_v3 = vld [vmem:[#allocation65_spill] sm:$0xff]  ;;  %v4661_v21 = vand.u32 4294901760, %v4637_v45  ;;  %807 = vst [vmem:[#allocation2 + $0xb0] sm:$0xf0] %v799_v34  ;;  %v5745_v36 = vand.u32 4294901760, %v4389_v12  ;;  %v5746_v23 = vand.u32 4294901760, %v4578_v30  ;;  %v745_v9 = vpop.permute.xlu1 %744 }
 0x1c7   : > { %1584 = vmatpush.msra.mxu1 %v5742_v8  ;;  %v4658_v1 = vsub.f32 %v5744_v3, %v5743_v54  ;;  %1804 = vmatpush.msrb.mxu2 %v5740_v44  ;;  %v719_v43 = vrot.slane %v711_v25, 4  ;;  %v1886_v56 = vand.u32 4294901760, %v4384_v27  ;;  %v5747_v37 = vld [vmem:[#allocation73_spill] sm:$0xff]  ;;  %808 = vst [vmem:[#allocation2 + $0xb8] sm:$0xf0] %v800_v16  ;;  %v5748_v3 = vld [vmem:[#allocation55_spill] sm:$0xff]  ;;  %v671_v12 = vmul.f32 %v4462_v38, %v4078_v39  ;;  %v661_v24 = vpop.permute.xlu0 %660 }
 0x1c8   : > { %1706 = vmatpush.msrb.mxu0 %v5745_v36  ;;  %v1875_v53 = vsub.f32 %v4578_v30, %v5746_v23  ;;  %v1898_v49 = vand.u32 4294901760, %v5747_v37  ;;  %1859 = vmatpush.msrb.mxu3 %v1858_v35  ;;  %v5749_v6 = vand.u32 4294901760, %v5748_v3  ;;  %v1864_v34 = vand.u32 4294901760, %v1863_v20  ;;  %396 = vst [vmem:[#allocation2 + $0x18] sm:$0xf0] %v388_v47  ;;  %v5754_v47 = vld [vmem:[#allocation24_spill] sm:$0xff] }
 0x1c9   : > { %v720_v19 = vrot.slane %v712_v13, 4  ;;  %v672_v25 = vmul.f32 %v4472_v58, %v4083_v10  ;;  %v5750_v11 = vand.u32 4294901760, %v4348_v18  ;;  %1806 = vmatpush.msrb.mxu2 %v4513_v0  ;;  %v1870_v35 = vand.u32 4294901760, %v4590_v29  ;;  %727 = vst [vmem:[#allocation2 + $0x90] sm:$0xf0] %v719_v43  ;;  %v5752_v18 = vld [vmem:[#allocation30_spill] sm:$0xff] }
 0x1ca   : > { %1590 = vmatpush.msra.mxu1 %v5749_v6  ;;  %v5751_v16 = vand.u32 4294901760, %v4541_v55  ;;  %v1892_v8 = vand.u32 4294901760, %v4308_v40  ;;  %v4687_v38 = vsub.f32 %v4563_v7, %v4593_v63  ;;  %1865 = vmatpush.msrb.mxu3 %v1864_v34  ;;  %v749_v58 = vsel %vm5753_vm14, %v745_v9, %v5752_v18  ;;  %v5756_v13 = vld [vmem:[#allocation56_spill] sm:$0xff]  ;;  %v5758_v23 = vld [vmem:[#allocation26_spill] sm:$0xff] }
 0x1cb   : > { %1710 = vmatpush.msrb.mxu0 %v5750_v11  ;;  %v750_v29 = vsel %vm5755_vm2, %v5754_v47, %v745_v9  ;;  %v5757_v36 = vand.u32 4294901760, %v5756_v13  ;;  %v665_v3 = vsel %vm664_vm4, %v661_v24, %v5758_v23  ;;  %v1401_v6 = vld [vmem:[#allocation2 + $0x28] sm:$0xff]  ;;  %v1395_v7 = vld [vmem:[%s5464_s1] sm:$0xff]  ;;  %728 = vst [vmem:[#allocation2 + $0x98] sm:$0xf0] %v720_v19  ;;  %v756_v34 = vmul.f32 %v749_v58, %v4313_v26  ;;  %v5760_v9 = vld [vmem:[#allocation19_spill] sm:$0xff] }
 0x1cc   : > { %v1881_v20 = vsub.f32 %v4541_v55, %v5751_v16  ;;  %v755_v43 = vmul.f32 %v750_v29, %v4301_v52  ;;  %v5759_v11 = vand.u32 4294901760, %v4325_v22  ;;  %v666_v16 = vsel %vm664_vm4, %v5760_v9, %v661_v24  ;;  %1808 = vmatpush.msrb.mxu2 %v4516_v33  ;;  %1871 = vmatpush.msrb.mxu3 %v1870_v35  ;;  %v5762_v58 = vld [vmem:[#allocation62_spill] sm:$0xff] }
 0x1cd   : > { %1596 = vmatpush.msra.mxu1 %v5757_v36  ;;  %v1876_v18 = vand.u32 4294901760, %v1875_v53  ;;  %v1887_v19 = vsub.f32 %v4384_v27, %v1886_v56  ;;  %v675_v52 = vmul.f32 %v671_v12, %v666_v16  ;;  %v676_v47 = vmul.f32 %v672_v25, %v665_v3  ;;  %760 = vst [vmem:[#allocation2 + $0xb8] sm:$0xf] %v756_v34 }
 0x1ce   : > { %1714 = vmatpush.msrb.mxu0 %v5759_v11  ;;  %759 = vst [vmem:[#allocation2 + $0xb0] sm:$0xf] %v755_v43  ;;  %v5761_v26 = vand.u32 4294901760, %v4365_v60  ;;  %v1904_v22 = vand.u32 4294901760, %v4687_v38  ;;  %v5763_v24 = vand.u32 4294901760, %v5762_v58  ;;  %v4724_v53 = vand.u32 4294901760, %v1401_v6  ;;  %1810 = vmatpush.msrb.mxu2 %v4448_v46  ;;  %v529_v34 = vpop.permute.xlu1 %528 }
 0x1cf   : > { %1765 = vmatpush.msrb.mxu1 %v5740_v44  ;;  %v4726_v35 = vand.u32 4294901760, %v1395_v7  ;;  %1877 = vmatpush.msrb.mxu3 %v1876_v18  ;;  %v1882_v12 = vand.u32 4294901760, %v1881_v20  ;;  %v1893_v60 = vsub.f32 %v4308_v40, %v1892_v8  ;;  %v4734_v25 = vsub.f32 %v4637_v45, %v4661_v21  ;;  %679 = vst [vmem:[#allocation2 + $0x90] sm:$0xf] %v675_v52  ;;  %v449_v9 = vpop.permute.xlu0 %448 }
 0x1d0   : > { %1718 = vmatpush.msrb.mxu0 %v5761_v26  ;;  %v4722_v29 = vsub.f32 %v5762_v58, %v5763_v24  ;;  %v5764_v13 = vand.u32 4294901760, %v4316_v17  ;;  %v539_v36 = vmul.f32 %v4078_v39, %v4432_v59  ;;  %v540_v20 = vmul.f32 %v4083_v10, %v4446_v28  ;;  %1812 = vmatpush.msrb.mxu2 %v4537_v61  ;;  %v5768_v26 = vld [vmem:[#allocation14_spill] sm:$0xff] }
 0x1d1   : > { %1767 = vmatpush.msrb.mxu1 %v5740_v44  ;;  %v1899_v23 = vsub.f32 %v5747_v37, %v1898_v49  ;;  %1883 = vmatpush.msrb.mxu3 %v1882_v12  ;;  %v1888_v45 = vand.u32 4294901760, %v1887_v19  ;;  %680 = vst [vmem:[#allocation2 + $0x98] sm:$0xf] %v676_v47  ;;  %v1910_v17 = vand.u32 4294901760, %v4658_v1  ;;  %v460_v3 = vmul.f32 %v4272_v50, %v4446_v28  ;;  %v5766_v19 = vld [vmem:[#allocation18_spill] sm:$0xff] }
 0x1d2   : > { %1722 = vmatpush.msrb.mxu0 %v5764_v13  ;;  %v5765_v43 = vand.u32 4294901760, %v4245_v57  ;;  %v1905_v11 = vsub.f32 %v4687_v38, %v1904_v22  ;;  %v4759_v16 = vsub.f32 %v1401_v6, %v4724_v53  ;;  %v4762_v18 = vsub.f32 %v1395_v7, %v4726_v35  ;;  %1814 = vmatpush.msrb.mxu2 %v4465_v31  ;;  %v5770_v13 = vld [vmem:[#allocation15_spill] sm:$0xff] }
 0x1d3   : > { %1769 = vmatpush.msrb.mxu1 %v4369_v2  ;;  %v459_v2 = vmul.f32 %v4267_v14, %v4432_v59  ;;  %1889 = vmatpush.msrb.mxu3 %v1888_v45  ;;  %v533_v57 = vsel %vm532_vm15, %v529_v34, %v5766_v19  ;;  %v1894_v47 = vand.u32 4294901760, %v1893_v60  ;;  %v453_v6 = vsel %vm452_vm11, %v449_v9, %v5768_v26  ;;  %v5775_v26 = vld [vmem:[#allocation74_spill] sm:$0xff] }
 0x1d4   : > { %1726 = vmatpush.msrb.mxu0 %v5765_v43  ;;  %v544_v12 = vmul.f32 %v540_v20, %v533_v57  ;;  %v5769_v7 = vand.u32 4294901760, %v4201_v41  ;;  %v454_v45 = vsel %vm452_vm11, %v5770_v13, %v449_v9  ;;  %v5771_v43 = vld [vmem:[#allocation67_spill] sm:$0xff]  ;;  %1816 = vmatpush.msrb.mxu2 %v4305_v5  ;;  %v1900_v60 = vand.u32 4294901760, %v1899_v23 }
 0x1d5   : > { %1771 = vmatpush.msrb.mxu1 %v4322_v32  ;;  %v5767_v32 = vld [vmem:[#allocation13_spill] sm:$0xff]  ;;  %v1922_v19 = vand.u32 4294901760, %v5771_v43  ;;  %1895 = vmatpush.msrb.mxu3 %v1894_v47  ;;  %v463_v20 = vmul.f32 %v459_v2, %v454_v45  ;;  %v1928_v9 = vand.u32 4294901760, %v4759_v16  ;;  %v1906_v23 = vand.u32 4294901760, %v1905_v11  ;;  %v5773_v2 = vld [vmem:[#allocation64_spill] sm:$0xff]  ;;  %v5777_v11 = vld [vmem:[#allocation38_spill] sm:$0xff] }
 0x1d6   : > { %v534_v52 = vsel %vm532_vm15, %v5767_v32, %v529_v34  ;;  %1730 = vmatpush.msrb.mxu0 %v5769_v7  ;;  %v464_v34 = vmul.f32 %v460_v3, %v453_v6  ;;  %v552_v57 = vrot.slane %v544_v12, 4  ;;  %v4790_v32 = vand.u32 4294901760, %v4762_v18  ;;  %1818 = vmatpush.msrb.mxu2 %v4233_v42  ;;  %v5778_v7 = vld [vmem:[#allocation37_spill] sm:$0xff]  ;;  %v5779_v45 = vld [vmem:[#allocation46_spill] sm:$0xff] }
 0x1d7   : > { %v543_v24 = vmul.f32 %v539_v36, %v534_v52  ;;  %1773 = vmatpush.msrb.mxu1 %v4252_v51  ;;  %v1911_v36 = vsub.f32 %v4658_v1, %v1910_v17  ;;  %v5772_v51 = vand.u32 4294901760, %v5694_v62  ;;  %1901 = vmatpush.msrb.mxu3 %v1900_v60  ;;  %v471_v52 = vrot.slane %v463_v20, 4  ;;  %v5776_v62 = vld [vmem:[#allocation68_spill] sm:$0xff]  ;;  %v5781_v20 = vld [vmem:[#allocation70_spill] sm:$0xff] }
 0x1d8   : > { %v472_v47 = vrot.slane %v464_v34, 4  ;;  %v5774_v3 = vand.u32 4294901760, %v5773_v2  ;;  %560 = vst [vmem:[#allocation2 + $0x58] sm:$0xf0] %v552_v57  ;;  %1820 = vmatpush.msrb.mxu2 %v5776_v62  ;;  %v423_v12 = vmul.f32 %v5777_v11, %v4078_v39  ;;  %v424_v13 = vmul.f32 %v5778_v7, %v4083_v10  ;;  %v497_v34 = vpop.permute.xlu1 %496  ;;  %v413_v57 = vpop.permute.xlu0 %412  ;;  %v5782_v10 = vld [vmem:[#allocation16_spill] sm:$0xff]  ;;  %1691 = vmatmul.f32.vlgmr.msra.gmra.mxu3 %v4790_v32 }
 0x1d9   : > { %v551_v41 = vrot.slane %v543_v24, 4  ;;  %1734 = vmatpush.msrb.mxu0 %v5772_v51  ;;  %1775 = vmatpush.msrb.mxu1 %v4335_v15  ;;  %v1923_v15 = vsub.f32 %v5771_v43, %v1922_v19  ;;  %v1912_v6 = vand.u32 4294901760, %v1911_v36  ;;  %v1934_v24 = vand.u32 4294901760, %v4734_v25  ;;  %479 = vst [vmem:[#allocation2 + $0x30] sm:$0xf0] %v471_v52  ;;  %v5784_v52 = vld [vmem:[#allocation12_spill] sm:$0xff] }
 0x1da   : > { %1907 = vmatpush.msrb.mxu3 %v1906_v23  ;;  %v5780_v60 = vand.u32 4294901760, %v5779_v45  ;;  %v1929_v36 = vsub.f32 %v4759_v16, %v1928_v9  ;;  %v1495_v39 = vsub.f32 %v4762_v18, %v4790_v32  ;;  %1822 = vmatpush.msrb.mxu2 %v4593_v63  ;;  %480 = vst [vmem:[#allocation2 + $0x38] sm:$0xf0] %v472_v47  ;;  %v5783_v23 = vld [vmem:[#allocation11_spill] sm:$0xff]  ;;  %v5787_v47 = vld [vmem:[#allocation66_spill] sm:$0xff] }
 0x1db   : > { %559 = vst [vmem:[#allocation2 + $0x50] sm:$0xf0] %v551_v41  ;;  %1738 = vmatpush.msrb.mxu0 %v5774_v3  ;;  %1777 = vmatpush.msrb.mxu1 %v5775_v26  ;;  %v1918_v41 = vand.u32 4294901760, %v4722_v29  ;;  %v501_v51 = vsel %vm500_vm9, %v497_v34, %v5782_v10  ;;  %v502_v29 = vsel %vm500_vm9, %v5783_v23, %v497_v34  ;;  %v5785_v45 = vld [vmem:[#allocation47_spill] sm:$0xff]  ;;  %v1924_v34 = vand.u32 4294901760, %v1923_v15  ;;  %v5795_v15 = vld [vmem:[#allocation54_spill] sm:$0xff]  ;;  %vm5801_vm9 = vmmov %vm5693_vm12 }
 0x1dc   : > { %1913 = vmatpush.msrb.mxu3 %v1912_v6  ;;  %v417_v2 = vsel %vm416_vm10, %v413_v57, %v5784_v52  ;;  %v507_v3 = vmul.f32 %v502_v29, %v4432_v59  ;;  %v508_v26 = vmul.f32 %v501_v51, %v4446_v28  ;;  %v5788_v6 = vld [vmem:[#allocation36_spill] sm:$0xff]  ;;  %1824 = vmatpush.msrb.mxu2 %v5743_v54  ;;  %v5791_v29 = vld [vmem:[#allocation53_spill] sm:$0xff] }
 0x1dd   : > { %1742 = vmatpush.msrb.mxu0 %v5780_v60  ;;  %1779 = vmatpush.msrb.mxu1 %v5781_v20  ;;  %v5786_v60 = vand.u32 4294901760, %v5785_v45  ;;  %v418_v20 = vsel %vm416_vm10, %v5788_v6, %v413_v57  ;;  %v1935_v10 = vsub.f32 %v4734_v25, %v1934_v24  ;;  %v428_v23 = vmul.f32 %v424_v13, %v417_v2  ;;  %v5789_v28 = vld [vmem:[#allocation48_spill] sm:$0xff]  ;;  %vm5803_vm10 = vmmov %vm5801_vm9 }
 0x1de   : > { %1919 = vmatpush.msrb.mxu3 %v1918_v41  ;;  %v427_v59 = vmul.f32 %v423_v12, %v418_v20  ;;  %511 = vst [vmem:[#allocation2 + $0x50] sm:$0xf] %v507_v3  ;;  %v5790_v51 = vand.u32 4294901760, %v5789_v28  ;;  %v5792_v52 = vld [vmem:[#allocation52_spill] sm:$0xff]  ;;  %v1930_v57 = vand.u32 4294901760, %v1929_v36  ;;  %v343_v12 = vmul.f32 %v5777_v11, %v4267_v14  ;;  %v5796_v3 = vld [vmem:[#allocation57_spill] sm:$0xff]  ;;  %1652 = vmatmul.f32.vlgmr.msra.gmra.mxu2 %v4762_v18 }
 0x1df   : > { %1746 = vmatpush.msrb.mxu0 %v5786_v60  ;;  %1781 = vmatpush.msrb.mxu1 %v5787_v47  ;;  %512 = vst [vmem:[#allocation2 + $0x58] sm:$0xf] %v508_v26  ;;  %v5793_v45 = vld [vmem:[#allocation44_spill] sm:$0xff]  ;;  %v344_v13 = vmul.f32 %v5778_v7, %v4272_v50  ;;  %v4847_v2 = vand.u32 4294901760, %v1495_v39  ;;  %v1936_v26 = vand.u32 4294901760, %v1935_v10  ;;  %v5797_v36 = vld [vmem:[#allocation45_spill] sm:$0xff] }
 0x1e0   : > { %1826 = vmatpush.msrb.mxu2 %v5792_v52  ;;  %1925 = vmatpush.msrb.mxu3 %v1924_v34  ;;  %v5794_v41 = vand.u32 4294901760, %v5793_v45  ;;  %431 = vst [vmem:[#allocation2 + $0x30] sm:$0xf] %v427_v59  ;;  %v5798_v60 = vand.u32 4294901760, %v5797_v36  ;;  %v5799_v47 = vld [vmem:[#allocation42_spill] sm:$0xff]  ;;  %v333_v6 = vpop.permute.xlu1 %332  ;;  %v5800_v14 = vld [vmem:[#allocation9_spill] sm:$0xff] }
 0x1e1   : > { %1750 = vmatpush.msrb.mxu0 %v5790_v51  ;;  %1783 = vmatpush.msrb.mxu1 %v5791_v29  ;;  %432 = vst [vmem:[#allocation2 + $0x38] sm:$0xf] %v428_v23  ;;  %v337_v50 = vsel %vm5801_vm9, %v333_v6, %v5800_v14  ;;  %v5802_v11 = vld [vmem:[#allocation28_spill] sm:$0xff]  ;;  %v5804_v34 = vld [vmem:[#allocation50_spill] sm:$0xff]  ;;  %v5805_v10 = vld [vmem:[#allocation43_spill] sm:$0xff] }
 0x1e2   : > { %1828 = vmatpush.msrb.mxu2 %v5796_v3  ;;  %1931 = vmatpush.msrb.mxu3 %v1930_v57  ;;  %v338_v7 = vsel %vm5803_vm10, %v5802_v11, %v333_v6  ;;  %v348_v20 = vmul.f32 %v344_v13, %v337_v50  ;;  %v5807_v59 = vld [vmem:[#allocation17_spill] sm:$0xff]  ;;  %v5809_v28 = vld [vmem:[#allocation23_spill] sm:$0xff] }
 0x1e3   : > { %1754 = vmatpush.msrb.mxu0 %v5794_v41  ;;  %1785 = vmatpush.msrb.mxu1 %v5795_v15  ;;  %v347_v39 = vmul.f32 %v343_v12, %v338_v7  ;;  %v5808_v23 = vld [vmem:[#allocation41_spill] sm:$0xff]  ;;  %v5810_v51 = vand.u32 4294901760, %v5807_v59  ;;  %v5811_v29 = vld [vmem:[#allocation39_spill] sm:$0xff]  ;;  %v5813_v45 = vand.u32 4294901760, %v5809_v28  ;;  %v5815_v41 = vand.u32 4294901760, %v4578_v30 }
 0x1e4   : > { %1830 = vmatpush.msrb.mxu2 %v4724_v53  ;;  %1937 = vmatpush.msrb.mxu3 %v1936_v26  ;;  %352 = vst [vmem:[#allocation2 + $0x18] sm:$0xf] %v348_v20  ;;  %v5812_v57 = vld [vmem:[#allocation75_spill] sm:$0xff] }
 0x1e5   : > { %1758 = vmatpush.msrb.mxu0 %v5798_v60  ;;  %1787 = vmatpush.msrb.mxu1 %v5799_v47  ;;  %351 = vst [vmem:[#allocation2 + $0x10] sm:$0xf] %v347_v39  ;;  %v1418_v12 = vld [vmem:[#allocation2 + $0xb0] sm:$0xff] }
 0x1e6   : > { %1497 = vmatmul.f32.vlgmr.msra.gmra.mxu0 %v4847_v2  ;;  %2106 = vmatpush.msra.mxu3 %v5740_v44  ;;  %v1414_v36 = vld [vmem:[#allocation2 + $0x90] sm:$0xff]  ;;  %v5036_v6 = vand.u32 4294901760, %v1418_v12 }
 0x1e7   : > { %1945 = vmatpush.msra.mxu0 %v5804_v34  ;;  %1789 = vmatpush.msrb.mxu1 %v5805_v10  ;;  %v1410_v50 = vld [vmem:[#allocation2 + $0x70] sm:$0xff] }
 0x1e8   : > { %1832 = vmatpush.msrb.mxu2 %v4661_v21  ;;  %2108 = vmatpush.msra.mxu3 %v5740_v44  ;;  %v5053_v10 = vand.u32 4294901760, %v1410_v50 }
 0x1e9   : > { %1948 = vmatpush.msra.mxu0 %v5804_v34  ;;  %1791 = vmatpush.msrb.mxu1 %v5806_v48  ;;  %v5049_v34 = vand.u32 4294901760, %v1414_v36  ;;  %v1406_v48 = vld [vmem:[#allocation2 + $0x50] sm:$0xff] }
 0x1ea   : > { %2039 = vmatpush.msra.mxu2 %v5730_v4  ;;  %1598 = vmatmul.f32.vlgmr.msra.gmra.mxu1 %v4726_v35 }
 0x1eb   : > { %1951 = vmatpush.msra.mxu0 %v5807_v59  ;;  %2110 = vmatpush.msra.mxu3 %v4513_v0 }
 0x1ec   : > { %2043 = vmatpush.msra.mxu2 %v5730_v4  ;;  %1793 = vmatpush.msrb.mxu1 %v5808_v23  ;;  %v5814_v4 = vand.u32 4294901760, %v5812_v57 }
 0x1ed   : > { %1954 = vmatpush.msra.mxu0 %v5809_v28  ;;  %2112 = vmatpush.msra.mxu3 %v4516_v33  ;;  %v5060_v28 = vsub.f32 %v1418_v12, %v5036_v6 }
 0x1ee   : > { %2047 = vmatpush.msra.mxu2 %v5810_v51  ;;  %1795 = vmatpush.msrb.mxu1 %v5811_v29  ;;  %v1451_v29 = vld [vmem:[#allocation2 + $0x1b8] sm:$0xff] }
 0x1ef   : > { %1957 = vmatpush.msra.mxu0 %v5812_v57  ;;  %2114 = vmatpush.msra.mxu3 %v4448_v46 }
 0x1f0   : > { %1998 = vmatpush.msra.mxu1 %v5740_v44  ;;  %2051 = vmatpush.msra.mxu2 %v5813_v45  ;;  %v1402_v45 = vld [vmem:[#allocation2 + $0x30] sm:$0xff] }
 0x1f1   : > { %1760 = vmatmul.f32.vlgmr.msrb.gmra.mxu0 %v4726_v35  ;;  %2116 = vmatpush.msra.mxu3 %v4537_v61 }
 0x1f2   : > { %2000 = vmatpush.msra.mxu1 %v5740_v44  ;;  %1960 = vmatpush.msra.mxu0 %v4578_v30  ;;  %v5816_v44 = vand.u32 4294901760, %v4541_v55  ;;  %v1438_v30 = vld [vmem:[#allocation2 + $0x150] sm:$0xff] }
 0x1f3   : > { %2055 = vmatpush.msra.mxu2 %v5814_v4  ;;  %1797 = vmatmul.f32.vlgmr.msrb.gmra.mxu1 %v4726_v35 }
 0x1f4   : > { %1963 = vmatpush.msra.mxu0 %v4541_v55  ;;  %2002 = vmatpush.msra.mxu1 %v4513_v0  ;;  %v1442_v0 = vld [vmem:[#allocation2 + $0x170] sm:$0xff] }
 0x1f5   : > { %2059 = vmatpush.msra.mxu2 %v5815_v41  ;;  %2118 = vmatpush.msra.mxu3 %v4465_v31  ;;  %v4959_v55 = vand.u32 4294901760, %v1442_v0  ;;  %v5070_v41 = vsub.f32 %v1414_v36, %v5049_v34 }
 0x1f6   : > { %1966 = vmatpush.msra.mxu0 %v4384_v27  ;;  %2004 = vmatpush.msra.mxu1 %v4516_v33 }
 0x1f7   : > { %2063 = vmatpush.msra.mxu2 %v5816_v44  ;;  %2120 = vmatpush.msra.mxu3 %v4305_v5  ;;  %v5072_v44 = vand.u32 4294901760, %v1406_v48  ;;  %v5582_v36 = vand.u32 4294901760, %v5070_v41 }
 0x1f8   : > { %1969 = vmatpush.msra.mxu0 %v4308_v40  ;;  %2006 = vmatpush.msra.mxu1 %v4448_v46  ;;  %v3086_v40 = vld [vmem:[#allocation2 + $0x1c0] sm:$0xff]  ;;  %v1450_v46 = vld [vmem:[#allocation2 + $0x1b0] sm:$0xff] }
 0x1f9   : > { %2067 = vmatpush.msra.mxu2 %v1886_v56  ;;  %2122 = vmatpush.msra.mxu3 %v4233_v42  ;;  %v4925_v27 = vand.u32 4294901760, %v3086_v40 }
 0x1fa   : > { %1972 = vmatpush.msra.mxu0 %v5747_v37  ;;  %2008 = vmatpush.msra.mxu1 %v4537_v61 }
 0x1fb   : > { %2071 = vmatpush.msra.mxu2 %v1892_v8  ;;  %2124 = vmatpush.msra.mxu3 %v5776_v62  ;;  %v1430_v8 = vld [vmem:[#allocation2 + $0x110] sm:$0xff] }
 0x1fc   : > { %1975 = vmatpush.msra.mxu0 %v4687_v38  ;;  %2010 = vmatpush.msra.mxu1 %v4465_v31  ;;  %v4945_v31 = vand.u32 4294901760, %v1450_v46  ;;  %v4981_v38 = vsub.f32 %v1442_v0, %v4959_v55  ;;  %v5080_v0 = vand.u32 4294901760, %v1451_v29 }
 0x1fd   : > { %2075 = vmatpush.msra.mxu2 %v1898_v49  ;;  %2126 = vmatpush.msra.mxu3 %v4593_v63  ;;  %v4976_v49 = vand.u32 4294901760, %v1438_v30 }
 0x1fe   : > { %1978 = vmatpush.msra.mxu0 %v4658_v1  ;;  %2012 = vmatpush.msra.mxu1 %v4305_v5  ;;  %v5817_v5 = vand.u32 4294901760, %v5762_v58  ;;  %v1446_v1 = vld [vmem:[#allocation2 + $0x190] sm:$0xff] }
 0x1ff   : > { %2079 = vmatpush.msra.mxu2 %v1904_v22  ;;  %2128 = vmatpush.msra.mxu3 %v5743_v54  ;;  %v4952_v33 = vand.u32 4294901760, %v1446_v1 }
 0x200   : > { %1981 = vmatpush.msra.mxu0 %v5762_v58  ;;  %2014 = vmatpush.msra.mxu1 %v4233_v42  ;;  %v4938_v42 = vsub.f32 %v3086_v40, %v4925_v27 }
 0x201   : > { %2083 = vmatpush.msra.mxu2 %v1910_v17  ;;  %2130 = vmatpush.msra.mxu3 %v5792_v52  ;;  %v4974_v37 = vsub.f32 %v1446_v1, %v4952_v33  ;;  %v1426_v17 = vld [vmem:[#allocation2 + $0xf0] sm:$0xff] }
 0x202   : > { %1984 = vmatpush.msra.mxu0 %v5771_v43  ;;  %2016 = vmatpush.msra.mxu1 %v5776_v62  ;;  %v4955_v61 = vand.u32 4294901760, %v4938_v42  ;;  %v4997_v43 = vsub.f32 %v1438_v30, %v4976_v49  ;;  %v1398_v1 = vld [vmem:[#allocation2 + $0x10] sm:$0xff] }
 0x203   : > { %2087 = vmatpush.msra.mxu2 %v5817_v5  ;;  %2132 = vmatpush.msra.mxu3 %v5796_v3  ;;  %v1447_v5 = vld [vmem:[#allocation2 + $0x198] sm:$0xff] }
 0x204   : > { %1838 = vmatmul.f32.vlgmr.msrb.gmra.mxu2 %v4847_v2  ;;  %1987 = vmatpush.msra.mxu0 %v4759_v16  ;;  %v2186_v56 = vsub.f32 %v4938_v42, %v4955_v61 }
 0x205   : > { %2018 = vmatpush.msra.mxu1 %v4593_v63  ;;  %2091 = vmatpush.msra.mxu2 %v1922_v19  ;;  %v4965_v63 = vsub.f32 %v1450_v46, %v4945_v31  ;;  %v5591_v19 = vand.u32 4294901760, %v4974_v37  ;;  %v5078_v46 = vsub.f32 %v1410_v50, %v5053_v10  ;;  %v5106_v50 = vsub.f32 %v1451_v29, %v5080_v0 }
 0x206   : > { %2134 = vmatpush.msra.mxu3 %v4724_v53  ;;  %1990 = vmatpush.msra.mxu0 %v4734_v25  ;;  %v4990_v25 = vand.u32 4294901760, %v1430_v8  ;;  %v4994_v16 = vand.u32 4294901760, %v2186_v56  ;;  %v5086_v56 = vand.u32 4294901760, %v1402_v45 }
 0x207   : > { %1939 = vmatmul.f32.vlgmr.msrb.gmra.mxu3 %v4726_v35  ;;  %2020 = vmatpush.msra.mxu1 %v5743_v54  ;;  %v1434_v54 = vld [vmem:[#allocation2 + $0x130] sm:$0xff]  ;;  %v5594_v58 = vand.u32 4294901760, %v4965_v63 }
 0x208   : > { %2095 = vmatpush.msra.mxu2 %v1928_v9  ;;  %2136 = vmatpush.msra.mxu3 %v4661_v21  ;;  %v4985_v22 = vand.u32 4294901760, %v1434_v54  ;;  %v1422_v9 = vld [vmem:[#allocation2 + $0xd0] sm:$0xff]  ;;  %v5016_v15 = vsub.f32 %v1430_v8, %v4990_v25  ;;  %5818 = vst [vmem:[#allocation63_spill] sm:$0xff] %v5086_v56  ;;  %v5581_v8 = vand.u32 4294901760, %v5060_v28 }
 0x209   : > { %2143 = vmatpush.msrb.mxu0 %v4925_v27  ;;  %2022 = vmatpush.msra.mxu1 %v5792_v52  ;;  %v2198_v62 = vsub.f32 %v4965_v63, %v5594_v58  ;;  %v5011_v52 = vand.u32 4294901760, %v1426_v17  ;;  %v5023_v13 = vand.u32 4294901760, %v1422_v9 }
 0x20a   : > { %2339 = vmatpush.msrb.mxu3 %v4925_v27  ;;  %2099 = vmatpush.msra.mxu2 %v1934_v24  ;;  %v5009_v24 = vsub.f32 %v1434_v54, %v4985_v22  ;;  %v5586_v11 = vand.u32 4294901760, %v5016_v15 }
 0x20b   : > { %2145 = vmatpush.msrb.mxu0 %v4925_v27  ;;  %2024 = vmatpush.msra.mxu1 %v5796_v3  ;;  %v5588_v3 = vand.u32 4294901760, %v4997_v43  ;;  %v2199_v60 = vand.u32 4294901760, %v2198_v62  ;;  %v5034_v47 = vsub.f32 %v1426_v17, %v5011_v52  ;;  %v5047_v20 = vsub.f32 %v1422_v9, %v5023_v13  ;;  %v1443_v17 = vld [vmem:[#allocation2 + $0x178] sm:$0xff] }
 0x20c   : > { %2286 = vmatpush.msrb.mxu2 %v4938_v42  ;;  %2341 = vmatpush.msrb.mxu3 %v4925_v27  ;;  %v5587_v14 = vand.u32 4294901760, %v5009_v24  ;;  %v2228_v57 = vsub.f32 %v5016_v15, %v5586_v11  ;;  %v5091_v62 = vand.u32 4294901760, %v1447_v5 }
 0x20d   : > { %2101 = vmatmul.f32.vlgmr.msra.gmra.mxu2 %v4726_v35  ;;  %2147 = vmatpush.msrb.mxu0 %v4945_v31  ;;  %v2216_v39 = vsub.f32 %v4997_v43, %v5588_v3  ;;  %v5584_v51 = vand.u32 4294901760, %v5034_v47  ;;  %v5583_v40 = vand.u32 4294901760, %v5047_v20  ;;  %v1423_v3 = vld [vmem:[#allocation2 + $0xd8] sm:$0xff] }
 0x20e   : > { %2289 = vmatpush.msrb.mxu2 %v4938_v42  ;;  %2343 = vmatpush.msrb.mxu3 %v4945_v31  ;;  %v2222_v23 = vsub.f32 %v5009_v24, %v5587_v14  ;;  %v2229_v9 = vand.u32 4294901760, %v2228_v57  ;;  %v5121_v29 = vsub.f32 %v1447_v5, %v5091_v62  ;;  %v5592_v5 = vand.u32 4294901760, %v5106_v50 }
 0x20f   : > { %2026 = vmatpush.msra.mxu1 %v4724_v53  ;;  %1993 = vmatmul.f32.vlgmr.msra.gmra.mxu0 %v4762_v18  ;;  %v5590_v53 = vand.u32 4294901760, %v4981_v38  ;;  %v2217_v4 = vand.u32 4294901760, %v2216_v39  ;;  %v2234_v54 = vsub.f32 %v5034_v47, %v5584_v51  ;;  %v2240_v12 = vsub.f32 %v5047_v20, %v5583_v40 }
 0x210   : > { %2138 = vmatmul.f32.vlgmr.msra.gmra.mxu3 %v4726_v35  ;;  %2149 = vmatpush.msrb.mxu0 %v4952_v33  ;;  %v2223_v30 = vand.u32 4294901760, %v2222_v23  ;;  %v5585_v23 = vand.u32 4294901760, %v5078_v46  ;;  %5820 = vst [vmem:[#allocation22_spill] sm:$0xff] %v5121_v29 }
 0x211   : > { %2292 = vmatpush.msrb.mxu2 %v4965_v63  ;;  %2345 = vmatpush.msrb.mxu3 %v4952_v33  ;;  %v2210_v26 = vsub.f32 %v4981_v38, %v5590_v53  ;;  %v2235_v39 = vand.u32 4294901760, %v2234_v54 }
 0x212   : > { %2028 = vmatpush.msra.mxu1 %v4661_v21  ;;  %2151 = vmatpush.msrb.mxu0 %v4959_v55  ;;  %v2204_v21 = vsub.f32 %v4974_v37, %v5591_v19 }
 0x213   : > { %2032 = vmatmul.f32.vlgmr.msra.gmra.mxu1 %v4790_v32  ;;  %2295 = vmatpush.msrb.mxu2 %v4974_v37  ;;  %v2211_v59 = vand.u32 4294901760, %v2210_v26  ;;  %v5100_v26 = vand.u32 4294901760, %v1398_v1 }
 0x214   : > { %2188 = vmatpush.msrb.mxu1 %v4994_v16  ;;  %2347 = vmatpush.msrb.mxu3 %v4959_v55  ;;  %v2205_v7 = vand.u32 4294901760, %v2204_v21  ;;  %v5098_v21 = vsub.f32 %v1406_v48, %v5072_v44  ;;  %v2246_v48 = vsub.f32 %v5060_v28, %v5581_v8  ;;  %v1431_v8 = vld [vmem:[#allocation2 + $0x118] sm:$0xff] }
 0x215   : > { %2153 = vmatpush.msrb.mxu0 %v4976_v49  ;;  %2298 = vmatpush.msrb.mxu2 %v4981_v38  ;;  %5819 = vst [vmem:[#allocation20_spill] sm:$0xff] %v5100_v26  ;;  %v5130_v54 = vsub.f32 %v1398_v1, %v5100_v26  ;;  %v2258_v1 = vsub.f32 %v5078_v46, %v5585_v23  ;;  %v5157_v14 = vand.u32 4294901760, %v1431_v8 }
 0x216   : > { %2194 = vmatpush.msrb.mxu1 %v4994_v16  ;;  %2349 = vmatpush.msrb.mxu3 %v4976_v49 }
 0x217   : > { %2155 = vmatpush.msrb.mxu0 %v4985_v22  ;;  %2301 = vmatpush.msrb.mxu2 %v4997_v43  ;;  %v5597_v11 = vand.u32 4294901760, %v5130_v54  ;;  %v5185_v58 = vsub.f32 %v1431_v8, %v5157_v14 }
 0x218   : > { %2200 = vmatpush.msrb.mxu1 %v2199_v60  ;;  %2351 = vmatpush.msrb.mxu3 %v4985_v22  ;;  %v1439_v60 = vld [vmem:[#allocation2 + $0x158] sm:$0xff] }
 0x219   : > { %2157 = vmatpush.msrb.mxu0 %v4990_v25  ;;  %2304 = vmatpush.msrb.mxu2 %v5009_v24  ;;  %v5123_v57 = vand.u32 4294901760, %v1439_v60 }
 0x21a   : > { %2206 = vmatpush.msrb.mxu1 %v2205_v7  ;;  %2353 = vmatpush.msrb.mxu3 %v4990_v25  ;;  %v5108_v7 = vand.u32 4294901760, %v1443_v17 }
 0x21b   : > { %2159 = vmatpush.msrb.mxu0 %v5011_v52  ;;  %2307 = vmatpush.msrb.mxu2 %v5016_v15  ;;  %v5150_v51 = vsub.f32 %v1439_v60, %v5123_v57  ;;  %v2539_v60 = vsub.f32 %v5106_v50, %v5592_v5 }
 0x21c   : > { %2212 = vmatpush.msrb.mxu1 %v2211_v59  ;;  %2355 = vmatpush.msrb.mxu3 %v5011_v52  ;;  %v5115_v59 = vsub.f32 %v1402_v45, %v5086_v56  ;;  %v2252_v45 = vsub.f32 %v5070_v41, %v5582_v36 }
 0x21d   : > { %2161 = vmatpush.msrb.mxu0 %v5023_v13  ;;  %2310 = vmatpush.msrb.mxu2 %v5034_v47 }
 0x21e   : > { %2218 = vmatpush.msrb.mxu1 %v2217_v4  ;;  %2357 = vmatpush.msrb.mxu3 %v5023_v13  ;;  %v1435_v4 = vld [vmem:[#allocation2 + $0x138] sm:$0xff]  ;;  %v5593_v36 = vand.u32 4294901760, %v5115_v59 }
 0x21f   : > { %2163 = vmatpush.msrb.mxu0 %v5036_v6  ;;  %2313 = vmatpush.msrb.mxu2 %v5047_v20  ;;  %v5144_v40 = vand.u32 4294901760, %v1435_v4 }
 0x220   : > { %2224 = vmatpush.msrb.mxu1 %v2223_v30  ;;  %2359 = vmatpush.msrb.mxu3 %v5036_v6  ;;  %v2241_v30 = vand.u32 4294901760, %v2240_v12  ;;  %v2247_v12 = vand.u32 4294901760, %v2246_v48  ;;  %v2253_v48 = vand.u32 4294901760, %v2252_v45  ;;  %v2259_v45 = vand.u32 4294901760, %v2258_v1  ;;  %v1419_v1 = vld [vmem:[#allocation2 + $0xb8] sm:$0xff] }
 0x221   : > { %2165 = vmatpush.msrb.mxu0 %v5049_v34  ;;  %2316 = vmatpush.msrb.mxu2 %v5060_v28  ;;  %v5170_v53 = vsub.f32 %v1435_v4, %v5144_v40  ;;  %v2276_v4 = vsub.f32 %v5130_v54, %v5597_v11 }
 0x222   : > { %2230 = vmatpush.msrb.mxu1 %v2229_v9  ;;  %2361 = vmatpush.msrb.mxu3 %v5049_v34  ;;  %v5589_v9 = vand.u32 4294901760, %v5098_v21 }
 0x223   : > { %2167 = vmatpush.msrb.mxu0 %v5053_v10  ;;  %2319 = vmatpush.msrb.mxu2 %v5070_v41 }
 0x224   : > { %2236 = vmatpush.msrb.mxu1 %v2235_v39  ;;  %2363 = vmatpush.msrb.mxu3 %v5053_v10  ;;  %v5137_v39 = vsub.f32 %v1443_v17, %v5108_v7  ;;  %v5595_v17 = vand.u32 4294901760, %v5121_v29  ;;  %v2264_v23 = vsub.f32 %v5098_v21, %v5589_v9  ;;  %v2270_v9 = vsub.f32 %v5115_v59, %v5593_v36 }
 0x225   : > { %2169 = vmatpush.msrb.mxu0 %v5072_v44  ;;  %2322 = vmatpush.msrb.mxu2 %v5078_v46 }
 0x226   : > { %5821 = vst [vmem:[#allocation32_spill] sm:$0xff] %v5137_v39  ;;  %2242 = vmatpush.msrb.mxu1 %v2241_v30  ;;  %2365 = vmatpush.msrb.mxu3 %v5072_v44  ;;  %v1427_v30 = vld [vmem:[#allocation2 + $0xf8] sm:$0xff]  ;;  %v2265_v36 = vand.u32 4294901760, %v2264_v23  ;;  %v5822_v5 = vand.u32 4294901760, %v5137_v39  ;;  %v2271_v23 = vand.u32 4294901760, %v2270_v9  ;;  %v5603_v9 = vand.u32 4294901760, %v5185_v58 }
 0x227   : > { %2171 = vmatpush.msrb.mxu0 %v5086_v56  ;;  %2325 = vmatpush.msrb.mxu2 %v5098_v21  ;;  %v5172_v19 = vand.u32 4294901760, %v1427_v30 }
 0x228   : > { %2248 = vmatpush.msrb.mxu1 %v2247_v12  ;;  %2367 = vmatpush.msrb.mxu3 %v5086_v56  ;;  %v5187_v12 = vand.u32 4294901760, %v1423_v3  ;;  %v5823_v56 = vand.u32 4294901760, %v4965_v63  ;;  %v5825_v63 = vand.u32 4294901760, %v4974_v37  ;;  %v5827_v37 = vand.u32 4294901760, %v4981_v38 }
 0x229   : > { %2173 = vmatpush.msrb.mxu0 %v5100_v26  ;;  %2328 = vmatpush.msrb.mxu2 %v5115_v59  ;;  %v5197_v8 = vsub.f32 %v1427_v30, %v5172_v19  ;;  %v5828_v38 = vand.u32 4294901760, %v4997_v43 }
 0x22a   : > { %2254 = vmatpush.msrb.mxu1 %v2253_v48  ;;  %2369 = vmatpush.msrb.mxu3 %v5100_v26  ;;  %v2545_v48 = vsub.f32 %v5121_v29, %v5595_v17  ;;  %v2540_v17 = vand.u32 4294901760, %v2539_v60  ;;  %v1415_v26 = vld [vmem:[#allocation2 + $0x98] sm:$0xff]  ;;  %v5199_v29 = vand.u32 4294901760, %v1419_v1  ;;  %v5209_v30 = vsub.f32 %v1423_v3, %v5187_v12 }
 0x22b   : > { %2380 = vmatpush.msra.mxu0 %v4955_v61  ;;  %2331 = vmatpush.msrb.mxu2 %v5130_v54  ;;  %v5211_v11 = vand.u32 4294901760, %v1415_v26 }
 0x22c   : > { %2529 = vmatpush.msra.mxu3 %v4994_v16  ;;  %2260 = vmatpush.msrb.mxu1 %v2259_v45  ;;  %v2551_v45 = vsub.f32 %v5137_v39, %v5822_v5  ;;  %v2546_v60 = vand.u32 4294901760, %v2545_v48  ;;  %v5824_v5 = vand.u32 4294901760, %v5150_v51  ;;  %v1407_v48 = vld [vmem:[#allocation2 + $0x58] sm:$0xff]  ;;  %v5221_v3 = vsub.f32 %v1419_v1, %v5199_v29 }
 0x22d   : > { %2384 = vmatpush.msra.mxu0 %v4955_v61  ;;  %2484 = vmatpush.msra.mxu2 %v4925_v27  ;;  %v5234_v1 = vsub.f32 %v1415_v26, %v5211_v11 }
 0x22e   : > { %2535 = vmatpush.msra.mxu3 %v4994_v16  ;;  %2266 = vmatpush.msrb.mxu1 %v2265_v36  ;;  %v2557_v39 = vsub.f32 %v5150_v51, %v5824_v5  ;;  %v1411_v16 = vld [vmem:[#allocation2 + $0x78] sm:$0xff]  ;;  %v2277_v36 = vand.u32 4294901760, %v2276_v4 }
 0x22f   : > { %2388 = vmatpush.msra.mxu0 %v5823_v56  ;;  %2486 = vmatpush.msra.mxu2 %v4925_v27  ;;  %v2552_v56 = vand.u32 4294901760, %v2551_v45  ;;  %v5223_v5 = vand.u32 4294901760, %v1411_v16 }
 0x230   : > { %2541 = vmatpush.msra.mxu3 %v2540_v17  ;;  %2272 = vmatpush.msrb.mxu1 %v2271_v23  ;;  %v5826_v17 = vand.u32 4294901760, %v5170_v53  ;;  %v5604_v23 = vand.u32 4294901760, %v5197_v8  ;;  %v2558_v45 = vand.u32 4294901760, %v2557_v39 }
 0x231   : > { %2392 = vmatpush.msra.mxu0 %v5825_v63  ;;  %2488 = vmatpush.msra.mxu2 %v5080_v0  ;;  %v5236_v63 = vand.u32 4294901760, %v1407_v48  ;;  %v5247_v26 = vsub.f32 %v1411_v16, %v5223_v5 }
 0x232   : > { %2547 = vmatpush.msra.mxu3 %v2546_v60  ;;  %2278 = vmatpush.msrb.mxu1 %v2277_v36  ;;  %v2563_v4 = vsub.f32 %v5170_v53, %v5826_v17  ;;  %v2569_v60 = vsub.f32 %v5185_v58, %v5603_v9  ;;  %v2580_v36 = vand.u32 4294901760, %v5209_v30  ;;  %v1403_v17 = vld [vmem:[#allocation2 + $0x38] sm:$0xff]  ;;  %v5829_v9 = vand.u32 4294901760, %v5009_v24 }
 0x233   : > { %2396 = vmatpush.msra.mxu0 %v5827_v37  ;;  %2490 = vmatpush.msra.mxu2 %v5091_v62  ;;  %v2586_v37 = vand.u32 4294901760, %v5221_v3  ;;  %v5252_v43 = vand.u32 4294901760, %v1403_v17  ;;  %v5260_v16 = vsub.f32 %v1407_v48, %v5236_v63  ;;  %v5830_v24 = vand.u32 4294901760, %v5016_v15 }
 0x234   : > { %2447 = vmatpush.msra.mxu1 %v4925_v27  ;;  %2553 = vmatpush.msra.mxu3 %v2552_v56  ;;  %v2564_v39 = vand.u32 4294901760, %v2563_v4  ;;  %v2575_v56 = vsub.f32 %v5197_v8, %v5604_v23  ;;  %v2570_v4 = vand.u32 4294901760, %v2569_v60  ;;  %v2592_v23 = vand.u32 4294901760, %v5234_v1 }
 0x235   : > { %2400 = vmatpush.msra.mxu0 %v5828_v38  ;;  %2492 = vmatpush.msra.mxu2 %v5108_v7  ;;  %v1399_v38 = vld [vmem:[#allocation2 + $0x18] sm:$0xff]  ;;  %v2598_v60 = vand.u32 4294901760, %v5247_v26  ;;  %v5831_v48 = vand.u32 4294901760, %v5034_v47  ;;  %v5276_v15 = vsub.f32 %v1403_v17, %v5252_v43 }
 0x236   : > { %2449 = vmatpush.msra.mxu1 %v4925_v27  ;;  %2559 = vmatpush.msra.mxu3 %v2558_v45  ;;  %v2581_v45 = vsub.f32 %v5209_v30, %v2580_v36 }
 0x237   : > { %2404 = vmatpush.msra.mxu0 %v5829_v9  ;;  %2494 = vmatpush.msra.mxu2 %v5123_v57  ;;  %v2587_v9 = vsub.f32 %v5221_v3, %v2586_v37  ;;  %v2599_v47 = vsub.f32 %v5247_v26, %v2598_v60 }
 0x238   : > { %2451 = vmatpush.msra.mxu1 %v4945_v31  ;;  %2565 = vmatpush.msra.mxu3 %v2564_v39  ;;  %v2576_v31 = vand.u32 4294901760, %v2575_v56  ;;  %v5270_v39 = vand.u32 4294901760, %v1399_v38  ;;  %v2593_v56 = vsub.f32 %v5234_v1, %v2592_v23 }
 0x239   : > { %2408 = vmatpush.msra.mxu0 %v5830_v24  ;;  %2496 = vmatpush.msra.mxu2 %v5144_v40  ;;  %v5832_v24 = vand.u32 4294901760, %v5047_v20  ;;  %v2610_v20 = vand.u32 4294901760, %v5276_v15 }
 0x23a   : > { %2453 = vmatpush.msra.mxu1 %v4952_v33  ;;  %2571 = vmatpush.msra.mxu3 %v2570_v4  ;;  %v2582_v33 = vand.u32 4294901760, %v2581_v45  ;;  %v2604_v4 = vand.u32 4294901760, %v5260_v16  ;;  %v5291_v17 = vsub.f32 %v1399_v38, %v5270_v39  ;;  %v5833_v45 = vand.u32 4294901760, %v5060_v28 }
 0x23b   : > { %2412 = vmatpush.msra.mxu0 %v5831_v48  ;;  %2498 = vmatpush.msra.mxu2 %v5157_v14  ;;  %v2600_v28 = vand.u32 4294901760, %v2599_v47  ;;  %v5835_v38 = vand.u32 4294901760, %v5078_v46  ;;  %v2611_v48 = vsub.f32 %v5276_v15, %v2610_v20  ;;  %v5837_v46 = vand.u32 4294901760, %v5115_v59 }
 0x23c   : > { %2455 = vmatpush.msra.mxu1 %v4959_v55  ;;  %2577 = vmatpush.msra.mxu3 %v2576_v31  ;;  %v2588_v55 = vand.u32 4294901760, %v2587_v9  ;;  %v2605_v31 = vsub.f32 %v5260_v16, %v2604_v4  ;;  %v5834_v9 = vand.u32 4294901760, %v5070_v41  ;;  %v5846_v59 = vand.u32 4294901760, %v5150_v51 }
 0x23d   : > { %2416 = vmatpush.msra.mxu0 %v5832_v24  ;;  %2500 = vmatpush.msra.mxu2 %v5172_v19 }
 0x23e   : > { %2457 = vmatpush.msra.mxu1 %v4976_v49  ;;  %2583 = vmatpush.msra.mxu3 %v2582_v33  ;;  %v2594_v49 = vand.u32 4294901760, %v2593_v56  ;;  %v2606_v41 = vand.u32 4294901760, %v2605_v31  ;;  %v2612_v33 = vand.u32 4294901760, %v2611_v48 }
 0x23f   : > { %2420 = vmatpush.msra.mxu0 %v5833_v45  ;;  %2502 = vmatpush.msra.mxu2 %v5187_v12 }
 0x240   : > { %2459 = vmatpush.msra.mxu1 %v4985_v22  ;;  %2589 = vmatpush.msra.mxu3 %v2588_v55  ;;  %v2616_v22 = vand.u32 4294901760, %v5291_v17 }
 0x241   : > { %2424 = vmatpush.msra.mxu0 %v5834_v9  ;;  %2504 = vmatpush.msra.mxu2 %v5199_v29 }
 0x242   : > { %2461 = vmatpush.msra.mxu1 %v4990_v25  ;;  %2595 = vmatpush.msra.mxu3 %v2594_v49  ;;  %v5836_v25 = vand.u32 4294901760, %v5098_v21 }
 0x243   : > { %2428 = vmatpush.msra.mxu0 %v5835_v38  ;;  %2506 = vmatpush.msra.mxu2 %v5211_v11 }
 0x244   : > { %2463 = vmatpush.msra.mxu1 %v5011_v52  ;;  %2601 = vmatpush.msra.mxu3 %v2600_v28  ;;  %v2617_v52 = vsub.f32 %v5291_v17, %v2616_v22 }
 0x245   : > { %2432 = vmatpush.msra.mxu0 %v5836_v25  ;;  %2508 = vmatpush.msra.mxu2 %v5223_v5 }
 0x246   : > { %2465 = vmatpush.msra.mxu1 %v5023_v13  ;;  %2607 = vmatpush.msra.mxu3 %v2606_v41  ;;  %v5838_v13 = vand.u32 4294901760, %v5130_v54  ;;  %v2618_v21 = vand.u32 4294901760, %v2617_v52  ;;  %v5847_v54 = vand.u32 4294901760, %v5170_v53 }
 0x247   : > { %2334 = vmatmul.f32.vlgmr.msrb.gmra.mxu2 %v4762_v18  ;;  %2436 = vmatpush.msra.mxu0 %v5837_v46 }
 0x248   : > { %2467 = vmatpush.msra.mxu1 %v5036_v6  ;;  %2510 = vmatpush.msra.mxu2 %v5236_v63  ;;  %v5839_v6 = vld [vmem:[#allocation63_spill] sm:$0xff] }
 0x249   : > { %2613 = vmatpush.msra.mxu3 %v2612_v33  ;;  %2179 = vmatmul.f32.vlgmr.msrb.gmra.mxu0 %v4847_v2 }
 0x24a   : > { %2373 = vmatmul.f32.vlgmr.msrb.gmra.mxu3 %v4790_v32  ;;  %2440 = vmatpush.msra.mxu0 %v5838_v13 }
 0x24b   : > { %2469 = vmatpush.msra.mxu1 %v5049_v34  ;;  %2512 = vmatpush.msra.mxu2 %v5252_v43  ;;  %v5840_v34 = vand.u32 4294901760, %v5106_v50 }
 0x24c   : > { %2619 = vmatpush.msra.mxu3 %v2618_v21  ;;  %2280 = vmatmul.f32.vlgmr.msrb.gmra.mxu1 %v4726_v35 }
 0x24d   : > { %2627 = vmatpush.msrb.mxu0 %v4938_v42  ;;  %2471 = vmatpush.msra.mxu1 %v5053_v10  ;;  %v5842_v10 = vld [vmem:[#allocation20_spill] sm:$0xff] }
 0x24e   : > { %2788 = vmatpush.msrb.mxu3 %v4925_v27  ;;  %2514 = vmatpush.msra.mxu2 %v5270_v39 }
 0x24f   : > { %2630 = vmatpush.msrb.mxu0 %v4938_v42  ;;  %2473 = vmatpush.msra.mxu1 %v5072_v44  ;;  %v5841_v42 = vld [vmem:[#allocation22_spill] sm:$0xff] }
 0x250   : > { %2721 = vmatpush.msrb.mxu2 %v4955_v61  ;;  %2790 = vmatpush.msrb.mxu3 %v4925_v27  ;;  %v5843_v44 = vand.u32 4294901760, %v5841_v42 }
 0x251   : > { %2633 = vmatpush.msrb.mxu0 %v5106_v50  ;;  %2475 = vmatpush.msra.mxu1 %v5839_v6 }
 0x252   : > { %2725 = vmatpush.msrb.mxu2 %v4955_v61  ;;  %2792 = vmatpush.msrb.mxu3 %v5080_v0  ;;  %v5844_v61 = vld [vmem:[#allocation32_spill] sm:$0xff] }
 0x253   : > { %2442 = vmatmul.f32.vlgmr.msra.gmra.mxu0 %v4726_v35  ;;  %2477 = vmatpush.msra.mxu1 %v5842_v10  ;;  %v5845_v50 = vand.u32 4294901760, %v5844_v61 }
 0x254   : > { %2729 = vmatpush.msrb.mxu2 %v5840_v34  ;;  %2636 = vmatpush.msrb.mxu0 %v5841_v42 }
 0x255   : > { %2794 = vmatpush.msrb.mxu3 %v5091_v62  ;;  %2479 = vmatmul.f32.vlgmr.msra.gmra.mxu1 %v4726_v35 }
 0x256   : > { %2733 = vmatpush.msrb.mxu2 %v5843_v44  ;;  %2639 = vmatpush.msrb.mxu0 %v5844_v61 }
 0x257   : > { %2680 = vmatpush.msrb.mxu1 %v4925_v27  ;;  %2796 = vmatpush.msrb.mxu3 %v5108_v7 }
 0x258   : > { %2642 = vmatpush.msrb.mxu0 %v5150_v51  ;;  %2737 = vmatpush.msrb.mxu2 %v5845_v50  ;;  %v5849_v51 = vand.u32 4294901760, %v5197_v8 }
 0x259   : > { %2682 = vmatpush.msrb.mxu1 %v4925_v27  ;;  %2798 = vmatpush.msrb.mxu3 %v5123_v57  ;;  %v5848_v27 = vand.u32 4294901760, %v5185_v58 }
 0x25a   : > { %2645 = vmatpush.msrb.mxu0 %v5170_v53  ;;  %2741 = vmatpush.msrb.mxu2 %v5846_v59 }
 0x25b   : > { %2684 = vmatpush.msrb.mxu1 %v5080_v0  ;;  %2800 = vmatpush.msrb.mxu3 %v5144_v40  ;;  %v1692_v53 = vpop.f32.mrf.mxu3 }
 0x25c   : > { %2648 = vmatpush.msrb.mxu0 %v5185_v58  ;;  %2745 = vmatpush.msrb.mxu2 %v5847_v54 }
 0x25d   : > { %2686 = vmatpush.msrb.mxu1 %v5091_v62  ;;  %2802 = vmatpush.msrb.mxu3 %v5157_v14 }
 0x25e   : > { %2651 = vmatpush.msrb.mxu0 %v5197_v8  ;;  %2749 = vmatpush.msrb.mxu2 %v5848_v27 }
 0x25f   : > { %2688 = vmatpush.msrb.mxu1 %v5108_v7  ;;  %2804 = vmatpush.msrb.mxu3 %v5172_v19 }
 0x260   : > { %2654 = vmatpush.msrb.mxu0 %v5209_v30  ;;  %2753 = vmatpush.msrb.mxu2 %v5849_v51  ;;  %v3206_v51 = vmov 0  }
 0x261   : > { %2690 = vmatpush.msrb.mxu1 %v5123_v57  ;;  %2806 = vmatpush.msrb.mxu3 %v5187_v12 }
 0x262   : > { %2657 = vmatpush.msrb.mxu0 %v5221_v3  ;;  %2757 = vmatpush.msrb.mxu2 %v2580_v36 }
 0x263   : > { %2692 = vmatpush.msrb.mxu1 %v5144_v40  ;;  %2808 = vmatpush.msrb.mxu3 %v5199_v29  ;;  %v1498_v58 = vpop.f32.mrf.mxu0 }
 0x264   : > { %2660 = vmatpush.msrb.mxu0 %v5234_v1  ;;  %2761 = vmatpush.msrb.mxu2 %v2586_v37 }
 0x265   : > { %2694 = vmatpush.msrb.mxu1 %v5157_v14  ;;  %2810 = vmatpush.msrb.mxu3 %v5211_v11 }
 0x266   : > { %2663 = vmatpush.msrb.mxu0 %v5247_v26  ;;  %2765 = vmatpush.msrb.mxu2 %v2592_v23 }
 0x267   : > { %2696 = vmatpush.msrb.mxu1 %v5172_v19  ;;  %2812 = vmatpush.msrb.mxu3 %v5223_v5  ;;  %v1653_v19 = vpop.f32.mrf.mxu2 }
 0x268   : > { %2666 = vmatpush.msrb.mxu0 %v5260_v16  ;;  %2769 = vmatpush.msrb.mxu2 %v2598_v60 }
 0x269   : > { %2698 = vmatpush.msrb.mxu1 %v5187_v12  ;;  %2814 = vmatpush.msrb.mxu3 %v5236_v63 }
 0x26a   : > { %2520 = vmatmul.f32.vlgmr.msra.gmra.mxu2 %v4847_v2  ;;  %2621 = vmatmul.f32.vlgmr.msra.gmra.mxu3 %v4726_v35  ;;  %v1599_v2 = vpop.f32.mrf.mxu1 }
 0x26b   : > { %2669 = vmatpush.msrb.mxu0 %v5276_v15  ;;  %2700 = vmatpush.msrb.mxu1 %v5199_v29  ;;  %v1600_v8 = vadd.f32 %v1599_v2, %v1498_v58 }
 0x26c   : > { %2773 = vmatpush.msrb.mxu2 %v2604_v4  ;;  %2816 = vmatpush.msrb.mxu3 %v5252_v43 }
 0x26d   : > { %2672 = vmatpush.msrb.mxu0 %v5291_v17  ;;  %2702 = vmatpush.msrb.mxu1 %v5211_v11 }
 0x26e   : > { %2777 = vmatpush.msrb.mxu2 %v2610_v20  ;;  %2818 = vmatpush.msrb.mxu3 %v5270_v39  ;;  %v1761_v14 = vpop.f32.mrf.mxu0 }
 0x26f   : > { %2704 = vmatpush.msrb.mxu1 %v5223_v5  ;;  %2675 = vmatmul.f32.vlgmr.msrb.gmra.mxu0 %v4762_v18 }
 0x270   : > { %2781 = vmatpush.msrb.mxu2 %v2616_v22  ;;  %3076 = vset.pattern.permute.xlu1 %v3206_v51 }
 0x271   : > { %2706 = vmatpush.msrb.mxu1 %v5236_v63 }
 0x272   : > { %2783 = vmatmul.f32.vlgmr.msrb.gmra.mxu2 %v4726_v35  ;;  %2820 = vmatmul.f32.vlgmr.msrb.gmra.mxu3 %v4726_v35  ;;  %v1798_v18 = vpop.f32.mrf.mxu1 }
 0x273   : > { %2708 = vmatpush.msrb.mxu1 %v5252_v43 }
 0x275   : > { %2710 = vmatpush.msrb.mxu1 %v5270_v39 }
 0x276   : > { %2714 = vmatmul.f32.vlgmr.msrb.gmra.mxu1 %v4790_v32  ;;  %v1654_v32 = vadd.f32 %v1653_v19, %v1600_v8 }
 0x278   : > { %v1693_v63 = vadd.f32 %v1692_v53, %v1654_v32 }
 0x27a   : > { %v1762_v16 = vadd.f32 %v1761_v14, %v1693_v63 }
 0x27c   : > { %v1799_v24 = vadd.f32 %v1798_v18, %v1762_v16 }
 0x27e   : > { %v2824_v20 = vmul.f32 0.2, %v1799_v24 }
 0x280   : > { %v2828_v41 = vmax.f32 %v1799_v24, %v2824_v20 }
 0x282   : > { %v2837_v13 = vmul.f32 %v2828_v41, %v2828_v41 }
 0x287   : > { %v1839_v11 = vpop.f32.mrf.mxu2 }
 0x28a   : > { %v1940_v40 = vpop.f32.mrf.mxu3 }
 0x28b   : > { %v1941_v35 = vadd.f32 %v1940_v40, %v1839_v11 }
 0x28c   : > { %v1994_v62 = vpop.f32.mrf.mxu0 }
 0x28d   : > { %v1995_v3 = vadd.f32 %v1994_v62, %v1941_v35 }
 0x290   : > { %v2033_v0 = vpop.f32.mrf.mxu1  ;;  %v2102_v7 = vpop.f32.mrf.mxu2 }
 0x291   : > { %v2034_v1 = vadd.f32 %v2033_v0, %v1995_v3 }
 0x293   : > { %v2139_v29 = vpop.f32.mrf.mxu3  ;;  %v2103_v43 = vadd.f32 %v2102_v7, %v2034_v1 }
 0x295   : > { %v2140_v15 = vadd.f32 %v2139_v29, %v2103_v43 }
 0x297   : > { %v2825_v45 = vmul.f32 0.2, %v2140_v15 }
 0x299   : > { %v2829_v28 = vmax.f32 %v2140_v15, %v2825_v45 }
 0x29b   : > { %v2838_v46 = vmul.f32 %v2829_v28, %v2829_v28  ;;  %v2832_v6 = vadd.f32 %v2829_v28, %v2828_v41 }
 0x29d   : > { %v2841_v44 = vadd.f32 %v2838_v46, %v2837_v13 }
 0x2c6   : > { %v2180_v12 = vpop.f32.mrf.mxu0 }
 0x2c9   : > { %v2281_v57 = vpop.f32.mrf.mxu1 }
 0x2ca   : > { %v2282_v30 = vadd.f32 %v2281_v57, %v2180_v12  ;;  %v2335_v23 = vpop.f32.mrf.mxu2  ;;  %v2861_v57 = vld [vmem:[%s205_s9] sm:$0xff] }
 0x2cc   : > { %v2336_v5 = vadd.f32 %v2335_v23, %v2282_v30  ;;  %v3207_v30 = vmov 1  }
 0x2cd   : > { %v2374_v36 = vpop.f32.mrf.mxu3  ;;  %3078 = vset.pattern.permute.xlu0 %v3207_v30 }
 0x2ce   : > { %v2375_v37 = vadd.f32 %v2374_v36, %v2336_v5 }
 0x2d0   : > { %v2443_v26 = vpop.f32.mrf.mxu0 }
 0x2d1   : > { %v2444_v60 = vadd.f32 %v2443_v26, %v2375_v37 }
 0x2d2   : > { %v2480_v39 = vpop.f32.mrf.mxu1 }
 0x2d3   : > { %v2481_v55 = vadd.f32 %v2480_v39, %v2444_v60 }
 0x2d5   : > { %v2826_v49 = vmul.f32 0.2, %v2481_v55 }
 0x2d7   : > { %v2830_v25 = vmax.f32 %v2481_v55, %v2826_v49 }
 0x2d9   : > { %v2839_v34 = vmul.f32 %v2830_v25, %v2830_v25  ;;  %v2833_v10 = vadd.f32 %v2832_v6, %v2830_v25 }
 0x2db   : > { %v2842_v59 = vadd.f32 %v2841_v44, %v2839_v34 }
 0x2ec   : > { %v2676_v17 = vpop.f32.mrf.mxu0 }
 0x2ed   : > { %v2521_v56 = vpop.f32.mrf.mxu2  ;;  %v2622_v4 = vpop.f32.mrf.mxu3 }
 0x2ee   : > { %v2623_v47 = vadd.f32 %v2622_v4, %v2521_v56 }
 0x2f0   : > { %v2677_v31 = vadd.f32 %v2676_v17, %v2623_v47 }
 0x2f3   : > { %v2715_v9 = vpop.f32.mrf.mxu1 }
 0x2f4   : > { %v2716_v22 = vadd.f32 %v2715_v9, %v2677_v31 }
 0x2f5   : > { %v2784_v38 = vpop.f32.mrf.mxu2  ;;  %v2821_v48 = vpop.f32.mrf.mxu3 }
 0x2f6   : > { %v2785_v52 = vadd.f32 %v2784_v38, %v2716_v22 }
 0x2f8   : > { %v2822_v33 = vadd.f32 %v2821_v48, %v2785_v52 }
 0x2fa   : > { %v2827_v21 = vmul.f32 0.2, %v2822_v33 }
 0x2fc   : > { %v2831_v42 = vmax.f32 %v2822_v33, %v2827_v21 }
 0x2fe   : > { %v2834_v61 = vadd.f32 %v2833_v10, %v2831_v42  ;;  %v2840_v50 = vmul.f32 %v2831_v42, %v2831_v42 }
 0x300   : > { %2835 = vadd.xlane.f32.xlu2 %v2834_v61  ;;  %v2843_v54 = vadd.f32 %v2842_v59, %v2840_v50 }
 0x302   : > { %2844 = vadd.xlane.f32.xlu0 %v2843_v54 }
 0x373   : > { %v2836_v27 = vpop.xlane.xlu2 %2835 }
 0x374   : > { %v2846_v2 = vmul.f32 0.001953125, %v2836_v27 }
 0x375   : > { %v2845_v58 = vpop.xlane.xlu0 %2844 }
 0x376   : > { %v2848_v19 = vmul.f32 %v2846_v2, %v2846_v2  ;;  %v2847_v53 = vmul.f32 0.001953125, %v2845_v58 }
 0x378   : > { %v2849_v18 = vsub.f32 %v2847_v53, %v2848_v19 }
 0x37a   : > { %v2850_v14 = vadd.f32 1e-08, %v2849_v18 }
 0x37c   : > { %3083 = vrsqrt.f32 %v2850_v14  ;;  %vm2857_vm15 = vweird.f32 %v2850_v14 }
 0x382   : > { %v3084_v11 = vpop.eup %3083 }
 0x383   : > { %v2852_v40 = vmul.f32 %v3084_v11, %v2850_v14  ;;  %vm2858_vm11 = vweird.f32 %v3084_v11 }
 0x384   : > { %vm2859_vm4 = vmor %vm2857_vm15, %vm2858_vm11 }
 0x385   : > { %v2853_v0 = vmul.f32 %v3084_v11, %v2852_v40 }
 0x387   : > { %v2854_v62 = vmul.f32 0.5, %v2853_v0 }
 0x389   : > { %v2855_v7 = vsub.f32 1.5, %v2854_v62 }
 0x38b   : > { %v2856_v29 = vmul.f32 %v3084_v11, %v2855_v7 }
 0x38d   : > { %v2860_v35 = vsel %vm2859_vm4, %v3084_v11, %v2856_v29 }
 0x38e   : > { %v2862_v12 = vmul.f32 %v2861_v57, %v2860_v35 }
 0x390   : > { %v2863_v8 = vmul.f32 %v2862_v12, %v2846_v2 }
 0x392   : > { %2865 = vrot.lane.b32.xlu1 %v2863_v8, %s3200_s22  ;;  %s201_s22 = scalar_lea.vmem [#allocation6], %s2998_s10 }
 0x393   : > { %s2905_s27 = sshll.u32 %s201_s22, 4  ;;  %s2906_s27 = int_to_ptr.vmem [resolvable:$true] %s2905_s27 }
 0x39a   : > { %2871 = vperm.xlu1 %3076, %v2862_v12  }
 0x3a2   : > { %3077 = vset.pattern.permute.xlu1 %v3207_v30 }
 0x404   : > { %v2866_v23 = vpop.permute.xlu1 %2865 }
 0x405   : > { %v2868_v3 = vsub.f32 %v2861_v57, %v2866_v23 }
 0x407   : > { %2880 = vperm.xlu1 %3077, %v2868_v3  }
 0x40c   : > { %v2872_v32 = vpop.permute.xlu1 %2871 }
 0x40d   : > { %v2874_v5 = vmul.f32 %v2872_v32, %v2828_v41  ;;  %v2875_v36 = vmul.f32 %v2872_v32, %v2829_v28  ;;  %v2876_v1 = vmul.f32 %v2872_v32, %v2830_v25  ;;  %v2877_v63 = vmul.f32 %v2872_v32, %v2831_v42 }
 0x479   : > { %v2881_v37 = vpop.permute.xlu1 %2880 }
 0x47a   : > { %v2883_v26 = vadd.f32 %v2881_v37, %v2874_v5  ;;  %v2884_v43 = vadd.f32 %v2881_v37, %v2875_v36  ;;  %v2885_v16 = vadd.f32 %v2881_v37, %v2876_v1  ;;  %v2886_v60 = vadd.f32 %v2881_v37, %v2877_v63 }
 0x47c   : > { %2887 = vst [vmem:[%s201_s22] sm:$0xff] %v2883_v26 }
 0x47d   : > { %2888 = vst [vmem:[%s201_s22 + $0x8] sm:$0xff] %v2884_v43 }
 0x47e   : > { %2889 = vst [vmem:[%s201_s22 + $0x10] sm:$0xff] %v2885_v16 }
 0x47f   : > { %2890 = vst [vmem:[%s201_s22 + $0x18] sm:$0xff] %v2886_v60 }
 0x480   : > { %3144 = shalt.err (!%p3141_p7)
}
 0x481   : > { %3009 = dma.vmem_to_hbm [thread:$0]  (%p3278_p11), %s2906_s27, 512, %s2908_s28, %s2892_s16  }
 0x482 PF: > { %s2919_s26 = sand.u32 1, %s3171_s12   ;;  %p5850_p5 = scmp.ge.s32.totalorder %s3183_s15, 2 }
 0x483   : > { %s2920_s8 = scalar_lea.sflag [#allocation5], %s2919_s26 }
 0x484   : > { %p3016_p8 = pnand %p5850_p5, %p3282_p12 }
 0x486   : > { %p3017_p10 = pneg %p3016_p8 }
 0x488   : > { %3166 = dma.done.wait (%p3017_p10), %s2920_s8, 512  }
 0x489   : > { %3168 = vsyncadd (%p3017_p10), %s2920_s8, 4294966784  ;;  %p16_p2 = scmp.ge.s32.totalorder %s3253_s18, 4   ;;  %s5851_s12 = smov %s3175_s13 }
 0x48a   : > { %s5852_s13 = smov %s3179_s14  ;;  %s5853_s14 = smov %s3265_s21 }
 0x48b   : > { %s5854_s15 = smov %s3253_s18  ;;  %18 = sbr.rel (!%p16_p2) target bundleno = 5 (0x5), region = 109 }
 0x490   :  { %2926 = vsyncpa [#allocation4], 1 }
 0x491   :  { %2928 = vsyncpa [#allocation4 + $0x1], 1 }
 0x492   :  { %2929 = vsyncpa [#allocation5], 1 }
 0x493   :  { %2931 = vsyncpa [#allocation5 + $0x1], 1 }

</bundles_post_ra>
